<compile_context>
chip_gen: v6e
topology: v6e:2x2x1
jax: 0.10.0
libtpu: 0.0.40
codegen_flags: <defaults>
</compile_context>

<pallas_src>
import jax
import jax.numpy as jnp
from jax.experimental import pallas as pl
from jax.experimental.pallas import tpu as pltpu


def _round_up(a, b):
    return (a + b - 1) // b * b


def _aux_kernel(p_ref, wc_ref, bc_ref, w1_ref, b1_ref, w2_ref, b2_ref, out_ref):
    _, nt, C = p_ref.shape                 # block = (16, n_tile, C), n_tile % 8 == 0

    # 1x1 conv for all 16 spatial positions of this batch tile in one matmul.
    # Rows are ordered s * n_tile + n (spatial-major).  bf16 in, f32 accumulate.
    p = p_ref[...].reshape(16 * nt, C)     # leading-dim fold, minor dims untouched
    conv = jnp.dot(p, wc_ref[...], preferred_element_type=jnp.float32)
    conv = jnp.maximum(conv + bc_ref[...], 0.0)                # (16*nt, 128) f32

    # Regroup to (n_tile, 2048) so fc1 is a single K=2048 matmul.  Each spatial
    # slice is a whole-vreg sublane block (nt % 8 == 0) and the concatenation
    # offsets are multiples of 128 lanes -> cheap layout plumbing.
    #   flat[n, s*128 + c] = conv[s*nt + n, c]; w1 was re-laid-out to match.
    flat = jnp.concatenate(
        [conv[s * nt:(s + 1) * nt, :] for s in range(16)], axis=-1)
    flat = flat.astype(jnp.bfloat16)                           # (nt, 2048)

    h = jnp.dot(flat, w1_ref[...], preferred_element_type=jnp.float32)
    h = jnp.maximum(h + b1_ref[...], 0.0)                      # (nt, 1024) f32

    # Dropout(0.7): identity at inference time.
    # TODO(synk): training-mode stochastic dropout (pltpu.prng_random_bits) not implemented.
    out = jnp.dot(h.astype(jnp.bfloat16), w2_ref[...],
                  preferred_element_type=jnp.float32) + b2_ref[...]
    out_ref[...] = out.astype(out_ref.dtype)                   # (nt, cpad)


def prepare_params(params, num_classes):
    """One-time weight re-layout + bf16 cast (hoisted out of the forward path)."""
    wc, bc, w1, b1, w2, b2 = (params["wc"], params["bc"], params["w1"],
                              params["b1"], params["w2"], params["b2"])
    C = wc.shape[1]
    cpad = _round_up(num_classes, 128)
    # conv weight: (128, C, 1, 1) -> (C, 128)
    wc_t = wc.reshape(128, C).T.astype(jnp.bfloat16)
    # kernel flat index is s*128 + c; torch flatten index is c*16 + s:
    #   w1_f[s*128 + c, j] = w1[j, c*16 + s]
    w1_f = (w1.reshape(1024, 128, 16).transpose(2, 1, 0)
              .reshape(2048, 1024).astype(jnp.bfloat16))
    w2_t = jnp.pad(w2.T, ((0, 0), (0, cpad - num_classes))).astype(jnp.bfloat16)
    return {
        "wc": wc_t,
        "bc": bc.reshape(1, 128).astype(jnp.float32),
        "w1": w1_f,
        "b1": b1.reshape(1, 1024).astype(jnp.float32),
        "w2": w2_t,
        "b2": jnp.pad(b2.reshape(1, num_classes).astype(jnp.float32),
                      ((0, 0), (0, cpad - num_classes))),
    }


def auxiliary_forward(x, prepped, num_classes, n_tile_max=128):
    """x: (N, C, H, W) float32 NCHW; prepped: prepare_params() output.
    Returns (N, num_classes) float32."""
    N, C, H, W = x.shape
    # TODO(synk): real GoogLeNet aux input is 14x14 where torch AdaptiveAvgPool2d
    # uses uneven windows; this glue only handles H, W divisible by 4.
    assert H % 4 == 0 and W % 4 == 0, "glue pooling assumes H, W divisible by 4"

    cpad = _round_up(num_classes, 128)
    n_tile = min(_round_up(N, 8), n_tile_max)   # multiple of 8; VMEM-safe on v7x
    n_pad = _round_up(N, n_tile)

    # --- glue: adaptive average pool to (4,4); (s = h*4+w, n, c) layout, bf16 ---
    pooled = x.reshape(N, C, 4, H // 4, 4, W // 4).mean(axis=(3, 5))   # (N, C, 4, 4)
    p_s = pooled.reshape(N, C, 16).transpose(2, 0, 1)                   # (16, N, C)
    if n_pad != N:
        p_s = jnp.pad(p_s, ((0, 0), (0, n_pad - N), (0, 0)))
    p_s = p_s.astype(jnp.bfloat16)

    flops = 2 * n_pad * (16 * C * 128 + 2048 * 1024 + 1024 * cpad)
    bytes_accessed = (16 * n_pad * C * 2 + C * 128 * 2 + 2048 * 1024 * 2
                      + 1024 * cpad * 2 + (128 + 1024 + cpad) * 4 + n_pad * cpad * 4)

    out_full = pl.pallas_call(
        _aux_kernel,
        out_shape=jax.ShapeDtypeStruct((n_pad, cpad), jnp.float32),
        grid_spec=pltpu.PrefetchScalarGridSpec(
            num_scalar_prefetch=0,
            grid=(n_pad // n_tile,),
            in_specs=[
                pl.BlockSpec((16, n_tile, C), lambda i: (0, i, 0)),  # pooled, per batch tile
                # Grid-invariant parameters: constant block index -> fetched once,
                # never re-streamed across batch tiles.
                pl.BlockSpec((C, 128), lambda i: (0, 0)),            # conv weight
                pl.BlockSpec((1, 128), lambda i: (0, 0)),            # conv bias
                pl.BlockSpec((2048, 1024), lambda i: (0, 0)),        # fc1 weight (single block)
                pl.BlockSpec((1, 1024), lambda i: (0, 0)),           # fc1 bias
                pl.BlockSpec((1024, cpad), lambda i: (0, 0)),        # fc2 weight
                pl.BlockSpec((1, cpad), lambda i: (0, 0)),           # fc2 bias
            ],
            out_specs=pl.BlockSpec((n_tile, cpad), lambda i: (i, 0)),
        ),
        compiler_params=pltpu.CompilerParams(
            dimension_semantics=("parallel",),      # batch tiles across TCs (v7x)
            vmem_limit_bytes=32 * 1024 * 1024),     # fits v7x 64 MiB with headroom
        cost_estimate=pl.CostEstimate(flops=flops, transcendentals=0,
                                      bytes_accessed=bytes_accessed),
    )(p_s, prepped["wc"], prepped["bc"], prepped["w1"], prepped["b1"],
      prepped["w2"], prepped["b2"])
    return out_full[:N, :num_classes]


def init_params(key, in_channels, num_classes):
    ks = jax.random.split(key, 6)
    params = {
        "wc": jax.random.normal(ks[0], (128, in_channels, 1, 1), jnp.float32) * 0.05,
        "bc": jax.random.normal(ks[1], (128,), jnp.float32) * 0.01,
        "w1": jax.random.normal(ks[2], (1024, 2048), jnp.float32) * 0.02,
        "b1": jax.random.normal(ks[3], (1024,), jnp.float32) * 0.01,
        "w2": jax.random.normal(ks[4], (num_classes, 1024), jnp.float32) * 0.02,
        "b2": jax.random.normal(ks[5], (num_classes,), jnp.float32) * 0.01,
    }
    return params


def auxiliary_reference(x, params, num_classes):
    """Pure-JAX f32 mirror of the PyTorch forward (eval mode) for validation."""
    N, C, H, W = x.shape
    pooled = x.reshape(N, C, 4, H // 4, 4, W // 4).mean(axis=(3, 5))   # (N, C, 4, 4)
    conv = jnp.einsum("nchw,oc->nohw", pooled, params["wc"].reshape(128, C))
    conv = conv + params["bc"][None, :, None, None]
    conv = jnp.maximum(conv, 0.0)
    flat = conv.reshape(N, 2048)                                       # channel-major flatten
    h = flat @ params["w1"].T + params["b1"]
    h = jnp.maximum(h, 0.0)
    out = h @ params["w2"].T + params["b2"]
    return out


if __name__ == "__main__":
    in_channels = 4
    num_classes = 10
    N, H, W = 2, 16, 16

    key = jax.random.PRNGKey(0)
    kx, kp = jax.random.split(key)
    x = jax.random.normal(kx, (N, in_channels, H, W), jnp.float32)
    params = init_params(kp, in_channels, num_classes)

    # One-time parameter re-layout (hoisted out of the forward path).
    prepped = jax.block_until_ready(prepare_params(params, num_classes))

    fwd = jax.jit(lambda xx, pp: auxiliary_forward(xx, pp, num_classes))
    out = jax.block_until_ready(fwd(x, prepped))

    ref = auxiliary_reference(x, params, num_classes)
    assert out.shape == (N, num_classes)
    # bf16 operands for conv/fc1/fc2 (f32 accumulation) -> loosened tolerance vs f32 ref.
    assert jnp.allclose(out, ref, atol=5e-3, rtol=5e-2), "mismatch vs reference"

    print("KERNEL_OK")
</pallas_src>

<mosaic_0001>
module attributes {stable_mosaic.version = 11 : i64} {
  func.func @_aux_kernel(%arg0: i32, %arg1: memref<16x8x4xbf16, #tpu.memory_space<vmem>>, %arg2: memref<4x128xbf16, #tpu.memory_space<vmem>>, %arg3: memref<1x128xf32, #tpu.memory_space<vmem>>, %arg4: memref<2048x1024xbf16, #tpu.memory_space<vmem>>, %arg5: memref<1x1024xf32, #tpu.memory_space<vmem>>, %arg6: memref<1024x128xbf16, #tpu.memory_space<vmem>>, %arg7: memref<1x128xf32, #tpu.memory_space<vmem>>, %arg8: memref<8x128xf32, #tpu.memory_space<vmem>>) attributes {dimension_semantics = [#tpu.dimension_semantics<parallel>], iteration_bounds = array<i64: 1>, scalar_prefetch = 0 : i64, scratch_operands = 0 : i64, tpu.core_type = #tpu.core_type<tc>, window_params = [{transform_indices = @transform_0, window_bounds = array<i64: 16, 8, 4>}, {pipeline_mode = #tpu.pipeline_mode<synchronous>, transform_indices = @transform_1, window_bounds = array<i64: 4, 128>}, {pipeline_mode = #tpu.pipeline_mode<synchronous>, transform_indices = @transform_2, window_bounds = array<i64: 1, 128>}, {pipeline_mode = #tpu.pipeline_mode<synchronous>, transform_indices = @transform_3, window_bounds = array<i64: 2048, 1024>}, {pipeline_mode = #tpu.pipeline_mode<synchronous>, transform_indices = @transform_4, window_bounds = array<i64: 1, 1024>}, {pipeline_mode = #tpu.pipeline_mode<synchronous>, transform_indices = @transform_5, window_bounds = array<i64: 1024, 128>}, {pipeline_mode = #tpu.pipeline_mode<synchronous>, transform_indices = @transform_6, window_bounds = array<i64: 1, 128>}, {transform_indices = @transform_7, window_bounds = array<i64: 8, 128>}]} {
    %c0 = arith.constant 0 : index
    %c0_0 = arith.constant 0 : index
    %c0_1 = arith.constant 0 : index
    %0 = vector.load %arg1[%c0, %c0_0, %c0_1] : memref<16x8x4xbf16, #tpu.memory_space<vmem>>, vector<16x8x4xbf16>
    %1 = vector.shape_cast %0 : vector<16x8x4xbf16> to vector<128x4xbf16>
    %c0_2 = arith.constant 0 : index
    %c0_3 = arith.constant 0 : index
    %2 = vector.load %arg2[%c0_2, %c0_3] : memref<4x128xbf16, #tpu.memory_space<vmem>>, vector<4x128xbf16>
    %cst = arith.constant dense<0.000000e+00> : vector<128x128xf32>
    %3 = tpu.matmul %1, %2, %cst {dimension_numbers = #tpu.dot_dimension_numbers<[1], [0], [0], [1], [0, 0, 1, 1], [], []>} : vector<128x4xbf16>, vector<4x128xbf16>, vector<128x128xf32> -> vector<128x128xf32>
    %c0_4 = arith.constant 0 : index
    %c0_5 = arith.constant 0 : index
    %4 = vector.load %arg3[%c0_4, %c0_5] : memref<1x128xf32, #tpu.memory_space<vmem>>, vector<1x128xf32>
    %5 = vector.broadcast %4 : vector<1x128xf32> to vector<128x128xf32>
    %6 = arith.addf %3, %5 : vector<128x128xf32>
    %cst_6 = arith.constant 0.000000e+00 : f32
    %7 = vector.broadcast %cst_6 : f32 to vector<128x128xf32>
    %8 = arith.maximumf %6, %7 : vector<128x128xf32>
    %9 = vector.extract_strided_slice %8 {offsets = [0, 0], sizes = [8, 128], strides = [1, 1]} : vector<128x128xf32> to vector<8x128xf32>
    %10 = vector.extract_strided_slice %8 {offsets = [8, 0], sizes = [8, 128], strides = [1, 1]} : vector<128x128xf32> to vector<8x128xf32>
    %11 = vector.extract_strided_slice %8 {offsets = [16, 0], sizes = [8, 128], strides = [1, 1]} : vector<128x128xf32> to vector<8x128xf32>
    %12 = vector.extract_strided_slice %8 {offsets = [24, 0], sizes = [8, 128], strides = [1, 1]} : vector<128x128xf32> to vector<8x128xf32>
    %13 = vector.extract_strided_slice %8 {offsets = [32, 0], sizes = [8, 128], strides = [1, 1]} : vector<128x128xf32> to vector<8x128xf32>
    %14 = vector.extract_strided_slice %8 {offsets = [40, 0], sizes = [8, 128], strides = [1, 1]} : vector<128x128xf32> to vector<8x128xf32>
    %15 = vector.extract_strided_slice %8 {offsets = [48, 0], sizes = [8, 128], strides = [1, 1]} : vector<128x128xf32> to vector<8x128xf32>
    %16 = vector.extract_strided_slice %8 {offsets = [56, 0], sizes = [8, 128], strides = [1, 1]} : vector<128x128xf32> to vector<8x128xf32>
    %17 = vector.extract_strided_slice %8 {offsets = [64, 0], sizes = [8, 128], strides = [1, 1]} : vector<128x128xf32> to vector<8x128xf32>
    %18 = vector.extract_strided_slice %8 {offsets = [72, 0], sizes = [8, 128], strides = [1, 1]} : vector<128x128xf32> to vector<8x128xf32>
    %19 = vector.extract_strided_slice %8 {offsets = [80, 0], sizes = [8, 128], strides = [1, 1]} : vector<128x128xf32> to vector<8x128xf32>
    %20 = vector.extract_strided_slice %8 {offsets = [88, 0], sizes = [8, 128], strides = [1, 1]} : vector<128x128xf32> to vector<8x128xf32>
    %21 = vector.extract_strided_slice %8 {offsets = [96, 0], sizes = [8, 128], strides = [1, 1]} : vector<128x128xf32> to vector<8x128xf32>
    %22 = vector.extract_strided_slice %8 {offsets = [104, 0], sizes = [8, 128], strides = [1, 1]} : vector<128x128xf32> to vector<8x128xf32>
    %23 = vector.extract_strided_slice %8 {offsets = [112, 0], sizes = [8, 128], strides = [1, 1]} : vector<128x128xf32> to vector<8x128xf32>
    %24 = vector.extract_strided_slice %8 {offsets = [120, 0], sizes = [8, 128], strides = [1, 1]} : vector<128x128xf32> to vector<8x128xf32>
    %25 = tpu.concatenate %9, %10, %11, %12, %13, %14, %15, %16, %17, %18, %19, %20, %21, %22, %23, %24 in 1 : vector<8x128xf32>, vector<8x128xf32>, vector<8x128xf32>, vector<8x128xf32>, vector<8x128xf32>, vector<8x128xf32>, vector<8x128xf32>, vector<8x128xf32>, vector<8x128xf32>, vector<8x128xf32>, vector<8x128xf32>, vector<8x128xf32>, vector<8x128xf32>, vector<8x128xf32>, vector<8x128xf32>, vector<8x128xf32> -> vector<8x2048xf32>
    %26 = arith.truncf %25 : vector<8x2048xf32> to vector<8x2048xbf16>
    %c0_7 = arith.constant 0 : index
    %c0_8 = arith.constant 0 : index
    %27 = vector.load %arg4[%c0_7, %c0_8] : memref<2048x1024xbf16, #tpu.memory_space<vmem>>, vector<2048x1024xbf16>
    %cst_9 = arith.constant dense<0.000000e+00> : vector<8x1024xf32>
    %28 = tpu.matmul %26, %27, %cst_9 {dimension_numbers = #tpu.dot_dimension_numbers<[1], [0], [0], [1], [0, 0, 1, 1], [], []>} : vector<8x2048xbf16>, vector<2048x1024xbf16>, vector<8x1024xf32> -> vector<8x1024xf32>
    %c0_10 = arith.constant 0 : index
    %c0_11 = arith.constant 0 : index
    %29 = vector.load %arg5[%c0_10, %c0_11] : memref<1x1024xf32, #tpu.memory_space<vmem>>, vector<1x1024xf32>
    %30 = vector.broadcast %29 : vector<1x1024xf32> to vector<8x1024xf32>
    %31 = arith.addf %28, %30 : vector<8x1024xf32>
    %cst_12 = arith.constant 0.000000e+00 : f32
    %32 = vector.broadcast %cst_12 : f32 to vector<8x1024xf32>
    %33 = arith.maximumf %31, %32 : vector<8x1024xf32>
    %34 = arith.truncf %33 : vector<8x1024xf32> to vector<8x1024xbf16>
    %c0_13 = arith.constant 0 : index
    %c0_14 = arith.constant 0 : index
    %35 = vector.load %arg6[%c0_13, %c0_14] : memref<1024x128xbf16, #tpu.memory_space<vmem>>, vector<1024x128xbf16>
    %cst_15 = arith.constant dense<0.000000e+00> : vector<8x128xf32>
    %36 = tpu.matmul %34, %35, %cst_15 {dimension_numbers = #tpu.dot_dimension_numbers<[1], [0], [0], [1], [0, 0, 1, 1], [], []>} : vector<8x1024xbf16>, vector<1024x128xbf16>, vector<8x128xf32> -> vector<8x128xf32>
    %c0_16 = arith.constant 0 : index
    %c0_17 = arith.constant 0 : index
    %37 = vector.load %arg7[%c0_16, %c0_17] : memref<1x128xf32, #tpu.memory_space<vmem>>, vector<1x128xf32>
    %38 = vector.broadcast %37 : vector<1x128xf32> to vector<8x128xf32>
    %39 = arith.addf %36, %38 : vector<8x128xf32>
    %c0_18 = arith.constant 0 : index
    %c0_19 = arith.constant 0 : index
    %40 = vector.load %arg8[%c0_18, %c0_19] : memref<8x128xf32, #tpu.memory_space<vmem>>, vector<8x128xf32>
    tpu.vector_store %arg8[%c0_18, %c0_19], %39 {strides = array<i32>} : memref<8x128xf32, #tpu.memory_space<vmem>>, vector<8x128xf32>,
    return
  }
  func.func @transform_0(%arg0: i32) -> (i32, i32, i32) {
    %c0_i32 = arith.constant 0 : i32
    %c0_i32_0 = arith.constant 0 : i32
    %c0_i32_1 = arith.constant 0 : i32
    return %c0_i32, %arg0, %c0_i32_0 : i32, i32, i32
  }
  func.func @transform_1(%arg0: i32) -> (i32, i32) {
    %c0_i32 = arith.constant 0 : i32
    %c0_i32_0 = arith.constant 0 : i32
    %c0_i32_1 = arith.constant 0 : i32
    return %c0_i32, %c0_i32_0 : i32, i32
  }
  func.func @transform_2(%arg0: i32) -> (i32, i32) {
    %c0_i32 = arith.constant 0 : i32
    %c0_i32_0 = arith.constant 0 : i32
    %c0_i32_1 = arith.constant 0 : i32
    return %c0_i32, %c0_i32_0 : i32, i32
  }
  func.func @transform_3(%arg0: i32) -> (i32, i32) {
    %c0_i32 = arith.constant 0 : i32
    %c0_i32_0 = arith.constant 0 : i32
    %c0_i32_1 = arith.constant 0 : i32
    return %c0_i32, %c0_i32_0 : i32, i32
  }
  func.func @transform_4(%arg0: i32) -> (i32, i32) {
    %c0_i32 = arith.constant 0 : i32
    %c0_i32_0 = arith.constant 0 : i32
    %c0_i32_1 = arith.constant 0 : i32
    return %c0_i32, %c0_i32_0 : i32, i32
  }
  func.func @transform_5(%arg0: i32) -> (i32, i32) {
    %c0_i32 = arith.constant 0 : i32
    %c0_i32_0 = arith.constant 0 : i32
    %c0_i32_1 = arith.constant 0 : i32
    return %c0_i32, %c0_i32_0 : i32, i32
  }
  func.func @transform_6(%arg0: i32) -> (i32, i32) {
    %c0_i32 = arith.constant 0 : i32
    %c0_i32_0 = arith.constant 0 : i32
    %c0_i32_1 = arith.constant 0 : i32
    return %c0_i32, %c0_i32_0 : i32, i32
  }
  func.func @transform_7(%arg0: i32) -> (i32, i32) {
    %c0_i32 = arith.constant 0 : i32
    %c0_i32_0 = arith.constant 0 : i32
    return %arg0, %c0_i32 : i32, i32
  }
}

</mosaic_0001>

<bundles_post_ra>
// kernel: _lambda_.1
= control target key start
LH: loop header
LB: loop body
LE: loop exit
PB: predicated region body
PF: predicated region fallthrough
CT: control target
= control target key end

     0   :  { %12 = vsyncpa [#allocation3], 0  ;;  %s10283_s0 = inlined_call_operand.vmem [shape: bf16[16,8,4], index: 0, kind: input, shape index: {}]   ;;  %s10284_s1 = inlined_call_operand.hbm [shape: bf16[4,128], index: 1, kind: input, shape index: {}]   ;;  %s10285_s2 = inlined_call_operand.hbm [shape: f32[1,128], index: 2, kind: input, shape index: {}]   ;;  %s10286_s3 = inlined_call_operand.hbm [shape: bf16[2048,1024], index: 3, kind: input, shape index: {}]   ;;  %s10287_s4 = inlined_call_operand.hbm [shape: f32[1,1024], index: 4, kind: input, shape index: {}]   ;;  %s10288_s5 = inlined_call_operand.hbm [shape: bf16[1024,128], index: 5, kind: input, shape index: {}]   ;;  %s10289_s6 = inlined_call_operand.hbm [shape: f32[1,128], index: 6, kind: input, shape index: {}]   ;;  %s10290_s7 = inlined_call_operand.vmem [shape: f32[8,128], index: 7, kind: output, shape index: {}]  }
   0x1   :  { %13 = vsyncpa [#allocation5], 0 }
   0x2   :  { %14 = vsyncpa [#allocation8], 0 }
   0x3   :  { %15 = vsyncpa [#allocation11], 0  ;;  %s9960_s24 = smov [#allocation4]   ;;  %s9961_s26 = smov [#allocation7]  }
   0x4   :  { %s34_s25 = sshll.u32 %s9960_s24, 4  ;;  %s56_s27 = sshll.u32 %s9961_s26, 4  ;;  %s35_s25 = int_to_ptr.vmem [resolvable:$true] %s34_s25  ;;  %s57_s27 = int_to_ptr.vmem [resolvable:$true] %s56_s27 }
   0x5   :  { %s9840_s28 = scalar_lea.vmem %s35_s25, 16  ;;  %s9844_s29 = scalar_lea.vmem %s35_s25, 32 }
   0x6   :  { %p9841_p0 = scmp.ne.s32.totalorder %s35_s25, %s9840_s28  ;;  %p9845_p1 = scmp.lt.s32.totalorder %s35_s25, %s35_s25 }
   0x7   :  { %p9846_p2 = scmp.lt.s32.totalorder %s9844_s29, %s9840_s28 }
   0x9   :  { %p9847_p3 = por %p9846_p2, %p9845_p1 }
   0xb   :  { %p9848_p4 = pnand %p9847_p3, %p9841_p0 }
   0xd   :  { %9851 = shalt.err (!%p9848_p4)
}
   0xe   :  { %37 = dma.hbm_to_vmem [thread:$0]  %s10285_s2, 16, %s35_s25, [#allocation5]  }
   0xf   :  { %s9860_s9 = scalar_lea.vmem %s57_s27, 128  ;;  %p9865_p6 = scmp.lt.s32.totalorder %s57_s27, %s57_s27 }
  0x10   :  { %p9861_p5 = scmp.ne.s32.totalorder %s57_s27, %s9860_s9  ;;  %p9866_p7 = scmp.lt.s32.totalorder %s9860_s9, %s9860_s9 }
  0x12   :  { %p9867_p8 = por %p9866_p7, %p9865_p6 }
  0x14   :  { %p9868_p9 = pnand %p9867_p8, %p9861_p5 }
  0x16   :  { %9871 = shalt.err (!%p9868_p9)
}
  0x17   :  { %59 = dma.hbm_to_vmem [thread:$0]  %s10287_s4, 128, %s57_s27, [#allocation8]  }
  0x18   :  { %s9962_s12 = smov [#allocation2]   ;;  %s9963_s14 = smov [#allocation6]  }
  0x19   :  { %s24_s13 = sshll.u32 %s9962_s12, 4  ;;  %s43_s15 = sshll.u32 %s9963_s14, 4  ;;  %s25_s13 = int_to_ptr.vmem [resolvable:$true] %s24_s13  ;;  %s44_s15 = int_to_ptr.vmem [resolvable:$true] %s43_s15 }
  0x1a   :  { %s9880_s16 = scalar_lea.vmem %s25_s13, 32  ;;  %p9885_p11 = scmp.lt.s32.totalorder %s25_s13, %s25_s13 }
  0x1b   :  { %p9881_p10 = scmp.ne.s32.totalorder %s25_s13, %s9880_s16  ;;  %p9886_p12 = scmp.lt.s32.totalorder %s9880_s16, %s9880_s16 }
  0x1d   :  { %p9887_p13 = por %p9886_p12, %p9885_p11 }
  0x1f   :  { %p9888_p0 = pnand %p9887_p13, %p9881_p10 }
  0x21   :  { %9891 = shalt.err (!%p9888_p0)
}
  0x22   :  { %27 = dma.hbm_to_vmem [thread:$0]  %s10284_s1, 32, %s25_s13, [#allocation3]  }
  0x23   :  { %s9900_s18 = scalar_lea.vmem %s44_s15, 131072  ;;  %p9905_p2 = scmp.lt.s32.totalorder %s44_s15, %s44_s15 }
  0x24   :  { %p9901_p1 = scmp.ne.s32.totalorder %s44_s15, %s9900_s18  ;;  %p9906_p3 = scmp.lt.s32.totalorder %s9900_s18, %s9900_s18 }
  0x26   :  { %p9907_p4 = por %p9906_p3, %p9905_p2 }
  0x28   :  { %p9908_p5 = pnand %p9907_p4, %p9901_p1 }
  0x2a   :  { %9911 = shalt.err (!%p9908_p5)
}
  0x2b   :  { %s9964_s4 = smov 512   ;;  %s9965_s19 = smov 32  }
  0x2c   :  { %49 = dma.hbm_to_vmem [thread:$0]  %s10286_s3, 131072, %s44_s15, [#allocation5], %s9964_s4, %s9964_s4, %s9965_s19  }
  0x2d   :  { %s9966_s22 = smov [#allocation9]  }
  0x2e   :  { %s65_s23 = sshll.u32 %s9966_s22, 4  ;;  %s66_s23 = int_to_ptr.vmem [resolvable:$true] %s65_s23 }
  0x2f   :  { %s9920_s24 = scalar_lea.vmem %s66_s23, 8192  ;;  %p9925_p7 = scmp.lt.s32.totalorder %s66_s23, %s66_s23 }
  0x30   :  { %p9921_p6 = scmp.ne.s32.totalorder %s66_s23, %s9920_s24  ;;  %p9926_p8 = scmp.lt.s32.totalorder %s9920_s24, %s9920_s24 }
  0x32   :  { %p9927_p9 = por %p9926_p8, %p9925_p7 }
  0x34   :  { %p9928_p10 = pnand %p9927_p9, %p9921_p6 }
  0x36   :  { %9931 = shalt.err (!%p9928_p10)
}
  0x37   :  { %s9967_s1 = smov 64   ;;  %s9968_s25 = smov 4  }
  0x38   :  { %71 = dma.hbm_to_vmem [thread:$0]  %s10288_s5, 8192, %s66_s23, [#allocation8], %s9967_s1, %s9967_s1, %s9968_s25  }
  0x39   :  { %s9969_s28 = smov [#allocation10]  }
  0x3a   :  { %s78_s29 = sshll.u32 %s9969_s28, 4  ;;  %s79_s29 = int_to_ptr.vmem [resolvable:$true] %s78_s29 }
  0x3b   :  { %s9940_s3 = scalar_lea.vmem %s79_s29, 16  ;;  %s9944_s30 = scalar_lea.vmem %s79_s29, 32 }
  0x3c   :  { %p9941_p11 = scmp.ne.s32.totalorder %s79_s29, %s9940_s3  ;;  %p9945_p12 = scmp.lt.s32.totalorder %s79_s29, %s79_s29 }
  0x3d   :  { %p9946_p13 = scmp.lt.s32.totalorder %s9944_s30, %s9940_s3 }
  0x3f   :  { %p9947_p0 = por %p9946_p13, %p9945_p12 }
  0x41   :  { %p9948_p1 = pnand %p9947_p0, %p9941_p11 }
  0x43   :  { %9951 = shalt.err (!%p9948_p1)
}
  0x44   :  { %81 = dma.hbm_to_vmem [thread:$0]  %s10289_s6, 16, %s79_s29, [#allocation11]  }
  0x45   :  { %9952 = dma.done.wait [#allocation3], 32  }
  0x46   :  { %9953 = vsyncadd [#allocation3], 4294967264 }
  0x47   :  { %9954 = dma.done.wait [#allocation5], 131088  }
  0x48   :  { %9955 = vsyncadd [#allocation5], 4294836208 }
  0x49   :  { %9956 = dma.done.wait [#allocation8], 8320  }
  0x4a   :  { %9957 = vsyncadd [#allocation8], 4294958976 }
  0x4b   :  { %9958 = dma.done.wait [#allocation11], 16  }
  0x4c   :  { %9959 = vsyncadd [#allocation11], 4294967280  ;;  %vm190_vm0 = vcmask 1041408   ;;  %vm165_vm1 = vcmask 31744   ;;  %v117_v0 = vld [vmem:[#allocation2] sm:$0x3] }
  0x4d   :  { %9746 = vmatprep.subr.msk.bf16.mxu0 %vm190_vm0, %v117_v0  ;;  %v192_v1 = vsel %vm190_vm0, %v117_v0, 0  ;;  %v9757_v2 = vld [vmem:[%s10283_s0] sm:$0xff]   ;;  %v9758_v3 = vld [vmem:[%s10283_s0 + $0x8] sm:$0xff]   ;;  %v9759_v4 = vld [vmem:[%s10283_s0 + $0x10] sm:$0xff]  }
  0x4e   :  { %9729 = vmatpush3.bf16.msra.mxu0 %v192_v1  ;;  %9730 = vmatprep.mubr.msk.bf16.mxu0 %vm165_vm1, %v9757_v2  ;;  %v507_v5 = vld [vmem:[#allocation6 + $0x5c0] sm:$0xff]  ;;  %v9760_v7 = vld [vmem:[%s10283_s0 + $0x18] sm:$0xff]   ;;  %v9763_v51 = vld [vmem:[%s10283_s0 + $0x30] sm:$0xff]  }
  0x4f   :  { %v511_v6 = vld [vmem:[#allocation6 + $0x5e0] sm:$0xff]  ;;  %v9764_v59 = vld [vmem:[%s10283_s0 + $0x38] sm:$0xff]  }
  0x50   :  { %v8726_v8 = vcombine.low %v507_v5, %v511_v6  ;;  %v8727_v9 = vcombine.high %v507_v5, %v511_v6  ;;  %v379_v10 = vld [vmem:[#allocation6 + $0x1c0] sm:$0xff] }
  0x51   :  { %9731 = vmatmul.mubr.msk.bf16.vlgmr.msra.gmra.mxu0 %vm165_vm1, %v9758_v3  ;;  %v383_v11 = vld [vmem:[#allocation6 + $0x1e0] sm:$0xff] }
  0x52   :  { %9734 = vmatprep.mubr.msk.bf16.mxu0 %vm165_vm1, %v9759_v4  ;;  %v499_v12 = vld [vmem:[#allocation6 + $0x580] sm:$0xff]  ;;  %v8599_v13 = vcombine.high %v379_v10, %v383_v11  ;;  %v8598_v14 = vcombine.low %v379_v10, %v383_v11  ;;  %6550 = vmatprep.subr.bf16.mxu0 %v8727_v9 }
  0x53   :  { %v503_v15 = vld [vmem:[#allocation6 + $0x5a0] sm:$0xff]  ;;  %6551 = vmatpush1.bf16.msra.mxu0 %v8726_v8 }
  0x54   :  { %v371_v16 = vld [vmem:[#allocation6 + $0x180] sm:$0xff]  ;;  %v8719_v18 = vcombine.high %v499_v12, %v503_v15  ;;  %6509 = vmatprep.subr.bf16.mxu1 %v8599_v13  ;;  %v8718_v24 = vcombine.low %v499_v12, %v503_v15 }
  0x55   :  { %v375_v17 = vld [vmem:[#allocation6 + $0x1a0] sm:$0xff]  ;;  %6510 = vmatpush1.bf16.msra.mxu1 %v8598_v14 }
  0x56   :  { %v8591_v19 = vcombine.high %v371_v16, %v375_v17  ;;  %v491_v20 = vld [vmem:[#allocation6 + $0x540] sm:$0xff]  ;;  %6552 = vmatprep.subr.bf16.mxu0 %v8719_v18  ;;  %v8590_v26 = vcombine.low %v371_v16, %v375_v17 }
  0x57   :  { %v495_v21 = vld [vmem:[#allocation6 + $0x560] sm:$0xff]  ;;  %6553 = vmatpush1.bf16.msra.mxu0 %v8718_v24 }
  0x58   :  { %v363_v22 = vld [vmem:[#allocation6 + $0x140] sm:$0xff]  ;;  %v8711_v27 = vcombine.high %v491_v20, %v495_v21  ;;  %6511 = vmatprep.subr.bf16.mxu1 %v8591_v19  ;;  %v8710_v33 = vcombine.low %v491_v20, %v495_v21 }
  0x59   :  { %v9761_v23 = vld [vmem:[%s10283_s0 + $0x20] sm:$0xff]   ;;  %9735 = vmatmul.mubr.msk.bf16.gmra.mxu0 %vm165_vm1, %v9760_v7  ;;  %6512 = vmatpush1.bf16.msra.mxu1 %v8590_v26  ;;  %v9762_v39 = vld [vmem:[%s10283_s0 + $0x28] sm:$0xff]  }
  0x5a   :  { %v367_v25 = vld [vmem:[#allocation6 + $0x160] sm:$0xff]  ;;  %9738 = vmatprep.mubr.msk.bf16.mxu0 %vm165_vm1, %v9761_v23  ;;  %6554 = vmatprep.subr.bf16.mxu0 %v8711_v27 }
  0x5b   :  { %v8583_v28 = vcombine.high %v363_v22, %v367_v25  ;;  %v483_v29 = vld [vmem:[#allocation6 + $0x500] sm:$0xff]  ;;  %v8582_v34 = vcombine.low %v363_v22, %v367_v25  ;;  %6555 = vmatpush1.bf16.msra.mxu0 %v8710_v33 }
  0x5c   :  { %v487_v30 = vld [vmem:[#allocation6 + $0x520] sm:$0xff] }
  0x5d   :  { %v355_v31 = vld [vmem:[#allocation6 + $0x100] sm:$0xff]  ;;  %v8703_v35 = vcombine.high %v483_v29, %v487_v30  ;;  %6513 = vmatprep.subr.bf16.mxu1 %v8583_v28  ;;  %v8702_v42 = vcombine.low %v483_v29, %v487_v30 }
  0x5e   :  { %v359_v32 = vld [vmem:[#allocation6 + $0x120] sm:$0xff]  ;;  %6514 = vmatpush1.bf16.msra.mxu1 %v8582_v34 }
  0x5f   :  { %v8575_v36 = vcombine.high %v355_v31, %v359_v32  ;;  %v475_v37 = vld [vmem:[#allocation6 + $0x4c0] sm:$0xff]  ;;  %6556 = vmatprep.subr.bf16.mxu0 %v8703_v35  ;;  %v8574_v43 = vcombine.low %v355_v31, %v359_v32 }
  0x60   :  { %v479_v38 = vld [vmem:[#allocation6 + $0x4e0] sm:$0xff]  ;;  %6557 = vmatpush1.bf16.msra.mxu0 %v8702_v42 }
  0x61   :  { %v347_v40 = vld [vmem:[#allocation6 + $0xc0] sm:$0xff]  ;;  %v8695_v44 = vcombine.high %v475_v37, %v479_v38  ;;  %6515 = vmatprep.subr.bf16.mxu1 %v8575_v36  ;;  %9739 = vmatmul.mubr.msk.bf16.gmra.mxu0 %vm165_vm1, %v9762_v39  ;;  %v8694_v50 = vcombine.low %v475_v37, %v479_v38 }
  0x62   :  { %v351_v41 = vld [vmem:[#allocation6 + $0xe0] sm:$0xff]  ;;  %6516 = vmatpush1.bf16.msra.mxu1 %v8574_v43  ;;  %9742 = vmatprep.mubr.msk.bf16.mxu0 %vm165_vm1, %v9763_v51 }
  0x63   :  { %v8567_v45 = vcombine.high %v347_v40, %v351_v41  ;;  %v467_v46 = vld [vmem:[#allocation6 + $0x480] sm:$0xff]  ;;  %6558 = vmatprep.subr.bf16.mxu0 %v8695_v44  ;;  %v8566_v52 = vcombine.low %v347_v40, %v351_v41 }
  0x64   :  { %v471_v47 = vld [vmem:[#allocation6 + $0x4a0] sm:$0xff]  ;;  %6559 = vmatpush1.bf16.msra.mxu0 %v8694_v50 }
  0x65   :  { %v339_v48 = vld [vmem:[#allocation6 + $0x80] sm:$0xff]  ;;  %v8687_v53 = vcombine.high %v467_v46, %v471_v47  ;;  %6517 = vmatprep.subr.bf16.mxu1 %v8567_v45  ;;  %v8686_v60 = vcombine.low %v467_v46, %v471_v47 }
  0x66   :  { %v343_v49 = vld [vmem:[#allocation6 + $0xa0] sm:$0xff]  ;;  %6518 = vmatpush1.bf16.msra.mxu1 %v8566_v52 }
  0x67   :  { %v8559_v54 = vcombine.high %v339_v48, %v343_v49  ;;  %v459_v55 = vld [vmem:[#allocation6 + $0x440] sm:$0xff]  ;;  %6560 = vmatprep.subr.bf16.mxu0 %v8687_v53  ;;  %v8558_v63 = vcombine.low %v339_v48, %v343_v49 }
  0x68   :  { %v463_v56 = vld [vmem:[#allocation6 + $0x460] sm:$0xff]  ;;  %6561 = vmatpush1.bf16.msra.mxu0 %v8686_v60 }
  0x69   :  { %v331_v57 = vld [vmem:[#allocation6 + $0x40] sm:$0xff]  ;;  %v8679_v0 = vcombine.high %v459_v55, %v463_v56  ;;  %6519 = vmatprep.subr.bf16.mxu1 %v8559_v54  ;;  %9743 = vmatmul.mubr.msk.bf16.gmra.mxu0 %vm165_vm1, %v9764_v59  ;;  %v8678_v4 = vcombine.low %v459_v55, %v463_v56 }
  0x6a   :  { %v335_v58 = vld [vmem:[#allocation6 + $0x60] sm:$0xff]  ;;  %6520 = vmatpush1.bf16.msra.mxu1 %v8558_v63 }
  0x6b   :  { %v451_v61 = vld [vmem:[#allocation6 + $0x400] sm:$0xff]  ;;  %v8551_v3 = vcombine.high %v331_v57, %v335_v58  ;;  %6562 = vmatprep.subr.bf16.mxu0 %v8679_v0  ;;  %v8550_v7 = vcombine.low %v331_v57, %v335_v58 }
  0x6c   :  { %v455_v62 = vld [vmem:[#allocation6 + $0x420] sm:$0xff]  ;;  %6563 = vmatpush1.bf16.msra.mxu0 %v8678_v4 }
  0x6d   :  { %v323_v1 = vld [vmem:[#allocation6] sm:$0xff]  ;;  %v8671_v8 = vcombine.high %v451_v61, %v455_v62  ;;  %6521 = vmatprep.subr.bf16.mxu1 %v8551_v3  ;;  %v8670_v12 = vcombine.low %v451_v61, %v455_v62 }
  0x6e   :  { %v327_v2 = vld [vmem:[#allocation6 + $0x20] sm:$0xff]  ;;  %6522 = vmatpush1.bf16.msra.mxu1 %v8550_v7 }
  0x6f   :  { %v571_v5 = vld [vmem:[#allocation6 + $0x7c0] sm:$0xff]  ;;  %v8543_v11 = vcombine.high %v323_v1, %v327_v2  ;;  %6564 = vmatprep.subr.bf16.mxu0 %v8671_v8  ;;  %v8542_v15 = vcombine.low %v323_v1, %v327_v2 }
  0x70   :  { %v575_v6 = vld [vmem:[#allocation6 + $0x7e0] sm:$0xff]  ;;  %6565 = vmatpush1.bf16.msra.mxu0 %v8670_v12 }
  0x71   :  { %v443_v9 = vld [vmem:[#allocation6 + $0x3c0] sm:$0xff]  ;;  %v8791_v16 = vcombine.high %v571_v5, %v575_v6  ;;  %6523 = vmatprep.subr.bf16.mxu1 %v8543_v11  ;;  %v8790_v20 = vcombine.low %v571_v5, %v575_v6 }
  0x72   :  { %v447_v10 = vld [vmem:[#allocation6 + $0x3e0] sm:$0xff]  ;;  %6524 = vmatpush1.bf16.msra.mxu1 %v8542_v15 }
  0x73   :  { %v563_v13 = vld [vmem:[#allocation6 + $0x780] sm:$0xff]  ;;  %v8663_v19 = vcombine.high %v443_v9, %v447_v10  ;;  %6566 = vmatprep.subr.bf16.mxu0 %v8791_v16  ;;  %v8662_v23 = vcombine.low %v443_v9, %v447_v10 }
  0x74   :  { %v567_v14 = vld [vmem:[#allocation6 + $0x7a0] sm:$0xff]  ;;  %6567 = vmatpush2.bf16.msra.mxu0 %v8790_v20 }
  0x75   :  { %v435_v17 = vld [vmem:[#allocation6 + $0x380] sm:$0xff]  ;;  %v8783_v24 = vcombine.high %v563_v13, %v567_v14  ;;  %6525 = vmatprep.subr.bf16.mxu1 %v8663_v19  ;;  %v8782_v28 = vcombine.low %v563_v13, %v567_v14 }
  0x76   :  { %v439_v18 = vld [vmem:[#allocation6 + $0x3a0] sm:$0xff]  ;;  %6526 = vmatpush2.bf16.msra.mxu1 %v8662_v23 }
  0x77   :  { %v555_v21 = vld [vmem:[#allocation6 + $0x740] sm:$0xff]  ;;  %v8655_v27 = vcombine.high %v435_v17, %v439_v18  ;;  %6568 = vmatprep.subr.bf16.mxu0 %v8783_v24  ;;  %v8654_v31 = vcombine.low %v435_v17, %v439_v18  ;;  %v10060_v18 = vld [vmem:[#allocation4] ss:$0 sm:$0xff] }
  0x78   :  { %v559_v22 = vld [vmem:[#allocation6 + $0x760] sm:$0xff]  ;;  %6569 = vmatpush2.bf16.msra.mxu0 %v8782_v28 }
  0x79   :  { %v427_v25 = vld [vmem:[#allocation6 + $0x340] sm:$0xff]  ;;  %v8775_v32 = vcombine.high %v555_v21, %v559_v22  ;;  %6527 = vmatprep.subr.bf16.mxu1 %v8655_v27  ;;  %v8774_v36 = vcombine.low %v555_v21, %v559_v22 }
  0x7a   :  { %v431_v26 = vld [vmem:[#allocation6 + $0x360] sm:$0xff]  ;;  %6528 = vmatpush2.bf16.msra.mxu1 %v8654_v31 }
  0x7b   :  { %v547_v29 = vld [vmem:[#allocation6 + $0x700] sm:$0xff]  ;;  %v8647_v35 = vcombine.high %v427_v25, %v431_v26  ;;  %6570 = vmatprep.subr.bf16.mxu0 %v8775_v32  ;;  %v8646_v39 = vcombine.low %v427_v25, %v431_v26 }
  0x7c   :  { %v551_v30 = vld [vmem:[#allocation6 + $0x720] sm:$0xff]  ;;  %6571 = vmatpush2.bf16.msra.mxu0 %v8774_v36 }
  0x7d   :  { %v419_v33 = vld [vmem:[#allocation6 + $0x300] sm:$0xff]  ;;  %v8767_v40 = vcombine.high %v547_v29, %v551_v30  ;;  %6529 = vmatprep.subr.bf16.mxu1 %v8647_v35  ;;  %v8766_v44 = vcombine.low %v547_v29, %v551_v30 }
  0x7e   :  { %v423_v34 = vld [vmem:[#allocation6 + $0x320] sm:$0xff]  ;;  %6530 = vmatpush2.bf16.msra.mxu1 %v8646_v39 }
  0x7f   :  { %v539_v37 = vld [vmem:[#allocation6 + $0x6c0] sm:$0xff]  ;;  %v8639_v43 = vcombine.high %v419_v33, %v423_v34  ;;  %6572 = vmatprep.subr.bf16.mxu0 %v8767_v40  ;;  %v8638_v47 = vcombine.low %v419_v33, %v423_v34 }
  0x80   :  { %v543_v38 = vld [vmem:[#allocation6 + $0x6e0] sm:$0xff]  ;;  %6573 = vmatpush2.bf16.msra.mxu0 %v8766_v44 }
  0x81   :  { %v411_v41 = vld [vmem:[#allocation6 + $0x2c0] sm:$0xff]  ;;  %v8759_v48 = vcombine.high %v539_v37, %v543_v38  ;;  %6531 = vmatprep.subr.bf16.mxu1 %v8639_v43  ;;  %v8758_v50 = vcombine.low %v539_v37, %v543_v38 }
  0x82   :  { %v415_v42 = vld [vmem:[#allocation6 + $0x2e0] sm:$0xff]  ;;  %6532 = vmatpush2.bf16.msra.mxu1 %v8638_v47 }
  0x83   :  { %v531_v45 = vld [vmem:[#allocation6 + $0x680] sm:$0xff]  ;;  %v8631_v49 = vcombine.high %v411_v41, %v415_v42  ;;  %6574 = vmatprep.subr.bf16.mxu0 %v8759_v48  ;;  %v8630_v51 = vcombine.low %v411_v41, %v415_v42 }
  0x84   :  { %v535_v46 = vld [vmem:[#allocation6 + $0x6a0] sm:$0xff]  ;;  %6575 = vmatpush2.bf16.msra.mxu0 %v8758_v50 }
  0x85   :  { %v8751_v52 = vcombine.high %v531_v45, %v535_v46  ;;  %6533 = vmatprep.subr.bf16.mxu1 %v8631_v49  ;;  %v8750_v53 = vcombine.low %v531_v45, %v535_v46  ;;  %v403_v54 = vld [vmem:[#allocation6 + $0x280] sm:$0xff] }
  0x86   :  { %6534 = vmatpush2.bf16.msra.mxu1 %v8630_v51  ;;  %v407_v55 = vld [vmem:[#allocation6 + $0x2a0] sm:$0xff] }
  0x87   :  { %6576 = vmatprep.subr.bf16.mxu0 %v8751_v52  ;;  %v8623_v56 = vcombine.high %v403_v54, %v407_v55  ;;  %v8622_v57 = vcombine.low %v403_v54, %v407_v55  ;;  %v523_v58 = vld [vmem:[#allocation6 + $0x640] sm:$0xff] }
  0x88   :  { %6577 = vmatpush2.bf16.msra.mxu0 %v8750_v53  ;;  %v527_v59 = vld [vmem:[#allocation6 + $0x660] sm:$0xff] }
  0x89   :  { %6535 = vmatprep.subr.bf16.mxu1 %v8623_v56  ;;  %v8743_v60 = vcombine.high %v523_v58, %v527_v59  ;;  %v8742_v61 = vcombine.low %v523_v58, %v527_v59  ;;  %v395_v62 = vld [vmem:[#allocation6 + $0x240] sm:$0xff] }
  0x8a   :  { %6536 = vmatpush2.bf16.msra.mxu1 %v8622_v57  ;;  %v399_v63 = vld [vmem:[#allocation6 + $0x260] sm:$0xff] }
  0x8b   :  { %6578 = vmatprep.subr.bf16.mxu0 %v8743_v60  ;;  %v8615_v0 = vcombine.high %v395_v62, %v399_v63  ;;  %v8614_v1 = vcombine.low %v395_v62, %v399_v63  ;;  %v515_v2 = vld [vmem:[#allocation6 + $0x600] sm:$0xff] }
  0x8c   :  { %6579 = vmatpush2.bf16.msra.mxu0 %v8742_v61  ;;  %v519_v3 = vld [vmem:[#allocation6 + $0x620] sm:$0xff] }
  0x8d   :  { %6537 = vmatprep.subr.bf16.mxu1 %v8615_v0  ;;  %v8735_v4 = vcombine.high %v515_v2, %v519_v3  ;;  %v8734_v5 = vcombine.low %v515_v2, %v519_v3  ;;  %v387_v6 = vld [vmem:[#allocation6 + $0x200] sm:$0xff] }
  0x8e   :  { %6538 = vmatpush2.bf16.msra.mxu1 %v8614_v1  ;;  %v391_v7 = vld [vmem:[#allocation6 + $0x220] sm:$0xff] }
  0x8f   :  { %6580 = vmatprep.subr.bf16.mxu0 %v8735_v4  ;;  %v8607_v8 = vcombine.high %v387_v6, %v391_v7  ;;  %v8606_v9 = vcombine.low %v387_v6, %v391_v7  ;;  %v763_v10 = vld [vmem:[#allocation6 + $0xdc0] sm:$0xff] }
  0x90   :  { %6581 = vmatpush2.bf16.msra.mxu0 %v8734_v5  ;;  %v767_v11 = vld [vmem:[#allocation6 + $0xde0] sm:$0xff] }
  0x91   :  { %6539 = vmatprep.subr.bf16.mxu1 %v8607_v8  ;;  %v8983_v12 = vcombine.high %v763_v10, %v767_v11  ;;  %v8982_v13 = vcombine.low %v763_v10, %v767_v11  ;;  %v635_v14 = vld [vmem:[#allocation6 + $0x9c0] sm:$0xff] }
  0x92   :  { %6540 = vmatpush2.bf16.msra.mxu1 %v8606_v9  ;;  %v639_v15 = vld [vmem:[#allocation6 + $0x9e0] sm:$0xff] }
  0x93   :  { %6632 = vmatprep.subr.bf16.mxu0 %v8983_v12  ;;  %v8855_v16 = vcombine.high %v635_v14, %v639_v15  ;;  %v8854_v17 = vcombine.low %v635_v14, %v639_v15  ;;  %v755_v29 = vld [vmem:[#allocation6 + $0xd80] sm:$0xff] }
  0x94   :  { %v759_v30 = vld [vmem:[#allocation6 + $0xda0] sm:$0xff] }
  0x95   :  { %6591 = vmatprep.subr.bf16.mxu1 %v8855_v16  ;;  %v627_v35 = vld [vmem:[#allocation6 + $0x980] sm:$0xff]  ;;  %v8975_v38 = vcombine.high %v755_v29, %v759_v30  ;;  %v8974_v46 = vcombine.low %v755_v29, %v759_v30 }
  0x96   :  { %v631_v36 = vld [vmem:[#allocation6 + $0x9a0] sm:$0xff] }
  0x97   :  { %v747_v41 = vld [vmem:[#allocation6 + $0xd40] sm:$0xff]  ;;  %v8847_v44 = vcombine.high %v627_v35, %v631_v36  ;;  %v8846_v52 = vcombine.low %v627_v35, %v631_v36 }
  0x98   :  { %v751_v42 = vld [vmem:[#allocation6 + $0xd60] sm:$0xff] }
  0x99   :  { %v619_v47 = vld [vmem:[#allocation6 + $0x940] sm:$0xff]  ;;  %v8967_v50 = vcombine.high %v747_v41, %v751_v42  ;;  %v8966_v59 = vcombine.low %v747_v41, %v751_v42 }
  0x9a   :  { %v623_v48 = vld [vmem:[#allocation6 + $0x960] sm:$0xff] }
  0x9b   :  { %v739_v53 = vld [vmem:[#allocation6 + $0xd00] sm:$0xff]  ;;  %v8839_v57 = vcombine.high %v619_v47, %v623_v48  ;;  %v8838_v3 = vcombine.low %v619_v47, %v623_v48 }
  0x9c   :  { %v743_v54 = vld [vmem:[#allocation6 + $0xd20] sm:$0xff] }
  0x9d   :  { %v611_v60 = vld [vmem:[#allocation6 + $0x900] sm:$0xff]  ;;  %v8959_v1 = vcombine.high %v739_v53, %v743_v54  ;;  %v8958_v9 = vcombine.low %v739_v53, %v743_v54 }
  0x9e   :  { %v615_v61 = vld [vmem:[#allocation6 + $0x920] sm:$0xff] }
  0x9f   :  { %v731_v4 = vld [vmem:[#allocation6 + $0xcc0] sm:$0xff]  ;;  %v8831_v8 = vcombine.high %v611_v60, %v615_v61 }
  0xa0   :  { %v735_v5 = vld [vmem:[#allocation6 + $0xce0] sm:$0xff] }
  0xa1   :  { %v603_v10 = vld [vmem:[#allocation6 + $0x8c0] sm:$0xff]  ;;  %v8951_v12 = vcombine.high %v731_v4, %v735_v5 }
  0xa2   :  { %v607_v11 = vld [vmem:[#allocation6 + $0x8e0] sm:$0xff] }
  0xa3   :  { %v723_v14 = vld [vmem:[#allocation6 + $0xc80] sm:$0xff]  ;;  %v8823_v16 = vcombine.high %v603_v10, %v607_v11 }
  0xa4   :  { %v727_v15 = vld [vmem:[#allocation6 + $0xca0] sm:$0xff] }
  0xa5   :  { %v583_v41 = vld [vmem:[#allocation6 + $0x820] sm:$0xff] }
  0xa6   :  { %v819_v53 = vld [vmem:[#allocation6 + $0xf80] sm:$0xff] }
  0xa7   :  { %v823_v54 = vld [vmem:[#allocation6 + $0xfa0] sm:$0xff] }
 0x111   :  { %v9732_v19 = vpop.f32.mrf.mxu0 }
 0x112   :  { %v237_v20 = vadd.f32 %v9732_v19, %v10060_v18  ;;  %v595_v19 = vld [vmem:[#allocation6 + $0x880] sm:$0xff] }
 0x113   :  { %v228_v21 = vpop.f32.mrf.mxu0 }
 0x114   :  { %v229_v22 = vadd.f32 %v10060_v18, %v228_v21  ;;  %v293_v25 = vmax.f32 %v237_v20, 0.0  ;;  %v599_v20 = vld [vmem:[#allocation6 + $0x8a0] sm:$0xff]  ;;  %v8943_v21 = vcombine.high %v723_v14, %v727_v15 }
 0x115   :  { %v9733_v23 = vpop.f32.mrf.mxu0  ;;  %v8814_v30 = vcombine.low %v595_v19, %v599_v20 }
 0x116   :  { %v240_v24 = vadd.f32 %v9733_v23, %v10060_v18  ;;  %v291_v31 = vmax.f32 %v229_v22, 0.0  ;;  %v10070_v37 = vpack.c.bf16 %v293_v25, %v293_v25  ;;  %v8822_v22 = vcombine.low %v603_v10, %v607_v11  ;;  %v715_v23 = vld [vmem:[#allocation6 + $0xc40] sm:$0xff] }
 0x117   :  { %v231_v26 = vpop.f32.mrf.mxu0  ;;  %v8815_v25 = vcombine.high %v595_v19, %v599_v20  ;;  %v807_v10 = vld [vmem:[#allocation6 + $0xf20] sm:$0xff] }
 0x118   :  { %v294_v27 = vmax.f32 %v240_v24, 0.0  ;;  %v232_v28 = vadd.f32 %v10060_v18, %v231_v26  ;;  %v10077_v43 = vpack.c.bf16 %v291_v31, %v291_v31  ;;  %v719_v24 = vld [vmem:[#allocation6 + $0xc60] sm:$0xff]  ;;  %v8942_v26 = vcombine.low %v723_v14, %v727_v15 }
 0x119   :  { %v10066_v32 = vpop.f32.mrf.mxu0  ;;  %v8935_v29 = vcombine.high %v715_v23, %v719_v24  ;;  %v707_v31 = vld [vmem:[#allocation6 + $0xc00] sm:$0xff]  ;;  %v8934_v36 = vcombine.low %v715_v23, %v719_v24 }
 0x11a   :  { %v10068_v33 = vpack.c.bf16 %v294_v27, %v294_v27  ;;  %v292_v34 = vmax.f32 %v232_v28, 0.0  ;;  %v587_v27 = vld [vmem:[#allocation6 + $0x840] sm:$0xff] }
 0x11b   :  { %v10072_v39 = vpop.f32.mrf.mxu0  ;;  %v591_v28 = vld [vmem:[#allocation6 + $0x860] sm:$0xff] }
 0x11c   :  { %v10074_v40 = vpack.c.bf16 %v292_v34, %v292_v34  ;;  %6582 = vmatprep.mubr.bf16.mxu0 %v10068_v33  ;;  %v711_v34 = vld [vmem:[#allocation6 + $0xc20] sm:$0xff]  ;;  %v8807_v35 = vcombine.high %v587_v27, %v591_v28 }
 0x11d   :  { %6583 = vmatmul.mubr.bf16.vlgmr.msra.gmra.mxu0 %v10070_v37  ;;  %v9737_v45 = vpop.f32.mrf.mxu0  ;;  %v8927_v42 = vcombine.high %v707_v31, %v711_v34  ;;  %v8926_v48 = vcombine.low %v707_v31, %v711_v34  ;;  %v679_v14 = vld [vmem:[#allocation6 + $0xb20] sm:$0xff] }
 0x11e   :  { %6633 = vmatpush1.bf16.msra.mxu0 %v8982_v13  ;;  %6541 = vmatprep.mubr.bf16.mxu1 %v10074_v40  ;;  %v256_v49 = vadd.f32 %v9737_v45, %v10060_v18  ;;  %v8830_v13 = vcombine.low %v611_v60, %v615_v61  ;;  %v827_v45 = vld [vmem:[#allocation6 + $0xfc0] sm:$0xff] }
 0x11f   :  { %6542 = vmatmul.mubr.bf16.vlgmr.msra.gmra.mxu1 %v10077_v43  ;;  %6634 = vmatprep.subr.bf16.mxu0 %v8975_v38  ;;  %v247_v51 = vpop.f32.mrf.mxu0  ;;  %v579_v38 = vld [vmem:[#allocation6 + $0x800] sm:$0xff] }
 0x120   :  { %6592 = vmatpush1.bf16.msra.mxu1 %v8854_v17  ;;  %v298_v55 = vmax.f32 %v256_v49, 0.0  ;;  %v248_v56 = vadd.f32 %v10060_v18, %v247_v51  ;;  %v8950_v17 = vcombine.low %v731_v4, %v735_v5  ;;  %v8799_v47 = vcombine.high %v579_v38, %v583_v41  ;;  %v699_v49 = vld [vmem:[#allocation6 + $0xbc0] sm:$0xff] }
 0x121   :  { %6593 = vmatprep.subr.bf16.mxu1 %v8847_v44  ;;  %v9740_v58 = vpop.f32.mrf.mxu0  ;;  %v8806_v44 = vcombine.low %v587_v27, %v591_v28  ;;  %v811_v61 = vld [vmem:[#allocation6 + $0xf40] sm:$0xff] }
 0x122   :  { %6635 = vmatpush1.bf16.msra.mxu0 %v8974_v46  ;;  %v10084_v62 = vpack.c.bf16 %v298_v55, %v298_v55  ;;  %v296_v63 = vmax.f32 %v248_v56, 0.0  ;;  %v10087_v0 = vadd.f32 %v9740_v58, %v10060_v18  ;;  %v831_v46 = vld [vmem:[#allocation6 + $0xfe0] sm:$0xff] }
 0x123   :  { %6636 = vmatprep.subr.bf16.mxu0 %v8967_v50  ;;  %v260_v2 = vpop.f32.mrf.mxu0  ;;  %v703_v50 = vld [vmem:[#allocation6 + $0xbe0] sm:$0xff]  ;;  %v9047_v51 = vcombine.high %v827_v45, %v831_v46  ;;  %v9046_v56 = vcombine.low %v827_v45, %v831_v46 }
 0x124   :  { %6594 = vmatpush1.bf16.msra.mxu1 %v8846_v52  ;;  %v10089_v6 = vpack.c.bf16 %v296_v63, %v296_v63  ;;  %6664 = vmatprep.mubr.bf16.mxu0 %v10084_v62  ;;  %v10093_v7 = vadd.f32 %v10060_v18, %v260_v2  ;;  %v8798_v52 = vcombine.low %v579_v38, %v583_v41  ;;  %v695_v58 = vld [vmem:[#allocation6 + $0xba0] sm:$0xff] }
 0x125   :  { %6595 = vmatprep.subr.bf16.mxu1 %v8839_v57  ;;  %v8919_v55 = vcombine.high %v699_v49, %v703_v50  ;;  %v691_v57 = vld [vmem:[#allocation6 + $0xb80] sm:$0xff]  ;;  %v8918_v60 = vcombine.low %v699_v49, %v703_v50  ;;  %v9038_v2 = vcombine.low %v819_v53, %v823_v54  ;;  %v9741_v20 = vpop.f32.mrf.mxu0 }
 0x126   :  { %6637 = vmatpush1.bf16.msra.mxu0 %v8966_v59  ;;  %6623 = vmatprep.mubr.bf16.mxu1 %v10089_v6  ;;  %v9039_v59 = vcombine.high %v819_v53, %v823_v54  ;;  %v815_v63 = vld [vmem:[#allocation6 + $0xf60] sm:$0xff] }
 0x127   :  { %6638 = vmatprep.subr.bf16.mxu0 %v8959_v1  ;;  %v8911_v1 = vcombine.high %v691_v57, %v695_v58  ;;  %v687_v4 = vld [vmem:[#allocation6 + $0xb60] sm:$0xff]  ;;  %v9031_v5 = vcombine.high %v811_v61, %v815_v63 }
 0x128   :  { %6596 = vmatpush1.bf16.msra.mxu1 %v8838_v3  ;;  %v683_v3 = vld [vmem:[#allocation6 + $0xb40] sm:$0xff] }
 0x129   :  { %6597 = vmatprep.subr.bf16.mxu1 %v8831_v8  ;;  %v8910_v8 = vcombine.low %v691_v57, %v695_v58  ;;  %v8903_v11 = vcombine.high %v683_v3, %v687_v4  ;;  %v799_v19 = vld [vmem:[#allocation6 + $0xee0] sm:$0xff] }
 0x12a   :  { %6639 = vmatpush1.bf16.msra.mxu0 %v8958_v9  ;;  %v803_v9 = vld [vmem:[#allocation6 + $0xf00] sm:$0xff] }
 0x12b   :  { %6640 = vmatprep.subr.bf16.mxu0 %v8951_v12  ;;  %v9030_v12 = vcombine.low %v811_v61, %v815_v63  ;;  %v9023_v15 = vcombine.high %v803_v9, %v807_v10  ;;  %v667_v23 = vld [vmem:[#allocation6 + $0xac0] sm:$0xff]  ;;  %v253_v61 = vadd.f32 %v10066_v32, %v10060_v18 }
 0x12c   :  { %6598 = vmatpush1.bf16.msra.mxu1 %v8830_v13  ;;  %v675_v13 = vld [vmem:[#allocation6 + $0xb00] sm:$0xff] }
 0x12d   :  { %6599 = vmatprep.subr.bf16.mxu1 %v8823_v16  ;;  %v8902_v16 = vcombine.low %v683_v3, %v687_v4  ;;  %v671_v24 = vld [vmem:[#allocation6 + $0xae0] sm:$0xff] }
 0x12e   :  { %6641 = vmatpush1.bf16.msra.mxu0 %v8950_v17  ;;  %v795_v17 = vld [vmem:[#allocation6 + $0xec0] sm:$0xff] }
 0x12f   :  { %6642 = vmatprep.subr.bf16.mxu0 %v8943_v21  ;;  %v8895_v21 = vcombine.high %v675_v13, %v679_v14  ;;  %v787_v27 = vld [vmem:[#allocation6 + $0xe80] sm:$0xff]  ;;  %v9014_v31 = vcombine.low %v795_v17, %v799_v19 }
 0x130   :  { %6600 = vmatpush1.bf16.msra.mxu1 %v8822_v22  ;;  %v9022_v22 = vcombine.low %v803_v9, %v807_v10  ;;  %v791_v28 = vld [vmem:[#allocation6 + $0xea0] sm:$0xff] }
 0x131   :  { %6601 = vmatprep.subr.bf16.mxu1 %v8815_v25  ;;  %v9015_v25 = vcombine.high %v795_v17, %v799_v19  ;;  %v659_v34 = vld [vmem:[#allocation6 + $0xa80] sm:$0xff]  ;;  %v9007_v38 = vcombine.high %v787_v27, %v791_v28  ;;  %v9006_v49 = vcombine.low %v787_v27, %v791_v28 }
 0x132   :  { %6643 = vmatpush1.bf16.msra.mxu0 %v8942_v26  ;;  %v8894_v26 = vcombine.low %v675_v13, %v679_v14  ;;  %v783_v45 = vld [vmem:[#allocation6 + $0xe60] sm:$0xff]  ;;  %v297_v13 = vmax.f32 %v253_v61, 0.0 }
 0x133   :  { %6644 = vmatprep.subr.bf16.mxu0 %v8935_v29  ;;  %v263_v29 = vpop.f32.mrf.mxu0  ;;  %v651_v50 = vld [vmem:[#allocation6 + $0xa40] sm:$0xff] }
 0x134   :  { %6602 = vmatpush1.bf16.msra.mxu1 %v8814_v30  ;;  %v8887_v30 = vcombine.high %v667_v23, %v671_v24  ;;  %v771_v54 = vld [vmem:[#allocation6 + $0xe00] sm:$0xff]  ;;  %v264_v4 = vadd.f32 %v10060_v18, %v263_v29 }
 0x135   :  { %6603 = vmatprep.subr.bf16.mxu1 %v8807_v35  ;;  %v663_v35 = vld [vmem:[#allocation6 + $0xaa0] sm:$0xff] }
 0x136   :  { %6645 = vmatpush1.bf16.msra.mxu0 %v8934_v36  ;;  %v9744_v36 = vpop.f32.mrf.mxu0  ;;  %v8878_v53 = vcombine.low %v659_v34, %v663_v35  ;;  %v643_v58 = vld [vmem:[#allocation6 + $0xa00] sm:$0xff]  ;;  %v300_v17 = vmax.f32 %v264_v4, 0.0 }
 0x137   :  { %6646 = vmatprep.subr.bf16.mxu0 %v8927_v42  ;;  %v10097_v41 = vadd.f32 %v9744_v36, %v10060_v18  ;;  %v8886_v42 = vcombine.low %v667_v23, %v671_v24  ;;  %v1023_v3 = vld [vmem:[#allocation6 + $0x15e0] sm:$0xff]  ;;  %v10110_v24 = vpack.c.bf16 %v297_v13, %v297_v13 }
 0x138   :  { %6604 = vmatpush1.bf16.msra.mxu1 %v8806_v44  ;;  %v779_v44 = vld [vmem:[#allocation6 + $0xe40] sm:$0xff]  ;;  %v276_v46 = vpop.f32.mrf.mxu0  ;;  %v10112_v29 = vpack.c.bf16 %v300_v17, %v300_v17 }
 0x139   :  { %6605 = vmatprep.subr.bf16.mxu1 %v8799_v47  ;;  %v8879_v47 = vcombine.high %v659_v34, %v663_v35  ;;  %v8998_v57 = vcombine.low %v779_v44, %v783_v45  ;;  %v891_v10 = vld [vmem:[#allocation6 + $0x11c0] sm:$0xff] }
 0x13a   :  { %6647 = vmatpush1.bf16.msra.mxu0 %v8926_v48  ;;  %v10100_v48 = vadd.f32 %v10060_v18, %v276_v46  ;;  %v1003_v27 = vld [vmem:[#allocation6 + $0x1540] sm:$0xff] }
 0x13b   :  { %6648 = vmatprep.subr.bf16.mxu0 %v9047_v51  ;;  %v655_v51 = vld [vmem:[#allocation6 + $0xa60] sm:$0xff] }
 0x13c   :  { %6606 = vmatpush1.bf16.msra.mxu1 %v8798_v52  ;;  %v8999_v52 = vcombine.high %v779_v44, %v783_v45  ;;  %v1007_v28 = vld [vmem:[#allocation6 + $0x1560] sm:$0xff] }
 0x13d   :  { %6607 = vmatprep.subr.bf16.mxu1 %v8919_v55  ;;  %v775_v55 = vld [vmem:[#allocation6 + $0xe20] sm:$0xff] }
 0x13e   :  { %6649 = vmatpush2.bf16.msra.mxu0 %v9046_v56  ;;  %v8871_v56 = vcombine.high %v651_v50, %v655_v51  ;;  %v8991_v63 = vcombine.high %v771_v54, %v775_v55  ;;  %v8990_v9 = vcombine.low %v771_v54, %v775_v55  ;;  %v875_v35 = vld [vmem:[#allocation6 + $0x1140] sm:$0xff] }
 0x13f   :  { %6650 = vmatprep.subr.bf16.mxu0 %v9039_v59  ;;  %v647_v59 = vld [vmem:[#allocation6 + $0xa20] sm:$0xff] }
 0x140   :  { %6608 = vmatpush2.bf16.msra.mxu1 %v8918_v60  ;;  %v272_v60 = vadd.f32 %v9741_v20, %v10060_v18  ;;  %v8862_v14 = vcombine.low %v643_v58, %v647_v59  ;;  %v879_v36 = vld [vmem:[#allocation6 + $0x1160] sm:$0xff] }
 0x141   :  { %6609 = vmatprep.subr.bf16.mxu1 %v8911_v1  ;;  %v8870_v1 = vcombine.low %v651_v50, %v655_v51  ;;  %v995_v44 = vld [vmem:[#allocation6 + $0x1500] sm:$0xff]  ;;  %v9095_v46 = vcombine.high %v875_v35, %v879_v36 }
 0x142   :  { %6651 = vmatpush2.bf16.msra.mxu0 %v9038_v2  ;;  %v1019_v2 = vld [vmem:[#allocation6 + $0x15c0] sm:$0xff] }
 0x143   :  { %6652 = vmatprep.subr.bf16.mxu0 %v9031_v5  ;;  %v245_v5 = vadd.f32 %v10060_v18, %v10072_v39  ;;  %v9239_v32 = vcombine.high %v1019_v2, %v1023_v3  ;;  %v9238_v39 = vcombine.low %v1019_v2, %v1023_v3  ;;  %v999_v45 = vld [vmem:[#allocation6 + $0x1520] sm:$0xff] }
 0x144   :  { %6610 = vmatpush2.bf16.msra.mxu1 %v8910_v8  ;;  %v8863_v8 = vcombine.high %v643_v58, %v647_v59  ;;  %v871_v50 = vld [vmem:[#allocation6 + $0x1120] sm:$0xff]  ;;  %v9215_v51 = vcombine.high %v995_v44, %v999_v45 }
 0x145   :  { %6611 = vmatprep.subr.bf16.mxu1 %v8903_v11  ;;  %v895_v11 = vld [vmem:[#allocation6 + $0x11e0] sm:$0xff]  ;;  %v295_v19 = vmax.f32 %v245_v5, 0.0 }
 0x146   :  { %6653 = vmatpush2.bf16.msra.mxu0 %v9030_v12  ;;  %v302_v12 = vmax.f32 %v272_v60, 0.0  ;;  %v9111_v20 = vcombine.high %v891_v10, %v895_v11  ;;  %v991_v54 = vld [vmem:[#allocation6 + $0x14e0] sm:$0xff] }
 0x147   :  { %6654 = vmatprep.subr.bf16.mxu0 %v9023_v15  ;;  %v1011_v15 = vld [vmem:[#allocation6 + $0x1580] sm:$0xff] }
 0x148   :  { %6612 = vmatpush2.bf16.msra.mxu1 %v8902_v16  ;;  %v1015_v16 = vld [vmem:[#allocation6 + $0x15a0] sm:$0xff]  ;;  %v10108_v23 = vpack.c.bf16 %v302_v12, %v302_v12 }
 0x149   :  { %6613 = vmatprep.subr.bf16.mxu1 %v8895_v21  ;;  %v883_v21 = vld [vmem:[#allocation6 + $0x1180] sm:$0xff]  ;;  %v9230_v34 = vcombine.low %v1011_v15, %v1015_v16 }
 0x14a   :  { %6655 = vmatpush2.bf16.msra.mxu0 %v9022_v22  ;;  %v887_v22 = vld [vmem:[#allocation6 + $0x11a0] sm:$0xff] }
 0x14b   :  { %6656 = vmatprep.subr.bf16.mxu0 %v9015_v25  ;;  %v9231_v25 = vcombine.high %v1011_v15, %v1015_v16  ;;  %v863_v58 = vld [vmem:[#allocation6 + $0x10e0] sm:$0xff] }
 0x14c   :  { %6614 = vmatpush2.bf16.msra.mxu1 %v8894_v26  ;;  %v9110_v26 = vcombine.low %v891_v10, %v895_v11  ;;  %v979_v61 = vld [vmem:[#allocation6 + $0x1480] sm:$0xff] }
 0x14d   :  { %6615 = vmatprep.subr.bf16.mxu1 %v8887_v30  ;;  %v10114_v30 = vpack.c.bf16 %v295_v19, %v295_v19  ;;  %v851_v3 = vld [vmem:[#allocation6 + $0x1080] sm:$0xff] }
 0x14e   :  { %6657 = vmatpush2.bf16.msra.mxu0 %v9014_v31  ;;  %v9103_v31 = vcombine.high %v883_v21, %v887_v22  ;;  %v855_v4 = vld [vmem:[#allocation6 + $0x10a0] sm:$0xff] }
 0x14f   :  { %6658 = vmatprep.subr.bf16.mxu0 %v9007_v38  ;;  %v9223_v38 = vcombine.high %v1003_v27, %v1007_v28  ;;  %v975_v10 = vld [vmem:[#allocation6 + $0x1460] sm:$0xff]  ;;  %v9071_v11 = vcombine.high %v851_v3, %v855_v4  ;;  %v9070_v15 = vcombine.low %v851_v3, %v855_v4 }
 0x150   :  { %6616 = vmatpush2.bf16.msra.mxu1 %v8886_v42  ;;  %v9102_v42 = vcombine.low %v883_v21, %v887_v22  ;;  %v843_v13 = vld [vmem:[#allocation6 + $0x1040] sm:$0xff] }
 0x151   :  { %6617 = vmatprep.subr.bf16.mxu1 %v8879_v47  ;;  %v9222_v47 = vcombine.low %v1003_v27, %v1007_v28  ;;  %v963_v16 = vld [vmem:[#allocation6 + $0x1400] sm:$0xff] }
 0x152   :  { %6659 = vmatpush2.bf16.msra.mxu0 %v9006_v49  ;;  %v867_v49 = vld [vmem:[#allocation6 + $0x1100] sm:$0xff] }
 0x153   :  { %6660 = vmatprep.subr.bf16.mxu0 %v8999_v52  ;;  %v9094_v52 = vcombine.low %v875_v35, %v879_v36  ;;  %v9087_v55 = vcombine.high %v867_v49, %v871_v50  ;;  %v9086_v60 = vcombine.low %v867_v49, %v871_v50  ;;  %v967_v17 = vld [vmem:[#allocation6 + $0x1420] sm:$0xff] }
 0x154   :  { %6618 = vmatpush2.bf16.msra.mxu1 %v8878_v53  ;;  %v987_v53 = vld [vmem:[#allocation6 + $0x14c0] sm:$0xff]  ;;  %v9183_v22 = vcombine.high %v963_v16, %v967_v17 }
 0x155   :  { %6619 = vmatprep.subr.bf16.mxu1 %v8871_v56  ;;  %v9214_v56 = vcombine.low %v995_v44, %v999_v45  ;;  %v9207_v59 = vcombine.high %v987_v53, %v991_v54  ;;  %v9206_v2 = vcombine.low %v987_v53, %v991_v54  ;;  %v839_v21 = vld [vmem:[#allocation6 + $0x1020] sm:$0xff] }
 0x156   :  { %6661 = vmatpush2.bf16.msra.mxu0 %v8998_v57  ;;  %v859_v57 = vld [vmem:[#allocation6 + $0x10c0] sm:$0xff] }
 0x157   :  { %6662 = vmatprep.subr.bf16.mxu0 %v8991_v63  ;;  %v983_v63 = vld [vmem:[#allocation6 + $0x14a0] sm:$0xff] }
 0x158   :  { %6620 = vmatpush2.bf16.msra.mxu1 %v8870_v1  ;;  %v9079_v1 = vcombine.high %v859_v57, %v863_v58  ;;  %v9199_v5 = vcombine.high %v979_v61, %v983_v63  ;;  %v9198_v12 = vcombine.low %v979_v61, %v983_v63  ;;  %v1087_v27 = vld [vmem:[#allocation6 + $0x17e0] sm:$0xff] }
 0x159   :  { %6621 = vmatprep.subr.bf16.mxu1 %v8863_v8  ;;  %v9078_v8 = vcombine.low %v859_v57, %v863_v58  ;;  %v959_v35 = vld [vmem:[#allocation6 + $0x13e0] sm:$0xff] }
 0x15a   :  { %6663 = vmatpush2.bf16.msra.mxu0 %v8990_v9  ;;  %v971_v9 = vld [vmem:[#allocation6 + $0x1440] sm:$0xff] }
 0x15b   :  { %6714 = vmatprep.subr.bf16.mxu0 %v9239_v32  ;;  %v847_v32 = vld [vmem:[#allocation6 + $0x1060] sm:$0xff] }
 0x15c   :  { %6622 = vmatpush2.bf16.msra.mxu1 %v8862_v14  ;;  %v9191_v14 = vcombine.high %v971_v9, %v975_v10  ;;  %v9063_v19 = vcombine.high %v843_v13, %v847_v32  ;;  %v1079_v44 = vld [vmem:[#allocation6 + $0x17a0] sm:$0xff] }
 0x15d   :  { %6665 = vmatmul.mubr.bf16.vlgmr.msra.gmra.mxu0 %v10110_v24  ;;  %6673 = vmatprep.subr.bf16.mxu1 %v9111_v20  ;;  %v9190_v20 = vcombine.low %v971_v9, %v975_v10  ;;  %v951_v49 = vld [vmem:[#allocation6 + $0x13a0] sm:$0xff] }
 0x15e   :  { %6715 = vmatpush1.bf16.msra.mxu0 %v9238_v39  ;;  %6746 = vmatprep.mubr.bf16.mxu0 %v10108_v23  ;;  %v835_v39 = vld [vmem:[#allocation6 + $0x1000] sm:$0xff] }
 0x15f   :  { %6624 = vmatmul.mubr.bf16.vlgmr.msra.gmra.mxu1 %v10114_v30  ;;  %6716 = vmatprep.subr.bf16.mxu0 %v9231_v25  ;;  %v9062_v25 = vcombine.low %v843_v13, %v847_v32  ;;  %v9055_v28 = vcombine.high %v835_v39, %v839_v21  ;;  %v1071_v53 = vld [vmem:[#allocation6 + $0x1760] sm:$0xff] }
 0x160   :  { %6674 = vmatpush1.bf16.msra.mxu1 %v9110_v26  ;;  %6705 = vmatprep.mubr.bf16.mxu1 %v10112_v29  ;;  %v1083_v26 = vld [vmem:[#allocation6 + $0x17c0] sm:$0xff] }
 0x161   :  { %6675 = vmatprep.subr.bf16.mxu1 %v9103_v31  ;;  %v9182_v31 = vcombine.low %v963_v16, %v967_v17  ;;  %v9303_v36 = vcombine.high %v1083_v26, %v1087_v27  ;;  %v943_v57 = vld [vmem:[#allocation6 + $0x1360] sm:$0xff] }
 0x162   :  { %6717 = vmatpush1.bf16.msra.mxu0 %v9230_v34  ;;  %v955_v34 = vld [vmem:[#allocation6 + $0x13c0] sm:$0xff] }
 0x163   :  { %6718 = vmatprep.subr.bf16.mxu0 %v9223_v38  ;;  %v9054_v38 = vcombine.low %v835_v39, %v839_v21  ;;  %v9175_v45 = vcombine.high %v955_v34, %v959_v35  ;;  %v1063_v61 = vld [vmem:[#allocation6 + $0x1720] sm:$0xff] }
 0x164   :  { %6676 = vmatpush1.bf16.msra.mxu1 %v9102_v42  ;;  %v1075_v42 = vld [vmem:[#allocation6 + $0x1780] sm:$0xff] }
 0x165   :  { %6677 = vmatprep.subr.bf16.mxu1 %v9095_v46  ;;  %v9302_v46 = vcombine.low %v1083_v26, %v1087_v27  ;;  %v9295_v50 = vcombine.high %v1075_v42, %v1079_v44  ;;  %v935_v3 = vld [vmem:[#allocation6 + $0x1320] sm:$0xff] }
 0x166   :  { %6719 = vmatpush1.bf16.msra.mxu0 %v9222_v47  ;;  %v947_v47 = vld [vmem:[#allocation6 + $0x1380] sm:$0xff] }
 0x167   :  { %6720 = vmatprep.subr.bf16.mxu0 %v9215_v51  ;;  %v9174_v51 = vcombine.low %v955_v34, %v959_v35  ;;  %v9167_v54 = vcombine.high %v947_v47, %v951_v49  ;;  %v1055_v9 = vld [vmem:[#allocation6 + $0x16e0] sm:$0xff] }
 0x168   :  { %6678 = vmatpush1.bf16.msra.mxu1 %v9094_v52  ;;  %v1067_v52 = vld [vmem:[#allocation6 + $0x1740] sm:$0xff] }
 0x169   :  { %6679 = vmatprep.subr.bf16.mxu1 %v9087_v55  ;;  %v9294_v55 = vcombine.low %v1075_v42, %v1079_v44  ;;  %v9287_v58 = vcombine.high %v1067_v52, %v1071_v53  ;;  %v927_v13 = vld [vmem:[#allocation6 + $0x12e0] sm:$0xff] }
 0x16a   :  { %6721 = vmatpush1.bf16.msra.mxu0 %v9214_v56  ;;  %v939_v56 = vld [vmem:[#allocation6 + $0x1340] sm:$0xff] }
 0x16b   :  { %6722 = vmatprep.subr.bf16.mxu0 %v9207_v59  ;;  %v9166_v59 = vcombine.low %v947_v47, %v951_v49  ;;  %v9159_v63 = vcombine.high %v939_v56, %v943_v57  ;;  %v1047_v16 = vld [vmem:[#allocation6 + $0x16a0] sm:$0xff] }
 0x16c   :  { %6680 = vmatpush1.bf16.msra.mxu1 %v9086_v60  ;;  %v1059_v60 = vld [vmem:[#allocation6 + $0x1700] sm:$0xff] }
 0x16d   :  { %6681 = vmatprep.subr.bf16.mxu1 %v9079_v1  ;;  %v9286_v1 = vcombine.low %v1067_v52, %v1071_v53  ;;  %v9279_v4 = vcombine.high %v1059_v60, %v1063_v61  ;;  %v919_v39 = vld [vmem:[#allocation6 + $0x12a0] sm:$0xff] }
 0x16e   :  { %6723 = vmatpush1.bf16.msra.mxu0 %v9206_v2  ;;  %v931_v2 = vld [vmem:[#allocation6 + $0x1300] sm:$0xff] }
 0x16f   :  { %6724 = vmatprep.subr.bf16.mxu0 %v9199_v5  ;;  %v9158_v5 = vcombine.low %v939_v56, %v943_v57  ;;  %v9151_v10 = vcombine.high %v931_v2, %v935_v3  ;;  %v1039_v26 = vld [vmem:[#allocation6 + $0x1660] sm:$0xff] }
 0x170   :  { %6682 = vmatpush1.bf16.msra.mxu1 %v9078_v8  ;;  %v1051_v8 = vld [vmem:[#allocation6 + $0x16c0] sm:$0xff] }
 0x171   :  { %6683 = vmatprep.subr.bf16.mxu1 %v9071_v11  ;;  %v9278_v11 = vcombine.low %v1059_v60, %v1063_v61  ;;  %v9271_v32 = vcombine.high %v1051_v8, %v1055_v9  ;;  %v907_v34 = vld [vmem:[#allocation6 + $0x1240] sm:$0xff] }
 0x172   :  { %6725 = vmatpush1.bf16.msra.mxu0 %v9198_v12  ;;  %v923_v12 = vld [vmem:[#allocation6 + $0x12c0] sm:$0xff] }
 0x173   :  { %6726 = vmatprep.subr.bf16.mxu0 %v9191_v14  ;;  %v9150_v14 = vcombine.low %v931_v2, %v935_v3  ;;  %v9143_v17 = vcombine.high %v923_v12, %v927_v13  ;;  %v911_v35 = vld [vmem:[#allocation6 + $0x1260] sm:$0xff] }
 0x174   :  { %6684 = vmatpush1.bf16.msra.mxu1 %v9070_v15  ;;  %v1043_v15 = vld [vmem:[#allocation6 + $0x1680] sm:$0xff]  ;;  %v9126_v53 = vcombine.low %v907_v34, %v911_v35 }
 0x175   :  { %6685 = vmatprep.subr.bf16.mxu1 %v9063_v19  ;;  %v9270_v19 = vcombine.low %v1051_v8, %v1055_v9  ;;  %v9263_v21 = vcombine.high %v1043_v15, %v1047_v16  ;;  %v1027_v42 = vld [vmem:[#allocation6 + $0x1600] sm:$0xff]  ;;  %v299_v8 = vmax.f32 %v10093_v7, 0.0 }
 0x176   :  { %6727 = vmatpush1.bf16.msra.mxu0 %v9190_v20  ;;  %v915_v20 = vld [vmem:[#allocation6 + $0x1280] sm:$0xff] }
 0x177   :  { %6728 = vmatprep.subr.bf16.mxu0 %v9183_v22  ;;  %v9142_v22 = vcombine.low %v923_v12, %v927_v13  ;;  %v9135_v27 = vcombine.high %v915_v20, %v919_v39  ;;  %v1031_v44 = vld [vmem:[#allocation6 + $0x1620] sm:$0xff] }
 0x178   :  { %6686 = vmatpush1.bf16.msra.mxu1 %v9062_v25  ;;  %v1035_v25 = vld [vmem:[#allocation6 + $0x1640] sm:$0xff]  ;;  %v9247_v52 = vcombine.high %v1027_v42, %v1031_v44 }
 0x179   :  { %6687 = vmatprep.subr.bf16.mxu1 %v9055_v28  ;;  %v9745_v28 = vpop.f32.mrf.mxu0  ;;  %v9254_v47 = vcombine.low %v1035_v25, %v1039_v26  ;;  %v899_v49 = vld [vmem:[#allocation6 + $0x1200] sm:$0xff] }
 0x17a   :  { %6729 = vmatpush1.bf16.msra.mxu0 %v9182_v31  ;;  %v9262_v31 = vcombine.low %v1043_v15, %v1047_v16  ;;  %v1151_v60 = vld [vmem:[#allocation6 + $0x19e0] sm:$0xff] }
 0x17b   :  { %6730 = vmatprep.subr.bf16.mxu0 %v9303_v36  ;;  %v9255_v36 = vcombine.high %v1035_v25, %v1039_v26  ;;  %v1267_v3 = vld [vmem:[#allocation6 + $0x1d80] sm:$0xff] }
 0x17c   :  { %6688 = vmatpush1.bf16.msra.mxu1 %v9054_v38  ;;  %v9134_v38 = vcombine.low %v915_v20, %v919_v39  ;;  %v1263_v15 = vld [vmem:[#allocation6 + $0x1d60] sm:$0xff] }
 0x17d   :  { %6689 = vmatprep.subr.bf16.mxu1 %v9175_v45  ;;  %v9127_v45 = vcombine.high %v907_v34, %v911_v35  ;;  %v1131_v20 = vld [vmem:[#allocation6 + $0x1940] sm:$0xff] }
 0x17e   :  { %6731 = vmatpush2.bf16.msra.mxu0 %v9302_v46  ;;  %v279_v46 = vpop.f32.mrf.mxu0  ;;  %v1135_v39 = vld [vmem:[#allocation6 + $0x1960] sm:$0xff] }
 0x17f   :  { %6732 = vmatprep.subr.bf16.mxu0 %v9295_v50  ;;  %v903_v50 = vld [vmem:[#allocation6 + $0x1220] sm:$0xff]  ;;  %v280_v56 = vadd.f32 %v10060_v18, %v279_v46 }
 0x180   :  { %6690 = vmatpush2.bf16.msra.mxu1 %v9174_v51  ;;  %v288_v51 = vadd.f32 %v9745_v28, %v10060_v18  ;;  %v9119_v57 = vcombine.high %v899_v49, %v903_v50  ;;  %v9118_v2 = vcombine.low %v899_v49, %v903_v50  ;;  %v1251_v25 = vld [vmem:[#allocation6 + $0x1d00] sm:$0xff] }
 0x181   :  { %6691 = vmatprep.subr.bf16.mxu1 %v9167_v54  ;;  %v1275_v54 = vld [vmem:[#allocation6 + $0x1dc0] sm:$0xff] }
 0x182   :  { %6733 = vmatpush2.bf16.msra.mxu0 %v9294_v55  ;;  %v1279_v55 = vld [vmem:[#allocation6 + $0x1de0] sm:$0xff]  ;;  %v306_v61 = vmax.f32 %v288_v51, 0.0 }
 0x183   :  { %6734 = vmatprep.subr.bf16.mxu0 %v9287_v58  ;;  %v9246_v58 = vcombine.low %v1027_v42, %v1031_v44  ;;  %v9494_v9 = vcombine.low %v1275_v54, %v1279_v55  ;;  %v1255_v26 = vld [vmem:[#allocation6 + $0x1d20] sm:$0xff] }
 0x184   :  { %6692 = vmatpush2.bf16.msra.mxu1 %v9166_v59  ;;  %v1147_v59 = vld [vmem:[#allocation6 + $0x19c0] sm:$0xff]  ;;  %v10124_v12 = vpack.c.bf16 %v306_v61, %v306_v61  ;;  %v9471_v35 = vcombine.high %v1251_v25, %v1255_v26 }
 0x185   :  { %6693 = vmatprep.subr.bf16.mxu1 %v9159_v63  ;;  %v301_v63 = vmax.f32 %v10087_v0, 0.0  ;;  %v9367_v18 = vcombine.high %v1147_v59, %v1151_v60  ;;  %v1127_v34 = vld [vmem:[#allocation6 + $0x1920] sm:$0xff] }
 0x186   :  { %6735 = vmatpush2.bf16.msra.mxu0 %v9286_v1  ;;  %v9495_v1 = vcombine.high %v1275_v54, %v1279_v55  ;;  %v1247_v42 = vld [vmem:[#allocation6 + $0x1ce0] sm:$0xff] }
 0x187   :  { %6736 = vmatprep.subr.bf16.mxu0 %v9279_v4  ;;  %v1271_v4 = vld [vmem:[#allocation6 + $0x1da0] sm:$0xff]  ;;  %v10126_v13 = vpack.c.bf16 %v301_v63, %v301_v63 }
 0x188   :  { %6694 = vmatpush2.bf16.msra.mxu1 %v9158_v5  ;;  %v304_v5 = vmax.f32 %v280_v56, 0.0  ;;  %v9487_v0 = vcombine.high %v1267_v3, %v1271_v4  ;;  %v1115_v46 = vld [vmem:[#allocation6 + $0x18c0] sm:$0xff] }
 0x189   :  { %6695 = vmatprep.subr.bf16.mxu1 %v9151_v10  ;;  %v1139_v10 = vld [vmem:[#allocation6 + $0x1980] sm:$0xff] }
 0x18a   :  { %6737 = vmatpush2.bf16.msra.mxu0 %v9278_v11  ;;  %v1143_v11 = vld [vmem:[#allocation6 + $0x19a0] sm:$0xff]  ;;  %v10128_v16 = vpack.c.bf16 %v304_v5, %v304_v5 }
 0x18b   :  { %6738 = vmatprep.subr.bf16.mxu0 %v9271_v32  ;;  %v9366_v32 = vcombine.low %v1147_v59, %v1151_v60  ;;  %v9359_v7 = vcombine.high %v1139_v10, %v1143_v11  ;;  %v1235_v51 = vld [vmem:[#allocation6 + $0x1c80] sm:$0xff] }
 0x18c   :  { %6696 = vmatpush2.bf16.msra.mxu1 %v9150_v14  ;;  %v1259_v14 = vld [vmem:[#allocation6 + $0x1d40] sm:$0xff] }
 0x18d   :  { %6697 = vmatprep.subr.bf16.mxu1 %v9143_v17  ;;  %v10130_v17 = vpack.c.bf16 %v299_v8, %v299_v8  ;;  %v9478_v28 = vcombine.low %v1259_v14, %v1263_v15  ;;  %v1107_v55 = vld [vmem:[#allocation6 + $0x1880] sm:$0xff] }
 0x18e   :  { %6739 = vmatpush2.bf16.msra.mxu0 %v9270_v19  ;;  %v9486_v19 = vcombine.low %v1267_v3, %v1271_v4  ;;  %v1111_v56 = vld [vmem:[#allocation6 + $0x18a0] sm:$0xff] }
 0x18f   :  { %6740 = vmatprep.subr.bf16.mxu0 %v9263_v21  ;;  %v9479_v21 = vcombine.high %v1259_v14, %v1263_v15  ;;  %v1227_v59 = vld [vmem:[#allocation6 + $0x1c40] sm:$0xff]  ;;  %v9327_v61 = vcombine.high %v1107_v55, %v1111_v56  ;;  %v9326_v4 = vcombine.low %v1107_v55, %v1111_v56 }
 0x190   :  { %6698 = vmatpush2.bf16.msra.mxu1 %v9142_v22  ;;  %v9358_v22 = vcombine.low %v1139_v10, %v1143_v11  ;;  %v1231_v60 = vld [vmem:[#allocation6 + $0x1c60] sm:$0xff] }
 0x191   :  { %6699 = vmatprep.subr.bf16.mxu1 %v9135_v27  ;;  %v9351_v27 = vcombine.high %v1131_v20, %v1135_v39  ;;  %v9447_v3 = vcombine.high %v1227_v59, %v1231_v60  ;;  %v1219_v5 = vld [vmem:[#allocation6 + $0x1c00] sm:$0xff] }
 0x192   :  { %6741 = vmatpush2.bf16.msra.mxu0 %v9262_v31  ;;  %v1123_v31 = vld [vmem:[#allocation6 + $0x1900] sm:$0xff] }
 0x193   :  { %6742 = vmatprep.subr.bf16.mxu0 %v9255_v36  ;;  %v9350_v36 = vcombine.low %v1131_v20, %v1135_v39  ;;  %v9343_v44 = vcombine.high %v1123_v31, %v1127_v34  ;;  %v9342_v50 = vcombine.low %v1123_v31, %v1127_v34  ;;  %v1223_v8 = vld [vmem:[#allocation6 + $0x1c20] sm:$0xff] }
 0x194   :  { %6700 = vmatpush2.bf16.msra.mxu1 %v9134_v38  ;;  %v1243_v38 = vld [vmem:[#allocation6 + $0x1cc0] sm:$0xff] }
 0x195   :  { %6701 = vmatprep.subr.bf16.mxu1 %v9127_v45  ;;  %v9470_v45 = vcombine.low %v1251_v25, %v1255_v26  ;;  %v9463_v49 = vcombine.high %v1243_v38, %v1247_v42  ;;  %v9462_v54 = vcombine.low %v1243_v38, %v1247_v42  ;;  %v1091_v10 = vld [vmem:[#allocation6 + $0x1800] sm:$0xff] }
 0x196   :  { %6743 = vmatpush2.bf16.msra.mxu0 %v9254_v47  ;;  %v1119_v47 = vld [vmem:[#allocation6 + $0x18e0] sm:$0xff] }
 0x197   :  { %6744 = vmatprep.subr.bf16.mxu0 %v9247_v52  ;;  %v1239_v52 = vld [vmem:[#allocation6 + $0x1ca0] sm:$0xff] }
 0x198   :  { %6702 = vmatpush2.bf16.msra.mxu1 %v9126_v53  ;;  %v9335_v53 = vcombine.high %v1115_v46, %v1119_v47  ;;  %v9454_v63 = vcombine.low %v1235_v51, %v1239_v52  ;;  %v1095_v11 = vld [vmem:[#allocation6 + $0x1820] sm:$0xff] }
 0x199   :  { %6703 = vmatprep.subr.bf16.mxu1 %v9119_v57  ;;  %v9455_v57 = vcombine.high %v1235_v51, %v1239_v52  ;;  %v1339_v14 = vld [vmem:[#allocation6 + $0x1fc0] sm:$0xff] }
 0x19a   :  { %6745 = vmatpush2.bf16.msra.mxu0 %v9246_v58  ;;  %v9334_v58 = vcombine.low %v1115_v46, %v1119_v47  ;;  %v1343_v15 = vld [vmem:[#allocation6 + $0x1fe0] sm:$0xff] }
 0x19b   :  { %6796 = vmatprep.subr.bf16.mxu0 %v9495_v1  ;;  %v1099_v1 = vld [vmem:[#allocation6 + $0x1840] sm:$0xff] }
 0x19c   :  { %6704 = vmatpush2.bf16.msra.mxu1 %v9118_v2  ;;  %v1103_v2 = vld [vmem:[#allocation6 + $0x1860] sm:$0xff] }
 0x19d   :  { %6747 = vmatmul.mubr.bf16.vlgmr.msra.gmra.mxu0 %v10126_v13  ;;  %6755 = vmatprep.subr.bf16.mxu1 %v9367_v18  ;;  %v9319_v18 = vcombine.high %v1099_v1, %v1103_v2  ;;  %v1211_v20 = vld [vmem:[#allocation6 + $0x1bc0] sm:$0xff] }
 0x19e   :  { %6797 = vmatpush1.bf16.msra.mxu0 %v9494_v9  ;;  %6828 = vmatprep.mubr.bf16.mxu0 %v10124_v12  ;;  %v9446_v9 = vcombine.low %v1227_v59, %v1231_v60  ;;  %v1215_v39 = vld [vmem:[#allocation6 + $0x1be0] sm:$0xff] }
 0x19f   :  { %6706 = vmatmul.mubr.bf16.vlgmr.msra.gmra.mxu1 %v10130_v17  ;;  %6798 = vmatprep.subr.bf16.mxu0 %v9487_v0  ;;  %v9439_v0 = vcombine.high %v1219_v5, %v1223_v8  ;;  %v1331_v25 = vld [vmem:[#allocation6 + $0x1f80] sm:$0xff] }
 0x1a0   :  { %6756 = vmatpush1.bf16.msra.mxu1 %v9366_v32  ;;  %6787 = vmatprep.mubr.bf16.mxu1 %v10128_v16  ;;  %v9318_v32 = vcombine.low %v1099_v1, %v1103_v2  ;;  %v1335_v26 = vld [vmem:[#allocation6 + $0x1fa0] sm:$0xff] }
 0x1a1   :  { %6757 = vmatprep.subr.bf16.mxu1 %v9359_v7  ;;  %v9311_v7 = vcombine.high %v1091_v10, %v1095_v11  ;;  %v1203_v31 = vld [vmem:[#allocation6 + $0x1b80] sm:$0xff] }
 0x1a2   :  { %6799 = vmatpush1.bf16.msra.mxu0 %v9486_v19  ;;  %v9438_v19 = vcombine.low %v1219_v5, %v1223_v8  ;;  %v1207_v34 = vld [vmem:[#allocation6 + $0x1ba0] sm:$0xff] }
 0x1a3   :  { %6800 = vmatprep.subr.bf16.mxu0 %v9479_v21  ;;  %v9559_v21 = vcombine.high %v1339_v14, %v1343_v15  ;;  %v1323_v38 = vld [vmem:[#allocation6 + $0x1f40] sm:$0xff] }
 0x1a4   :  { %6758 = vmatpush1.bf16.msra.mxu1 %v9358_v22  ;;  %v9310_v22 = vcombine.low %v1091_v10, %v1095_v11  ;;  %v1327_v42 = vld [vmem:[#allocation6 + $0x1f60] sm:$0xff] }
 0x1a5   :  { %6759 = vmatprep.subr.bf16.mxu1 %v9351_v27  ;;  %v9431_v27 = vcombine.high %v1211_v20, %v1215_v39  ;;  %v1195_v46 = vld [vmem:[#allocation6 + $0x1b40] sm:$0xff] }
 0x1a6   :  { %6801 = vmatpush1.bf16.msra.mxu0 %v9478_v28  ;;  %v9558_v28 = vcombine.low %v1339_v14, %v1343_v15  ;;  %v1199_v47 = vld [vmem:[#allocation6 + $0x1b60] sm:$0xff] }
 0x1a7   :  { %6802 = vmatprep.subr.bf16.mxu0 %v9471_v35  ;;  %v9551_v35 = vcombine.high %v1331_v25, %v1335_v26  ;;  %v1315_v51 = vld [vmem:[#allocation6 + $0x1f00] sm:$0xff] }
 0x1a8   :  { %6760 = vmatpush1.bf16.msra.mxu1 %v9350_v36  ;;  %v9430_v36 = vcombine.low %v1211_v20, %v1215_v39  ;;  %v1319_v52 = vld [vmem:[#allocation6 + $0x1f20] sm:$0xff] }
 0x1a9   :  { %6761 = vmatprep.subr.bf16.mxu1 %v9343_v44  ;;  %v9423_v44 = vcombine.high %v1203_v31, %v1207_v34  ;;  %v1187_v55 = vld [vmem:[#allocation6 + $0x1b00] sm:$0xff] }
 0x1aa   :  { %6803 = vmatpush1.bf16.msra.mxu0 %v9470_v45  ;;  %v9550_v45 = vcombine.low %v1331_v25, %v1335_v26  ;;  %v1191_v56 = vld [vmem:[#allocation6 + $0x1b20] sm:$0xff] }
 0x1ab   :  { %6804 = vmatprep.subr.bf16.mxu0 %v9463_v49  ;;  %v9543_v49 = vcombine.high %v1323_v38, %v1327_v42  ;;  %v1307_v59 = vld [vmem:[#allocation6 + $0x1ec0] sm:$0xff] }
 0x1ac   :  { %6762 = vmatpush1.bf16.msra.mxu1 %v9342_v50  ;;  %v9422_v50 = vcombine.low %v1203_v31, %v1207_v34  ;;  %v1311_v60 = vld [vmem:[#allocation6 + $0x1ee0] sm:$0xff] }
 0x1ad   :  { %6763 = vmatprep.subr.bf16.mxu1 %v9335_v53  ;;  %v9415_v53 = vcombine.high %v1195_v46, %v1199_v47  ;;  %v1179_v1 = vld [vmem:[#allocation6 + $0x1ac0] sm:$0xff] }
 0x1ae   :  { %6805 = vmatpush1.bf16.msra.mxu0 %v9462_v54  ;;  %v9542_v54 = vcombine.low %v1323_v38, %v1327_v42  ;;  %v1183_v2 = vld [vmem:[#allocation6 + $0x1ae0] sm:$0xff]  ;;  %v508_v42 = vld [vmem:[#allocation6 + $0x5c8] sm:$0xff] }
 0x1af   :  { %6806 = vmatprep.subr.bf16.mxu0 %v9455_v57  ;;  %v9535_v57 = vcombine.high %v1315_v51, %v1319_v52  ;;  %v1299_v5 = vld [vmem:[#allocation6 + $0x1e80] sm:$0xff] }
 0x1b0   :  { %6764 = vmatpush1.bf16.msra.mxu1 %v9334_v58  ;;  %v9414_v58 = vcombine.low %v1195_v46, %v1199_v47  ;;  %v1303_v8 = vld [vmem:[#allocation6 + $0x1ea0] sm:$0xff] }
 0x1b1   :  { %6765 = vmatprep.subr.bf16.mxu1 %v9327_v61  ;;  %v9407_v61 = vcombine.high %v1187_v55, %v1191_v56  ;;  %v1171_v10 = vld [vmem:[#allocation6 + $0x1a80] sm:$0xff] }
 0x1b2   :  { %6807 = vmatpush1.bf16.msra.mxu0 %v9454_v63  ;;  %v9534_v63 = vcombine.low %v1315_v51, %v1319_v52  ;;  %v1175_v11 = vld [vmem:[#allocation6 + $0x1aa0] sm:$0xff]  ;;  %v305_v51 = vmax.f32 %v10097_v41, 0.0 }
 0x1b3   :  { %6808 = vmatprep.subr.bf16.mxu0 %v9447_v3  ;;  %v9527_v3 = vcombine.high %v1307_v59, %v1311_v60  ;;  %v1291_v14 = vld [vmem:[#allocation6 + $0x1e40] sm:$0xff] }
 0x1b4   :  { %6766 = vmatpush1.bf16.msra.mxu1 %v9326_v4  ;;  %v9406_v4 = vcombine.low %v1187_v55, %v1191_v56  ;;  %v1295_v15 = vld [vmem:[#allocation6 + $0x1e60] sm:$0xff]  ;;  %v500_v55 = vld [vmem:[#allocation6 + $0x588] sm:$0xff]  ;;  %v10142_v41 = vpack.c.bf16 %v305_v51, %v305_v51 }
 0x1b5   :  { %6767 = vmatprep.subr.bf16.mxu1 %v9319_v18  ;;  %v9399_v18 = vcombine.high %v1179_v1, %v1183_v2  ;;  %v1163_v20 = vld [vmem:[#allocation6 + $0x1a40] sm:$0xff]  ;;  %v9510_v31 = vcombine.low %v1291_v14, %v1295_v15  ;;  %v504_v56 = vld [vmem:[#allocation6 + $0x5a8] sm:$0xff] }
 0x1b6   :  { %6809 = vmatpush1.bf16.msra.mxu0 %v9446_v9  ;;  %v9526_v9 = vcombine.low %v1307_v59, %v1311_v60  ;;  %v1167_v39 = vld [vmem:[#allocation6 + $0x1a60] sm:$0xff] }
 0x1b7   :  { %6810 = vmatprep.subr.bf16.mxu0 %v9439_v0  ;;  %v9519_v0 = vcombine.high %v1299_v5, %v1303_v8  ;;  %v1283_v25 = vld [vmem:[#allocation6 + $0x1e00] sm:$0xff]  ;;  %v9382_v38 = vcombine.low %v1163_v20, %v1167_v39 }
 0x1b8   :  { %6768 = vmatpush1.bf16.msra.mxu1 %v9318_v32  ;;  %v9398_v32 = vcombine.low %v1179_v1, %v1183_v2  ;;  %v1287_v26 = vld [vmem:[#allocation6 + $0x1e20] sm:$0xff]  ;;  %v376_v1 = vld [vmem:[#allocation6 + $0x1a8] sm:$0xff]  ;;  %v8721_v2 = vcombine.high %v500_v55, %v504_v56 }
 0x1b9   :  { %6769 = vmatprep.subr.bf16.mxu1 %v9311_v7  ;;  %v9391_v7 = vcombine.high %v1171_v10, %v1175_v11  ;;  %v1155_v34 = vld [vmem:[#allocation6 + $0x1a00] sm:$0xff]  ;;  %v9502_v47 = vcombine.low %v1283_v25, %v1287_v26 }
 0x1ba   :  { %6811 = vmatpush1.bf16.msra.mxu0 %v9438_v19  ;;  %v9518_v19 = vcombine.low %v1299_v5, %v1303_v8  ;;  %v1347_v59 = vld [vmem:[#allocation7] sm:$0xff]  ;;  %v492_v5 = vld [vmem:[#allocation6 + $0x548] sm:$0xff] }
 0x1bb   :  { %6812 = vmatprep.subr.bf16.mxu0 %v9559_v21  ;;  %v9511_v21 = vcombine.high %v1291_v14, %v1295_v15  ;;  %v496_v8 = vld [vmem:[#allocation6 + $0x568] sm:$0xff] }
 0x1bc   :  { %6770 = vmatpush1.bf16.msra.mxu1 %v9310_v22  ;;  %v9390_v22 = vcombine.low %v1171_v10, %v1175_v11  ;;  %v8720_v10 = vcombine.low %v500_v55, %v504_v56 }
 0x1bd   :  { %6771 = vmatprep.subr.bf16.mxu1 %v9431_v27  ;;  %v1349_v27 = vlaneseq }
 0x1be   :  { %6813 = vmatpush2.bf16.msra.mxu0 %v9558_v28  ;;  %v9383_v28 = vcombine.high %v1163_v20, %v1167_v39  ;;  %v484_v39 = vld [vmem:[#allocation6 + $0x508] sm:$0xff] }
 0x1bf   :  { %6814 = vmatprep.subr.bf16.mxu0 %v9551_v35  ;;  %v1159_v35 = vld [vmem:[#allocation6 + $0x1a20] sm:$0xff] }
 0x1c0   :  { %6772 = vmatpush2.bf16.msra.mxu1 %v9430_v36  ;;  %v9503_v36 = vcombine.high %v1283_v25, %v1287_v26  ;;  %v9375_v46 = vcombine.high %v1155_v34, %v1159_v35 }
 0x1c1   :  { %6773 = vmatprep.subr.bf16.mxu1 %v9423_v44  ;;  %v512_v44 = vld [vmem:[#allocation6 + $0x5e8] sm:$0xff] }
 0x1c2   :  { %6815 = vmatpush2.bf16.msra.mxu0 %v9550_v45  ;;  %v10136_v45 = vshrl.u32 %v1349_v27, 7  ;;  %v8729_v52 = vcombine.high %v508_v42, %v512_v44  ;;  %v8728_v60 = vcombine.low %v508_v42, %v512_v44 }
 0x1c3   :  { %6816 = vmatprep.subr.bf16.mxu0 %v9543_v49  ;;  %v380_v49 = vld [vmem:[#allocation6 + $0x1c8] sm:$0xff] }
 0x1c4   :  { %6774 = vmatpush2.bf16.msra.mxu1 %v9422_v50  ;;  %v384_v50 = vld [vmem:[#allocation6 + $0x1e8] sm:$0xff] }
 0x1c5   :  { %6775 = vmatprep.subr.bf16.mxu1 %v9415_v53  ;;  %v9374_v53 = vcombine.low %v1155_v34, %v1159_v35  ;;  %v360_v34 = vld [vmem:[#allocation6 + $0x128] sm:$0xff] }
 0x1c6   :  { %6817 = vmatpush2.bf16.msra.mxu0 %v9542_v54  ;;  %v1351_v54 = vsub.s32 0, %v10136_v45 }
 0x1c7   :  { %6818 = vmatprep.subr.bf16.mxu0 %v9535_v57  ;;  %v303_v57 = vmax.f32 %v10100_v48, 0.0 }
 0x1c8   :  { %6776 = vmatpush2.bf16.msra.mxu1 %v9414_v58  ;;  %v8601_v58 = vcombine.high %v380_v49, %v384_v50 }
 0x1c9   :  { %6777 = vmatprep.subr.bf16.mxu1 %v9407_v61  ;;  %v1355_v61 = vsub.s32 1, %v10136_v45 }
 0x1ca   :  { %6819 = vmatpush2.bf16.msra.mxu0 %v9534_v63  ;;  %v372_v63 = vld [vmem:[#allocation6 + $0x188] sm:$0xff] }
 0x1cb   :  { %6820 = vmatprep.subr.bf16.mxu0 %v9527_v3  ;;  %v8600_v3 = vcombine.low %v380_v49, %v384_v50  ;;  %v1356_v11 = vrot.slane %v1347_v59, %v1355_v61  ;;  %v8592_v20 = vcombine.low %v372_v63, %v376_v1  ;;  %v340_v61 = vld [vmem:[#allocation6 + $0x88] sm:$0xff] }
 0x1cc   :  { %6778 = vmatpush2.bf16.msra.mxu1 %v9406_v4  ;;  %v1352_v4 = vrot.slane %v1347_v59, %v1351_v54  ;;  %v352_v54 = vld [vmem:[#allocation6 + $0xe8] sm:$0xff] }
 0x1cd   :  { %6779 = vmatprep.subr.bf16.mxu1 %v9399_v18  ;;  %v10144_v18 = vpack.c.bf16 %v303_v57, %v303_v57  ;;  %v468_v57 = vld [vmem:[#allocation6 + $0x488] sm:$0xff] }
 0x1ce   :  { %6821 = vmatpush2.bf16.msra.mxu0 %v9526_v9  ;;  %v8593_v9 = vcombine.high %v372_v63, %v376_v1  ;;  %v344_v63 = vld [vmem:[#allocation6 + $0xa8] sm:$0xff] }
 0x1cf   :  { %6822 = vmatprep.subr.bf16.mxu0 %v9519_v0  ;;  %v364_v0 = vld [vmem:[#allocation6 + $0x148] sm:$0xff] }
 0x1d0   :  { %6780 = vmatpush2.bf16.msra.mxu1 %v9398_v32  ;;  %v368_v32 = vld [vmem:[#allocation6 + $0x168] sm:$0xff] }
 0x1d1   :  { %6781 = vmatprep.subr.bf16.mxu1 %v9391_v7  ;;  %v8713_v7 = vcombine.high %v492_v5, %v496_v8  ;;  %v8585_v26 = vcombine.high %v364_v0, %v368_v32  ;;  %v8584_v44 = vcombine.low %v364_v0, %v368_v32  ;;  %v452_v0 = vld [vmem:[#allocation6 + $0x408] sm:$0xff] }
 0x1d2   :  { %6823 = vmatpush2.bf16.msra.mxu0 %v9518_v19  ;;  %v456_v32 = vld [vmem:[#allocation6 + $0x428] sm:$0xff] }
 0x1d3   :  { %6824 = vmatprep.subr.bf16.mxu0 %v9511_v21  ;;  %v488_v21 = vld [vmem:[#allocation6 + $0x528] sm:$0xff] }
 0x1d4   :  { %6782 = vmatpush2.bf16.msra.mxu1 %v9390_v22  ;;  %v8705_v42 = vcombine.high %v484_v39, %v488_v21 }
 0x1d5   :  { %6783 = vmatprep.subr.bf16.mxu1 %v9383_v28  ;;  %v8712_v28 = vcombine.low %v492_v5, %v496_v8  ;;  %v8561_v5 = vcombine.high %v340_v61, %v344_v63 }
 0x1d6   :  { %6825 = vmatpush2.bf16.msra.mxu0 %v9510_v31  ;;  %v356_v31 = vld [vmem:[#allocation6 + $0x108] sm:$0xff] }
 0x1d7   :  { %6826 = vmatprep.subr.bf16.mxu0 %v9503_v36  ;;  %v8577_v51 = vcombine.high %v356_v31, %v360_v34  ;;  %v8576_v56 = vcombine.low %v356_v31, %v360_v34 }
 0x1d8   :  { %6784 = vmatpush2.bf16.msra.mxu1 %v9382_v38 }
 0x1d9   :  { %6785 = vmatprep.subr.bf16.mxu1 %v9375_v46  ;;  %v476_v46 = vld [vmem:[#allocation6 + $0x4c8] sm:$0xff] }
 0x1da   :  { %6827 = vmatpush2.bf16.msra.mxu0 %v9502_v47  ;;  %v480_v47 = vld [vmem:[#allocation6 + $0x4e8] sm:$0xff] }
 0x1db   :  { %6878 = vmatprep.subr.bf16.mxu0 %v8729_v52  ;;  %v8704_v52 = vcombine.low %v484_v39, %v488_v21  ;;  %v8697_v55 = vcombine.high %v476_v46, %v480_v47  ;;  %v572_v21 = vld [vmem:[#allocation6 + $0x7c8] sm:$0xff] }
 0x1dc   :  { %6786 = vmatpush2.bf16.msra.mxu1 %v9374_v53  ;;  %v348_v53 = vld [vmem:[#allocation6 + $0xc8] sm:$0xff] }
 0x1dd   :  { %6829 = vmatmul.mubr.bf16.vlgmr.msra.gmra.mxu0 %v10142_v41  ;;  %v6584_v48 = vpop.f32.mrf.mxu0  ;;  %6837 = vmatprep.subr.bf16.mxu1 %v8601_v58  ;;  %v472_v58 = vld [vmem:[#allocation6 + $0x4a8] sm:$0xff]  ;;  %v8569_v59 = vcombine.high %v348_v53, %v352_v54 }
 0x1de   :  { %6879 = vmatpush1.bf16.msra.mxu0 %v8728_v60  ;;  %6910 = vmatprep.mubr.bf16.mxu0 %v10068_v33  ;;  %v8696_v60 = vcombine.low %v476_v46, %v480_v47  ;;  %v8689_v1 = vcombine.high %v468_v57, %v472_v58  ;;  %v8688_v8 = vcombine.low %v468_v57, %v472_v58  ;;  %v436_v46 = vld [vmem:[#allocation6 + $0x388] sm:$0xff] }
 0x1df   :  { %6788 = vmatmul.mubr.bf16.vlgmr.msra.gmra.mxu1 %v10144_v18  ;;  %v6543_v14 = vpop.f32.mrf.mxu1  ;;  %v6586_v15 = vpop.f32.mrf.mxu0  ;;  %6880 = vmatprep.subr.bf16.mxu0 %v8721_v2  ;;  %v8568_v2 = vcombine.low %v348_v53, %v352_v54  ;;  %v440_v47 = vld [vmem:[#allocation6 + $0x3a8] sm:$0xff] }
 0x1e0   :  { %v6544_v19 = vadd.f32 %v6543_v14, %v1352_v4  ;;  %6838 = vmatpush1.bf16.msra.mxu1 %v8600_v3  ;;  %6869 = vmatprep.mubr.bf16.mxu1 %v10074_v40  ;;  %v460_v3 = vld [vmem:[#allocation6 + $0x448] sm:$0xff]  ;;  %v8657_v54 = vcombine.high %v436_v46, %v440_v47 }
 0x1e1   :  { %v6545_v22 = vpop.f32.mrf.mxu1  ;;  %v6588_v25 = vpop.f32.mrf.mxu0  ;;  %6839 = vmatprep.subr.bf16.mxu1 %v8593_v9  ;;  %v464_v4 = vld [vmem:[#allocation6 + $0x468] sm:$0xff] }
 0x1e2   :  { %v6546_v27 = vadd.f32 %v6545_v22, %v1356_v11  ;;  %6881 = vmatpush1.bf16.msra.mxu0 %v8720_v10  ;;  %v10150_v35 = vadd.f32 %v6584_v48, %v6544_v19  ;;  %v332_v48 = vld [vmem:[#allocation6 + $0x48] sm:$0xff]  ;;  %v8681_v10 = vcombine.high %v460_v3, %v464_v4  ;;  %v8560_v11 = vcombine.low %v340_v61, %v344_v63 }
 0x1e3   :  { %v6547_v36 = vpop.f32.mrf.mxu1  ;;  %v6589_v38 = vpop.f32.mrf.mxu0  ;;  %6882 = vmatprep.subr.bf16.mxu0 %v8713_v7  ;;  %v336_v9 = vld [vmem:[#allocation6 + $0x68] sm:$0xff] }
 0x1e4   :  { %6840 = vmatpush1.bf16.msra.mxu1 %v8592_v20  ;;  %v10152_v49 = vadd.f32 %v6586_v15, %v6546_v27  ;;  %v8553_v14 = vcombine.high %v332_v48, %v336_v9  ;;  %v8680_v15 = vcombine.low %v460_v3, %v464_v4  ;;  %v324_v7 = vld [vmem:[#allocation6 + $0x8] sm:$0xff]  ;;  %v8673_v20 = vcombine.high %v452_v0, %v456_v32 }
 0x1e5   :  { %v6548_v50 = vpop.f32.mrf.mxu1  ;;  %6841 = vmatprep.subr.bf16.mxu1 %v8585_v26  ;;  %v328_v19 = vld [vmem:[#allocation6 + $0x28] sm:$0xff]  ;;  %v8552_v39 = vcombine.low %v332_v48, %v336_v9  ;;  %v8672_v26 = vcombine.low %v452_v0, %v456_v32 }
 0x1e6   :  { %6883 = vmatpush1.bf16.msra.mxu0 %v8712_v28  ;;  %v576_v22 = vld [vmem:[#allocation6 + $0x7e8] sm:$0xff]  ;;  %v8545_v25 = vcombine.high %v324_v7, %v328_v19  ;;  %v8544_v34 = vcombine.low %v324_v7, %v328_v19 }
 0x1e7   :  { %6884 = vmatprep.subr.bf16.mxu0 %v8705_v42  ;;  %v444_v27 = vld [vmem:[#allocation6 + $0x3c8] sm:$0xff]  ;;  %v8793_v31 = vcombine.high %v572_v21, %v576_v22 }
 0x1e8   :  { %6842 = vmatpush1.bf16.msra.mxu1 %v8584_v44  ;;  %v448_v28 = vld [vmem:[#allocation6 + $0x3e8] sm:$0xff]  ;;  %v8792_v44 = vcombine.low %v572_v21, %v576_v22 }
 0x1e9   :  { %6843 = vmatprep.subr.bf16.mxu1 %v8577_v51  ;;  %v564_v36 = vld [vmem:[#allocation6 + $0x788] sm:$0xff]  ;;  %v8665_v42 = vcombine.high %v444_v27, %v448_v28  ;;  %v8664_v51 = vcombine.low %v444_v27, %v448_v28 }
 0x1ea   :  { %6885 = vmatpush1.bf16.msra.mxu0 %v8704_v52  ;;  %v568_v38 = vld [vmem:[#allocation6 + $0x7a8] sm:$0xff] }
 0x1eb   :  { %6886 = vmatprep.subr.bf16.mxu0 %v8697_v55  ;;  %v8785_v50 = vcombine.high %v564_v36, %v568_v38  ;;  %v556_v52 = vld [vmem:[#allocation6 + $0x748] sm:$0xff]  ;;  %v8784_v55 = vcombine.low %v564_v36, %v568_v38 }
 0x1ec   :  { %6844 = vmatpush1.bf16.msra.mxu1 %v8576_v56  ;;  %v560_v53 = vld [vmem:[#allocation6 + $0x768] sm:$0xff] }
 0x1ed   :  { %6845 = vmatprep.subr.bf16.mxu1 %v8569_v59  ;;  %v428_v56 = vld [vmem:[#allocation6 + $0x348] sm:$0xff]  ;;  %v8777_v58 = vcombine.high %v556_v52, %v560_v53  ;;  %v8656_v59 = vcombine.low %v436_v46, %v440_v47 }
 0x1ee   :  { %6887 = vmatpush1.bf16.msra.mxu0 %v8696_v60  ;;  %v432_v57 = vld [vmem:[#allocation6 + $0x368] sm:$0xff] }
 0x1ef   :  { %6888 = vmatprep.subr.bf16.mxu0 %v8689_v1  ;;  %v548_v60 = vld [vmem:[#allocation6 + $0x708] sm:$0xff]  ;;  %v8649_v63 = vcombine.high %v428_v56, %v432_v57  ;;  %v8776_v1 = vcombine.low %v556_v52, %v560_v53 }
 0x1f0   :  { %6846 = vmatpush1.bf16.msra.mxu1 %v8568_v2  ;;  %v552_v61 = vld [vmem:[#allocation6 + $0x728] sm:$0xff] }
 0x1f1   :  { %6847 = vmatprep.subr.bf16.mxu1 %v8561_v5  ;;  %v420_v2 = vld [vmem:[#allocation6 + $0x308] sm:$0xff]  ;;  %v8769_v4 = vcombine.high %v548_v60, %v552_v61  ;;  %v8648_v5 = vcombine.low %v428_v56, %v432_v57 }
 0x1f2   :  { %6889 = vmatpush1.bf16.msra.mxu0 %v8688_v8  ;;  %v424_v3 = vld [vmem:[#allocation6 + $0x328] sm:$0xff] }
 0x1f3   :  { %6890 = vmatprep.subr.bf16.mxu0 %v8681_v10  ;;  %v540_v8 = vld [vmem:[#allocation6 + $0x6c8] sm:$0xff]  ;;  %v8641_v9 = vcombine.high %v420_v2, %v424_v3  ;;  %v8768_v10 = vcombine.low %v548_v60, %v552_v61 }
 0x1f4   :  { %6848 = vmatpush1.bf16.msra.mxu1 %v8560_v11  ;;  %v544_v48 = vld [vmem:[#allocation6 + $0x6e8] sm:$0xff] }
 0x1f5   :  { %6849 = vmatprep.subr.bf16.mxu1 %v8553_v14  ;;  %v412_v11 = vld [vmem:[#allocation6 + $0x2c8] sm:$0xff]  ;;  %v8761_v32 = vcombine.high %v540_v8, %v544_v48  ;;  %v8640_v14 = vcombine.low %v420_v2, %v424_v3 }
 0x1f6   :  { %6891 = vmatpush1.bf16.msra.mxu0 %v8680_v15  ;;  %v416_v0 = vld [vmem:[#allocation6 + $0x2e8] sm:$0xff] }
 0x1f7   :  { %6892 = vmatprep.subr.bf16.mxu0 %v8673_v20  ;;  %v532_v15 = vld [vmem:[#allocation6 + $0x688] sm:$0xff]  ;;  %v8633_v19 = vcombine.high %v412_v11, %v416_v0  ;;  %v8760_v20 = vcombine.low %v540_v8, %v544_v48 }
 0x1f8   :  { %6850 = vmatpush1.bf16.msra.mxu1 %v8552_v39  ;;  %v536_v7 = vld [vmem:[#allocation6 + $0x6a8] sm:$0xff] }
 0x1f9   :  { %6851 = vmatprep.subr.bf16.mxu1 %v8545_v25  ;;  %v404_v39 = vld [vmem:[#allocation6 + $0x288] sm:$0xff]  ;;  %v8753_v22 = vcombine.high %v532_v15, %v536_v7  ;;  %v8632_v25 = vcombine.low %v412_v11, %v416_v0 }
 0x1fa   :  { %6893 = vmatpush1.bf16.msra.mxu0 %v8672_v26  ;;  %v408_v21 = vld [vmem:[#allocation6 + $0x2a8] sm:$0xff] }
 0x1fb   :  { %6894 = vmatprep.subr.bf16.mxu0 %v8793_v31  ;;  %v524_v26 = vld [vmem:[#allocation6 + $0x648] sm:$0xff]  ;;  %v8625_v28 = vcombine.high %v404_v39, %v408_v21  ;;  %v8752_v31 = vcombine.low %v532_v15, %v536_v7 }
 0x1fc   :  { %6852 = vmatpush1.bf16.msra.mxu1 %v8544_v34  ;;  %v528_v27 = vld [vmem:[#allocation6 + $0x668] sm:$0xff] }
 0x1fd   :  { %6853 = vmatprep.subr.bf16.mxu1 %v8665_v42  ;;  %v396_v34 = vld [vmem:[#allocation6 + $0x248] sm:$0xff]  ;;  %v8745_v38 = vcombine.high %v524_v26, %v528_v27  ;;  %v8624_v42 = vcombine.low %v404_v39, %v408_v21 }
 0x1fe   :  { %6895 = vmatpush2.bf16.msra.mxu0 %v8792_v44  ;;  %v400_v36 = vld [vmem:[#allocation6 + $0x268] sm:$0xff] }
 0x1ff   :  { %6896 = vmatprep.subr.bf16.mxu0 %v8785_v50  ;;  %v516_v44 = vld [vmem:[#allocation6 + $0x608] sm:$0xff]  ;;  %v8617_v47 = vcombine.high %v396_v34, %v400_v36  ;;  %v8744_v50 = vcombine.low %v524_v26, %v528_v27 }
 0x200   :  { %6854 = vmatpush2.bf16.msra.mxu1 %v8664_v51  ;;  %v520_v46 = vld [vmem:[#allocation6 + $0x628] sm:$0xff] }
 0x201   :  { %6855 = vmatprep.subr.bf16.mxu1 %v8657_v54  ;;  %v388_v51 = vld [vmem:[#allocation6 + $0x208] sm:$0xff]  ;;  %v8737_v53 = vcombine.high %v516_v44, %v520_v46  ;;  %v8616_v54 = vcombine.low %v396_v34, %v400_v36 }
 0x202   :  { %6897 = vmatpush2.bf16.msra.mxu0 %v8784_v55  ;;  %v392_v52 = vld [vmem:[#allocation6 + $0x228] sm:$0xff] }
 0x203   :  { %6898 = vmatprep.subr.bf16.mxu0 %v8777_v58  ;;  %v764_v55 = vld [vmem:[#allocation6 + $0xdc8] sm:$0xff]  ;;  %v8609_v57 = vcombine.high %v388_v51, %v392_v52  ;;  %v8736_v58 = vcombine.low %v516_v44, %v520_v46 }
 0x204   :  { %6856 = vmatpush2.bf16.msra.mxu1 %v8656_v59  ;;  %v768_v56 = vld [vmem:[#allocation6 + $0xde8] sm:$0xff] }
 0x205   :  { %6857 = vmatprep.subr.bf16.mxu1 %v8649_v63  ;;  %v636_v59 = vld [vmem:[#allocation6 + $0x9c8] sm:$0xff]  ;;  %v8985_v61 = vcombine.high %v764_v55, %v768_v56  ;;  %v8608_v63 = vcombine.low %v388_v51, %v392_v52 }
 0x206   :  { %6899 = vmatpush2.bf16.msra.mxu0 %v8776_v1  ;;  %v640_v60 = vld [vmem:[#allocation6 + $0x9e8] sm:$0xff] }
 0x207   :  { %6900 = vmatprep.subr.bf16.mxu0 %v8769_v4  ;;  %v756_v1 = vld [vmem:[#allocation6 + $0xd88] sm:$0xff]  ;;  %v8857_v3 = vcombine.high %v636_v59, %v640_v60  ;;  %v8984_v4 = vcombine.low %v764_v55, %v768_v56 }
 0x208   :  { %6858 = vmatpush2.bf16.msra.mxu1 %v8648_v5  ;;  %v760_v2 = vld [vmem:[#allocation6 + $0xda8] sm:$0xff] }
 0x209   :  { %6859 = vmatprep.subr.bf16.mxu1 %v8641_v9  ;;  %v628_v5 = vld [vmem:[#allocation6 + $0x988] sm:$0xff]  ;;  %v8977_v48 = vcombine.high %v756_v1, %v760_v2  ;;  %v8856_v9 = vcombine.low %v636_v59, %v640_v60 }
 0x20a   :  { %6901 = vmatpush2.bf16.msra.mxu0 %v8768_v10  ;;  %v632_v8 = vld [vmem:[#allocation6 + $0x9a8] sm:$0xff] }
 0x20b   :  { %6902 = vmatprep.subr.bf16.mxu0 %v8761_v32  ;;  %v748_v10 = vld [vmem:[#allocation6 + $0xd48] sm:$0xff]  ;;  %v8849_v32 = vcombine.high %v628_v5, %v632_v8 }
 0x20c   :  { %6860 = vmatpush2.bf16.msra.mxu1 %v8640_v14  ;;  %v752_v11 = vld [vmem:[#allocation6 + $0xd68] sm:$0xff]  ;;  %v8976_v14 = vcombine.low %v756_v1, %v760_v2 }
 0x20d   :  { %6861 = vmatprep.subr.bf16.mxu1 %v8633_v19  ;;  %v620_v15 = vld [vmem:[#allocation6 + $0x948] sm:$0xff]  ;;  %v8969_v39 = vcombine.high %v748_v10, %v752_v11  ;;  %v8968_v36 = vcombine.low %v748_v10, %v752_v11 }
 0x20e   :  { %6903 = vmatpush2.bf16.msra.mxu0 %v8760_v20  ;;  %v624_v7 = vld [vmem:[#allocation6 + $0x968] sm:$0xff] }
 0x20f   :  { %6904 = vmatprep.subr.bf16.mxu0 %v8753_v22  ;;  %v8848_v22 = vcombine.low %v628_v5, %v632_v8  ;;  %v744_v26 = vld [vmem:[#allocation6 + $0xd28] sm:$0xff] }
 0x210   :  { %6862 = vmatpush2.bf16.msra.mxu1 %v8632_v25  ;;  %v740_v25 = vld [vmem:[#allocation6 + $0xd08] sm:$0xff] }
 0x211   :  { %6863 = vmatprep.subr.bf16.mxu1 %v8625_v28  ;;  %v732_v51 = vld [vmem:[#allocation6 + $0xcc8] sm:$0xff] }
 0x212   :  { %6905 = vmatpush2.bf16.msra.mxu0 %v8752_v31  ;;  %v8841_v31 = vcombine.high %v620_v15, %v624_v7  ;;  %v736_v52 = vld [vmem:[#allocation6 + $0xce8] sm:$0xff] }
 0x213   :  { %6906 = vmatprep.subr.bf16.mxu0 %v8745_v38  ;;  %v612_v38 = vld [vmem:[#allocation6 + $0x908] sm:$0xff]  ;;  %v8952_v1 = vcombine.low %v732_v51, %v736_v52 }
 0x214   :  { %6864 = vmatpush2.bf16.msra.mxu1 %v8624_v42  ;;  %v616_v42 = vld [vmem:[#allocation6 + $0x928] sm:$0xff] }
 0x215   :  { %6865 = vmatprep.subr.bf16.mxu1 %v8617_v47  ;;  %v8961_v47 = vcombine.high %v740_v25, %v744_v26  ;;  %v8833_v55 = vcombine.high %v612_v38, %v616_v42  ;;  %v604_v56 = vld [vmem:[#allocation6 + $0x8c8] sm:$0xff]  ;;  %v8832_v59 = vcombine.low %v612_v38, %v616_v42 }
 0x216   :  { %6907 = vmatpush2.bf16.msra.mxu0 %v8744_v50  ;;  %v8840_v50 = vcombine.low %v620_v15, %v624_v7  ;;  %v724_v60 = vld [vmem:[#allocation6 + $0xc88] sm:$0xff] }
 0x217   :  { %6908 = vmatprep.subr.bf16.mxu0 %v8737_v53  ;;  %v596_v2 = vld [vmem:[#allocation6 + $0x888] sm:$0xff] }
 0x218   :  { %6866 = vmatpush2.bf16.msra.mxu1 %v8616_v54  ;;  %v716_v8 = vld [vmem:[#allocation6 + $0xc48] sm:$0xff] }
 0x219   :  { %6867 = vmatprep.subr.bf16.mxu1 %v8609_v57  ;;  %v608_v57 = vld [vmem:[#allocation6 + $0x8e8] sm:$0xff] }
 0x21a   :  { %6909 = vmatpush2.bf16.msra.mxu0 %v8736_v58  ;;  %v8953_v58 = vcombine.high %v732_v51, %v736_v52  ;;  %v8824_v5 = vcombine.low %v604_v56, %v608_v57  ;;  %v588_v11 = vld [vmem:[#allocation6 + $0x848] sm:$0xff] }
 0x21b   :  { %6960 = vmatprep.subr.bf16.mxu0 %v8985_v61  ;;  %v728_v61 = vld [vmem:[#allocation6 + $0xca8] sm:$0xff] }
 0x21c   :  { %6868 = vmatpush2.bf16.msra.mxu1 %v8608_v63  ;;  %v8825_v63 = vcombine.high %v604_v56, %v608_v57  ;;  %v8944_v10 = vcombine.low %v724_v60, %v728_v61  ;;  %v708_v15 = vld [vmem:[#allocation6 + $0xc08] sm:$0xff] }
 0x21d   :  { %v6666_v0 = vpop.f32.mrf.mxu0  ;;  %6911 = vmatmul.mubr.bf16.vlgmr.msra.gmra.mxu0 %v10070_v37  ;;  %6919 = vmatprep.subr.bf16.mxu1 %v8857_v3  ;;  %v600_v3 = vld [vmem:[#allocation6 + $0x8a8] sm:$0xff] }
 0x21e   :  { %6961 = vmatpush1.bf16.msra.mxu0 %v8984_v4  ;;  %6992 = vmatprep.mubr.bf16.mxu0 %v10084_v62  ;;  %v8945_v4 = vcombine.high %v724_v60, %v728_v61  ;;  %v712_v7 = vld [vmem:[#allocation6 + $0xc28] sm:$0xff] }
 0x21f   :  { %v6625_v19 = vpop.f32.mrf.mxu1  ;;  %v6668_v20 = vpop.f32.mrf.mxu0  ;;  %6870 = vmatmul.mubr.bf16.vlgmr.msra.gmra.mxu1 %v10077_v43  ;;  %6962 = vmatprep.subr.bf16.mxu0 %v8977_v48  ;;  %v720_v48 = vld [vmem:[#allocation6 + $0xc68] sm:$0xff] }
 0x220   :  { %v6626_v21 = vadd.f32 %v6625_v19, %v10150_v35  ;;  %6920 = vmatpush1.bf16.msra.mxu1 %v8856_v9  ;;  %6951 = vmatprep.mubr.bf16.mxu1 %v10089_v6  ;;  %v8817_v9 = vcombine.high %v596_v2, %v600_v3  ;;  %v692_v51 = vld [vmem:[#allocation6 + $0xb88] sm:$0xff] }
 0x221   :  { %v6627_v27 = vpop.f32.mrf.mxu1  ;;  %v6670_v28 = vpop.f32.mrf.mxu0  ;;  %6921 = vmatprep.subr.bf16.mxu1 %v8849_v32  ;;  %v8937_v32 = vcombine.high %v716_v8, %v720_v48  ;;  %v696_v52 = vld [vmem:[#allocation6 + $0xba8] sm:$0xff] }
 0x222   :  { %v6628_v34 = vadd.f32 %v6627_v27, %v10152_v49  ;;  %6963 = vmatpush1.bf16.msra.mxu0 %v8976_v14  ;;  %v10160_v44 = vadd.f32 %v6666_v0, %v6626_v21  ;;  %v8960_v49 = vcombine.low %v740_v25, %v744_v26  ;;  %v592_v0 = vld [vmem:[#allocation6 + $0x868] sm:$0xff]  ;;  %v8816_v14 = vcombine.low %v596_v2, %v600_v3 }
 0x223   :  { %v6629_v46 = vpop.f32.mrf.mxu1  ;;  %v6671_v35 = vpop.f32.mrf.mxu0  ;;  %6964 = vmatprep.subr.bf16.mxu0 %v8969_v39  ;;  %v8809_v19 = vcombine.high %v588_v11, %v592_v0  ;;  %v580_v39 = vld [vmem:[#allocation6 + $0x808] sm:$0xff]  ;;  %v8808_v25 = vcombine.low %v588_v11, %v592_v0  ;;  %v8913_v57 = vcombine.high %v692_v51, %v696_v52 }
 0x224   :  { %6922 = vmatpush1.bf16.msra.mxu1 %v8848_v22  ;;  %v10162_v53 = vadd.f32 %v6668_v20, %v6628_v34  ;;  %v8936_v20 = vcombine.low %v716_v8, %v720_v48  ;;  %v584_v21 = vld [vmem:[#allocation6 + $0x828] sm:$0xff]  ;;  %v8929_v22 = vcombine.high %v708_v15, %v712_v7 }
 0x225   :  { %v6630_v54 = vpop.f32.mrf.mxu1  ;;  %6923 = vmatprep.subr.bf16.mxu1 %v8841_v31  ;;  %v828_v26 = vld [vmem:[#allocation6 + $0xfc8] sm:$0xff]  ;;  %v8801_v28 = vcombine.high %v580_v39, %v584_v21  ;;  %v8928_v31 = vcombine.low %v708_v15, %v712_v7  ;;  %v8800_v42 = vcombine.low %v580_v39, %v584_v21 }
 0x226   :  { %6965 = vmatpush1.bf16.msra.mxu0 %v8968_v36  ;;  %v832_v27 = vld [vmem:[#allocation6 + $0xfe8] sm:$0xff] }
 0x227   :  { %6966 = vmatprep.subr.bf16.mxu0 %v8961_v47  ;;  %v700_v34 = vld [vmem:[#allocation6 + $0xbc8] sm:$0xff]  ;;  %v9049_v38 = vcombine.high %v828_v26, %v832_v27 }
 0x228   :  { %6924 = vmatpush1.bf16.msra.mxu1 %v8840_v50  ;;  %v704_v36 = vld [vmem:[#allocation6 + $0xbe8] sm:$0xff]  ;;  %v9048_v50 = vcombine.low %v828_v26, %v832_v27 }
 0x229   :  { %6925 = vmatprep.subr.bf16.mxu1 %v8833_v55  ;;  %v820_v46 = vld [vmem:[#allocation6 + $0xf88] sm:$0xff]  ;;  %v8921_v47 = vcombine.high %v700_v34, %v704_v36  ;;  %v8920_v55 = vcombine.low %v700_v34, %v704_v36 }
 0x22a   :  { %6967 = vmatpush1.bf16.msra.mxu0 %v8960_v49  ;;  %v824_v35 = vld [vmem:[#allocation6 + $0xfa8] sm:$0xff] }
 0x22b   :  { %6968 = vmatprep.subr.bf16.mxu0 %v8953_v58  ;;  %v9041_v54 = vcombine.high %v820_v46, %v824_v35  ;;  %v812_v49 = vld [vmem:[#allocation6 + $0xf48] sm:$0xff]  ;;  %v9040_v58 = vcombine.low %v820_v46, %v824_v35 }
 0x22c   :  { %6926 = vmatpush1.bf16.msra.mxu1 %v8832_v59  ;;  %v816_v56 = vld [vmem:[#allocation6 + $0xf68] sm:$0xff] }
 0x22d   :  { %6927 = vmatprep.subr.bf16.mxu1 %v8825_v63  ;;  %v684_v59 = vld [vmem:[#allocation6 + $0xb48] sm:$0xff]  ;;  %v9033_v61 = vcombine.high %v812_v49, %v816_v56  ;;  %v8912_v63 = vcombine.low %v692_v51, %v696_v52 }
 0x22e   :  { %6969 = vmatpush1.bf16.msra.mxu0 %v8952_v1  ;;  %v688_v60 = vld [vmem:[#allocation6 + $0xb68] sm:$0xff] }
 0x22f   :  { %6970 = vmatprep.subr.bf16.mxu0 %v8945_v4  ;;  %v804_v1 = vld [vmem:[#allocation6 + $0xf08] sm:$0xff]  ;;  %v8905_v3 = vcombine.high %v684_v59, %v688_v60  ;;  %v9032_v4 = vcombine.low %v812_v49, %v816_v56 }
 0x230   :  { %6928 = vmatpush1.bf16.msra.mxu1 %v8824_v5  ;;  %v808_v2 = vld [vmem:[#allocation6 + $0xf28] sm:$0xff] }
 0x231   :  { %6929 = vmatprep.subr.bf16.mxu1 %v8817_v9  ;;  %v676_v5 = vld [vmem:[#allocation6 + $0xb08] sm:$0xff]  ;;  %v9025_v48 = vcombine.high %v804_v1, %v808_v2  ;;  %v8904_v9 = vcombine.low %v684_v59, %v688_v60 }
 0x232   :  { %6971 = vmatpush1.bf16.msra.mxu0 %v8944_v10  ;;  %v680_v8 = vld [vmem:[#allocation6 + $0xb28] sm:$0xff] }
 0x233   :  { %6972 = vmatprep.subr.bf16.mxu0 %v8937_v32  ;;  %v796_v10 = vld [vmem:[#allocation6 + $0xec8] sm:$0xff]  ;;  %v8897_v0 = vcombine.high %v676_v5, %v680_v8  ;;  %v9024_v32 = vcombine.low %v804_v1, %v808_v2 }
 0x234   :  { %6930 = vmatpush1.bf16.msra.mxu1 %v8816_v14  ;;  %v800_v11 = vld [vmem:[#allocation6 + $0xee8] sm:$0xff] }
 0x235   :  { %6931 = vmatprep.subr.bf16.mxu1 %v8809_v19  ;;  %v668_v14 = vld [vmem:[#allocation6 + $0xac8] sm:$0xff]  ;;  %v9017_v7 = vcombine.high %v796_v10, %v800_v11  ;;  %v8896_v19 = vcombine.low %v676_v5, %v680_v8 }
 0x236   :  { %6973 = vmatpush1.bf16.msra.mxu0 %v8936_v20  ;;  %v672_v15 = vld [vmem:[#allocation6 + $0xae8] sm:$0xff] }
 0x237   :  { %6974 = vmatprep.subr.bf16.mxu0 %v8929_v22  ;;  %v788_v20 = vld [vmem:[#allocation6 + $0xe88] sm:$0xff]  ;;  %v8889_v21 = vcombine.high %v668_v14, %v672_v15  ;;  %v9016_v22 = vcombine.low %v796_v10, %v800_v11 }
 0x238   :  { %6932 = vmatpush1.bf16.msra.mxu1 %v8808_v25  ;;  %v792_v39 = vld [vmem:[#allocation6 + $0xea8] sm:$0xff] }
 0x239   :  { %6933 = vmatprep.subr.bf16.mxu1 %v8801_v28  ;;  %v660_v25 = vld [vmem:[#allocation6 + $0xa88] sm:$0xff]  ;;  %v9009_v27 = vcombine.high %v788_v20, %v792_v39  ;;  %v8888_v28 = vcombine.low %v668_v14, %v672_v15 }
 0x23a   :  { %6975 = vmatpush1.bf16.msra.mxu0 %v8928_v31  ;;  %v664_v26 = vld [vmem:[#allocation6 + $0xaa8] sm:$0xff] }
 0x23b   :  { %6976 = vmatprep.subr.bf16.mxu0 %v9049_v38  ;;  %v780_v31 = vld [vmem:[#allocation6 + $0xe48] sm:$0xff]  ;;  %v8881_v36 = vcombine.high %v660_v25, %v664_v26  ;;  %v9008_v38 = vcombine.low %v788_v20, %v792_v39 }
 0x23c   :  { %6934 = vmatpush1.bf16.msra.mxu1 %v8800_v42  ;;  %v784_v34 = vld [vmem:[#allocation6 + $0xe68] sm:$0xff] }
 0x23d   :  { %6935 = vmatprep.subr.bf16.mxu1 %v8921_v47  ;;  %v652_v42 = vld [vmem:[#allocation6 + $0xa48] sm:$0xff]  ;;  %v9001_v35 = vcombine.high %v780_v31, %v784_v34  ;;  %v8880_v47 = vcombine.low %v660_v25, %v664_v26 }
 0x23e   :  { %6977 = vmatpush2.bf16.msra.mxu0 %v9048_v50  ;;  %v656_v46 = vld [vmem:[#allocation6 + $0xa68] sm:$0xff] }
 0x23f   :  { %6978 = vmatprep.subr.bf16.mxu0 %v9041_v54  ;;  %v772_v50 = vld [vmem:[#allocation6 + $0xe08] sm:$0xff]  ;;  %v8873_v52 = vcombine.high %v652_v42, %v656_v46  ;;  %v9000_v54 = vcombine.low %v780_v31, %v784_v34 }
 0x240   :  { %6936 = vmatpush2.bf16.msra.mxu1 %v8920_v55  ;;  %v776_v51 = vld [vmem:[#allocation6 + $0xe28] sm:$0xff] }
 0x241   :  { %6937 = vmatprep.subr.bf16.mxu1 %v8913_v57  ;;  %v644_v55 = vld [vmem:[#allocation6 + $0xa08] sm:$0xff]  ;;  %v8993_v56 = vcombine.high %v772_v50, %v776_v51  ;;  %v8872_v57 = vcombine.low %v652_v42, %v656_v46 }
 0x242   :  { %6979 = vmatpush2.bf16.msra.mxu0 %v9040_v58  ;;  %v648_v49 = vld [vmem:[#allocation6 + $0xa28] sm:$0xff] }
 0x243   :  { %6980 = vmatprep.subr.bf16.mxu0 %v9033_v61  ;;  %v1020_v58 = vld [vmem:[#allocation6 + $0x15c8] sm:$0xff]  ;;  %v8865_v60 = vcombine.high %v644_v55, %v648_v49  ;;  %v8992_v61 = vcombine.low %v772_v50, %v776_v51 }
 0x244   :  { %6938 = vmatpush2.bf16.msra.mxu1 %v8912_v63  ;;  %v1024_v59 = vld [vmem:[#allocation6 + $0x15e8] sm:$0xff] }
 0x245   :  { %6939 = vmatprep.subr.bf16.mxu1 %v8905_v3  ;;  %v892_v63 = vld [vmem:[#allocation6 + $0x11c8] sm:$0xff]  ;;  %v9241_v2 = vcombine.high %v1020_v58, %v1024_v59  ;;  %v8864_v3 = vcombine.low %v644_v55, %v648_v49 }
 0x246   :  { %6981 = vmatpush2.bf16.msra.mxu0 %v9032_v4  ;;  %v896_v1 = vld [vmem:[#allocation6 + $0x11e8] sm:$0xff] }
 0x247   :  { %6982 = vmatprep.subr.bf16.mxu0 %v9025_v48  ;;  %v1012_v4 = vld [vmem:[#allocation6 + $0x1588] sm:$0xff]  ;;  %v9113_v8 = vcombine.high %v892_v63, %v896_v1  ;;  %v9240_v48 = vcombine.low %v1020_v58, %v1024_v59 }
 0x248   :  { %6940 = vmatpush2.bf16.msra.mxu1 %v8904_v9  ;;  %v1016_v5 = vld [vmem:[#allocation6 + $0x15a8] sm:$0xff] }
 0x249   :  { %6941 = vmatprep.subr.bf16.mxu1 %v8897_v0  ;;  %v884_v9 = vld [vmem:[#allocation6 + $0x1188] sm:$0xff]  ;;  %v9233_v11 = vcombine.high %v1012_v4, %v1016_v5  ;;  %v9112_v0 = vcombine.low %v892_v63, %v896_v1 }
 0x24a   :  { %6983 = vmatpush2.bf16.msra.mxu0 %v9024_v32  ;;  %v888_v10 = vld [vmem:[#allocation6 + $0x11a8] sm:$0xff] }
 0x24b   :  { %6984 = vmatprep.subr.bf16.mxu0 %v9017_v7  ;;  %v1004_v32 = vld [vmem:[#allocation6 + $0x1548] sm:$0xff]  ;;  %v9105_v7 = vcombine.high %v884_v9, %v888_v10 }
 0x24c   :  { %6942 = vmatpush2.bf16.msra.mxu1 %v8896_v19  ;;  %v1008_v14 = vld [vmem:[#allocation6 + $0x1568] sm:$0xff]  ;;  %v9232_v19 = vcombine.low %v1012_v4, %v1016_v5 }
 0x24d   :  { %6943 = vmatprep.subr.bf16.mxu1 %v8889_v21  ;;  %v876_v20 = vld [vmem:[#allocation6 + $0x1148] sm:$0xff]  ;;  %v9225_v25 = vcombine.high %v1004_v32, %v1008_v14  ;;  %v9224_v46 = vcombine.low %v1004_v32, %v1008_v14 }
 0x24e   :  { %6985 = vmatpush2.bf16.msra.mxu0 %v9016_v22  ;;  %v880_v39 = vld [vmem:[#allocation6 + $0x1168] sm:$0xff] }
 0x24f   :  { %6986 = vmatprep.subr.bf16.mxu0 %v9009_v27  ;;  %v9104_v27 = vcombine.low %v884_v9, %v888_v10  ;;  %v1000_v31 = vld [vmem:[#allocation6 + $0x1528] sm:$0xff] }
 0x250   :  { %6944 = vmatpush2.bf16.msra.mxu1 %v8888_v28  ;;  %v996_v28 = vld [vmem:[#allocation6 + $0x1508] sm:$0xff] }
 0x251   :  { %6945 = vmatprep.subr.bf16.mxu1 %v8881_v36  ;;  %v988_v55 = vld [vmem:[#allocation6 + $0x14c8] sm:$0xff] }
 0x252   :  { %6987 = vmatpush2.bf16.msra.mxu0 %v9008_v38  ;;  %v9097_v38 = vcombine.high %v876_v20, %v880_v39  ;;  %v992_v49 = vld [vmem:[#allocation6 + $0x14e8] sm:$0xff] }
 0x253   :  { %6988 = vmatprep.subr.bf16.mxu0 %v9001_v35  ;;  %v868_v35 = vld [vmem:[#allocation6 + $0x1108] sm:$0xff]  ;;  %v9208_v4 = vcombine.low %v988_v55, %v992_v49 }
 0x254   :  { %6946 = vmatpush2.bf16.msra.mxu1 %v8880_v47  ;;  %v872_v47 = vld [vmem:[#allocation6 + $0x1128] sm:$0xff] }
 0x255   :  { %6947 = vmatprep.subr.bf16.mxu1 %v8873_v52  ;;  %v9217_v52 = vcombine.high %v996_v28, %v1000_v31  ;;  %v9089_v58 = vcombine.high %v868_v35, %v872_v47  ;;  %v860_v59 = vld [vmem:[#allocation6 + $0x10c8] sm:$0xff]  ;;  %v9088_v63 = vcombine.low %v868_v35, %v872_v47 }
 0x256   :  { %6989 = vmatpush2.bf16.msra.mxu0 %v9000_v54  ;;  %v9096_v54 = vcombine.low %v876_v20, %v880_v39  ;;  %v980_v1 = vld [vmem:[#allocation6 + $0x1488] sm:$0xff] }
 0x257   :  { %6990 = vmatprep.subr.bf16.mxu0 %v8993_v56  ;;  %v852_v5 = vld [vmem:[#allocation6 + $0x1088] sm:$0xff] }
 0x258   :  { %6948 = vmatpush2.bf16.msra.mxu1 %v8872_v57  ;;  %v972_v10 = vld [vmem:[#allocation6 + $0x1448] sm:$0xff] }
 0x259   :  { %6949 = vmatprep.subr.bf16.mxu1 %v8865_v60  ;;  %v864_v60 = vld [vmem:[#allocation6 + $0x10e8] sm:$0xff] }
 0x25a   :  { %6991 = vmatpush2.bf16.msra.mxu0 %v8992_v61  ;;  %v9209_v61 = vcombine.high %v988_v55, %v992_v49  ;;  %v9080_v9 = vcombine.low %v860_v59, %v864_v60  ;;  %v844_v14 = vld [vmem:[#allocation6 + $0x1048] sm:$0xff] }
 0x25b   :  { %7042 = vmatprep.subr.bf16.mxu0 %v9241_v2  ;;  %v984_v2 = vld [vmem:[#allocation6 + $0x14a8] sm:$0xff] }
 0x25c   :  { %6950 = vmatpush2.bf16.msra.mxu1 %v8864_v3  ;;  %v9081_v3 = vcombine.high %v860_v59, %v864_v60  ;;  %v9200_v32 = vcombine.low %v980_v1, %v984_v2  ;;  %v964_v20 = vld [vmem:[#allocation6 + $0x1408] sm:$0xff] }
 0x25d   :  { %v6748_v15 = vpop.f32.mrf.mxu0  ;;  %6993 = vmatmul.mubr.bf16.vlgmr.msra.gmra.mxu0 %v10110_v24  ;;  %7001 = vmatprep.subr.bf16.mxu1 %v9113_v8  ;;  %v856_v8 = vld [vmem:[#allocation6 + $0x10a8] sm:$0xff] }
 0x25e   :  { %7043 = vmatpush1.bf16.msra.mxu0 %v9240_v48  ;;  %7074 = vmatprep.mubr.bf16.mxu0 %v10108_v23  ;;  %v9201_v48 = vcombine.high %v980_v1, %v984_v2  ;;  %v968_v39 = vld [vmem:[#allocation6 + $0x1428] sm:$0xff] }
 0x25f   :  { %v6707_v21 = vpop.f32.mrf.mxu1  ;;  %v6750_v22 = vpop.f32.mrf.mxu0  ;;  %6952 = vmatmul.mubr.bf16.vlgmr.msra.gmra.mxu1 %v10114_v30  ;;  %7044 = vmatprep.subr.bf16.mxu0 %v9233_v11  ;;  %v976_v11 = vld [vmem:[#allocation6 + $0x1468] sm:$0xff] }
 0x260   :  { %v6708_v26 = vadd.f32 %v6707_v21, %v10160_v44  ;;  %7002 = vmatpush1.bf16.msra.mxu1 %v9112_v0  ;;  %7033 = vmatprep.mubr.bf16.mxu1 %v10112_v29  ;;  %v9073_v0 = vcombine.high %v852_v5, %v856_v8  ;;  %v948_v55 = vld [vmem:[#allocation6 + $0x1388] sm:$0xff] }
 0x261   :  { %v6709_v34 = vpop.f32.mrf.mxu1  ;;  %v6752_v36 = vpop.f32.mrf.mxu0  ;;  %7003 = vmatprep.subr.bf16.mxu1 %v9105_v7  ;;  %v9193_v7 = vcombine.high %v972_v10, %v976_v11  ;;  %v952_v49 = vld [vmem:[#allocation6 + $0x13a8] sm:$0xff] }
 0x262   :  { %v6710_v42 = vadd.f32 %v6709_v34, %v10162_v53  ;;  %7045 = vmatpush1.bf16.msra.mxu0 %v9232_v19  ;;  %v10170_v50 = vadd.f32 %v6748_v15, %v6708_v26  ;;  %v9216_v53 = vcombine.low %v996_v28, %v1000_v31  ;;  %v848_v15 = vld [vmem:[#allocation6 + $0x1068] sm:$0xff]  ;;  %v9072_v19 = vcombine.low %v852_v5, %v856_v8 }
 0x263   :  { %v6711_v51 = vpop.f32.mrf.mxu1  ;;  %v6753_v44 = vpop.f32.mrf.mxu0  ;;  %7046 = vmatprep.subr.bf16.mxu0 %v9225_v25  ;;  %v9065_v21 = vcombine.high %v844_v14, %v848_v15  ;;  %v836_v25 = vld [vmem:[#allocation6 + $0x1008] sm:$0xff]  ;;  %v9064_v28 = vcombine.low %v844_v14, %v848_v15  ;;  %v9169_v60 = vcombine.high %v948_v55, %v952_v49 }
 0x264   :  { %7004 = vmatpush1.bf16.msra.mxu1 %v9104_v27  ;;  %v10172_v56 = vadd.f32 %v6750_v22, %v6710_v42  ;;  %v9192_v22 = vcombine.low %v972_v10, %v976_v11  ;;  %v840_v26 = vld [vmem:[#allocation6 + $0x1028] sm:$0xff]  ;;  %v9185_v27 = vcombine.high %v964_v20, %v968_v39 }
 0x265   :  { %v6712_v57 = vpop.f32.mrf.mxu1  ;;  %7005 = vmatprep.subr.bf16.mxu1 %v9097_v38  ;;  %v1084_v31 = vld [vmem:[#allocation6 + $0x17c8] sm:$0xff]  ;;  %v9057_v36 = vcombine.high %v836_v25, %v840_v26  ;;  %v9184_v38 = vcombine.low %v964_v20, %v968_v39  ;;  %v9056_v47 = vcombine.low %v836_v25, %v840_v26 }
 0x266   :  { %7047 = vmatpush1.bf16.msra.mxu0 %v9224_v46  ;;  %v1088_v34 = vld [vmem:[#allocation6 + $0x17e8] sm:$0xff] }
 0x267   :  { %7048 = vmatprep.subr.bf16.mxu0 %v9217_v52  ;;  %v956_v42 = vld [vmem:[#allocation6 + $0x13c8] sm:$0xff]  ;;  %v9305_v35 = vcombine.high %v1084_v31, %v1088_v34 }
 0x268   :  { %7006 = vmatpush1.bf16.msra.mxu1 %v9096_v54  ;;  %v960_v46 = vld [vmem:[#allocation6 + $0x13e8] sm:$0xff]  ;;  %v9304_v54 = vcombine.low %v1084_v31, %v1088_v34 }
 0x269   :  { %7007 = vmatprep.subr.bf16.mxu1 %v9089_v58  ;;  %v1076_v51 = vld [vmem:[#allocation6 + $0x1788] sm:$0xff]  ;;  %v9177_v52 = vcombine.high %v956_v42, %v960_v46  ;;  %v9176_v58 = vcombine.low %v956_v42, %v960_v46 }
 0x26a   :  { %7049 = vmatpush1.bf16.msra.mxu0 %v9216_v53  ;;  %v1080_v44 = vld [vmem:[#allocation6 + $0x17a8] sm:$0xff] }
 0x26b   :  { %7050 = vmatprep.subr.bf16.mxu0 %v9209_v61  ;;  %v9297_v57 = vcombine.high %v1076_v51, %v1080_v44  ;;  %v1068_v53 = vld [vmem:[#allocation6 + $0x1748] sm:$0xff]  ;;  %v9296_v61 = vcombine.low %v1076_v51, %v1080_v44 }
 0x26c   :  { %7008 = vmatpush1.bf16.msra.mxu1 %v9088_v63  ;;  %v1072_v59 = vld [vmem:[#allocation6 + $0x1768] sm:$0xff] }
 0x26d   :  { %7009 = vmatprep.subr.bf16.mxu1 %v9081_v3  ;;  %v940_v63 = vld [vmem:[#allocation6 + $0x1348] sm:$0xff]  ;;  %v9289_v2 = vcombine.high %v1068_v53, %v1072_v59  ;;  %v9168_v3 = vcombine.low %v948_v55, %v952_v49 }
 0x26e   :  { %7051 = vmatpush1.bf16.msra.mxu0 %v9208_v4  ;;  %v944_v1 = vld [vmem:[#allocation6 + $0x1368] sm:$0xff] }
 0x26f   :  { %7052 = vmatprep.subr.bf16.mxu0 %v9201_v48  ;;  %v1060_v4 = vld [vmem:[#allocation6 + $0x1708] sm:$0xff]  ;;  %v9161_v8 = vcombine.high %v940_v63, %v944_v1  ;;  %v9288_v48 = vcombine.low %v1068_v53, %v1072_v59 }
 0x270   :  { %7010 = vmatpush1.bf16.msra.mxu1 %v9080_v9  ;;  %v1064_v5 = vld [vmem:[#allocation6 + $0x1728] sm:$0xff] }
 0x271   :  { %7011 = vmatprep.subr.bf16.mxu1 %v9073_v0  ;;  %v932_v9 = vld [vmem:[#allocation6 + $0x1308] sm:$0xff]  ;;  %v9281_v11 = vcombine.high %v1060_v4, %v1064_v5  ;;  %v9160_v0 = vcombine.low %v940_v63, %v944_v1 }
 0x272   :  { %7053 = vmatpush1.bf16.msra.mxu0 %v9200_v32  ;;  %v936_v10 = vld [vmem:[#allocation6 + $0x1328] sm:$0xff] }
 0x273   :  { %7054 = vmatprep.subr.bf16.mxu0 %v9193_v7  ;;  %v1052_v32 = vld [vmem:[#allocation6 + $0x16c8] sm:$0xff]  ;;  %v9153_v15 = vcombine.high %v932_v9, %v936_v10  ;;  %v9280_v7 = vcombine.low %v1060_v4, %v1064_v5 }
 0x274   :  { %7012 = vmatpush1.bf16.msra.mxu1 %v9072_v19  ;;  %v1056_v14 = vld [vmem:[#allocation6 + $0x16e8] sm:$0xff] }
 0x275   :  { %7013 = vmatprep.subr.bf16.mxu1 %v9065_v21  ;;  %v924_v19 = vld [vmem:[#allocation6 + $0x12c8] sm:$0xff]  ;;  %v9273_v39 = vcombine.high %v1052_v32, %v1056_v14  ;;  %v9152_v21 = vcombine.low %v932_v9, %v936_v10 }
 0x276   :  { %7055 = vmatpush1.bf16.msra.mxu0 %v9192_v22  ;;  %v928_v20 = vld [vmem:[#allocation6 + $0x12e8] sm:$0xff] }
 0x277   :  { %7056 = vmatprep.subr.bf16.mxu0 %v9185_v27  ;;  %v1044_v22 = vld [vmem:[#allocation6 + $0x1688] sm:$0xff]  ;;  %v9145_v26 = vcombine.high %v924_v19, %v928_v20  ;;  %v9272_v27 = vcombine.low %v1052_v32, %v1056_v14 }
 0x278   :  { %7014 = vmatpush1.bf16.msra.mxu1 %v9064_v28  ;;  %v1048_v25 = vld [vmem:[#allocation6 + $0x16a8] sm:$0xff] }
 0x279   :  { %7015 = vmatprep.subr.bf16.mxu1 %v9057_v36  ;;  %v916_v28 = vld [vmem:[#allocation6 + $0x1288] sm:$0xff]  ;;  %v9265_v34 = vcombine.high %v1044_v22, %v1048_v25  ;;  %v9144_v36 = vcombine.low %v924_v19, %v928_v20 }
 0x27a   :  { %7057 = vmatpush1.bf16.msra.mxu0 %v9184_v38  ;;  %v920_v31 = vld [vmem:[#allocation6 + $0x12a8] sm:$0xff] }
 0x27b   :  { %7058 = vmatprep.subr.bf16.mxu0 %v9305_v35  ;;  %v1036_v38 = vld [vmem:[#allocation6 + $0x1648] sm:$0xff]  ;;  %v9137_v46 = vcombine.high %v916_v28, %v920_v31  ;;  %v9264_v35 = vcombine.low %v1044_v22, %v1048_v25 }
 0x27c   :  { %7016 = vmatpush1.bf16.msra.mxu1 %v9056_v47  ;;  %v1040_v42 = vld [vmem:[#allocation6 + $0x1668] sm:$0xff] }
 0x27d   :  { %7017 = vmatprep.subr.bf16.mxu1 %v9177_v52  ;;  %v908_v47 = vld [vmem:[#allocation6 + $0x1248] sm:$0xff]  ;;  %v9257_v44 = vcombine.high %v1036_v38, %v1040_v42  ;;  %v9136_v52 = vcombine.low %v916_v28, %v920_v31 }
 0x27e   :  { %7059 = vmatpush2.bf16.msra.mxu0 %v9304_v54  ;;  %v912_v51 = vld [vmem:[#allocation6 + $0x1268] sm:$0xff] }
 0x27f   :  { %7060 = vmatprep.subr.bf16.mxu0 %v9297_v57  ;;  %v1028_v54 = vld [vmem:[#allocation6 + $0x1608] sm:$0xff]  ;;  %v9129_v49 = vcombine.high %v908_v47, %v912_v51  ;;  %v9256_v57 = vcombine.low %v1036_v38, %v1040_v42 }
 0x280   :  { %7018 = vmatpush2.bf16.msra.mxu1 %v9176_v58  ;;  %v1032_v55 = vld [vmem:[#allocation6 + $0x1628] sm:$0xff] }
 0x281   :  { %7019 = vmatprep.subr.bf16.mxu1 %v9169_v60  ;;  %v900_v58 = vld [vmem:[#allocation6 + $0x1208] sm:$0xff]  ;;  %v9249_v59 = vcombine.high %v1028_v54, %v1032_v55  ;;  %v9128_v60 = vcombine.low %v908_v47, %v912_v51 }
 0x282   :  { %7061 = vmatpush2.bf16.msra.mxu0 %v9296_v61  ;;  %v904_v53 = vld [vmem:[#allocation6 + $0x1228] sm:$0xff] }
 0x283   :  { %7062 = vmatprep.subr.bf16.mxu0 %v9289_v2  ;;  %v1276_v61 = vld [vmem:[#allocation6 + $0x1dc8] sm:$0xff]  ;;  %v9121_v1 = vcombine.high %v900_v58, %v904_v53  ;;  %v9248_v2 = vcombine.low %v1028_v54, %v1032_v55 }
 0x284   :  { %7020 = vmatpush2.bf16.msra.mxu1 %v9168_v3  ;;  %v1280_v63 = vld [vmem:[#allocation6 + $0x1de8] sm:$0xff] }
 0x285   :  { %7021 = vmatprep.subr.bf16.mxu1 %v9161_v8  ;;  %v1148_v3 = vld [vmem:[#allocation6 + $0x19c8] sm:$0xff]  ;;  %v9497_v5 = vcombine.high %v1276_v61, %v1280_v63  ;;  %v9120_v8 = vcombine.low %v900_v58, %v904_v53 }
 0x286   :  { %7063 = vmatpush2.bf16.msra.mxu0 %v9288_v48  ;;  %v1152_v4 = vld [vmem:[#allocation6 + $0x19e8] sm:$0xff] }
 0x287   :  { %7064 = vmatprep.subr.bf16.mxu0 %v9281_v11  ;;  %v1268_v48 = vld [vmem:[#allocation6 + $0x1d88] sm:$0xff]  ;;  %v9369_v10 = vcombine.high %v1148_v3, %v1152_v4  ;;  %v9496_v11 = vcombine.low %v1276_v61, %v1280_v63 }
 0x288   :  { %7022 = vmatpush2.bf16.msra.mxu1 %v9160_v0  ;;  %v1272_v9 = vld [vmem:[#allocation6 + $0x1da8] sm:$0xff] }
 0x289   :  { %7023 = vmatprep.subr.bf16.mxu1 %v9153_v15  ;;  %v1140_v0 = vld [vmem:[#allocation6 + $0x1988] sm:$0xff]  ;;  %v9489_v14 = vcombine.high %v1268_v48, %v1272_v9  ;;  %v9368_v15 = vcombine.low %v1148_v3, %v1152_v4 }
 0x28a   :  { %7065 = vmatpush2.bf16.msra.mxu0 %v9280_v7  ;;  %v1144_v32 = vld [vmem:[#allocation6 + $0x19a8] sm:$0xff] }
 0x28b   :  { %7066 = vmatprep.subr.bf16.mxu0 %v9273_v39  ;;  %v1260_v7 = vld [vmem:[#allocation6 + $0x1d48] sm:$0xff]  ;;  %v9361_v39 = vcombine.high %v1140_v0, %v1144_v32 }
 0x28c   :  { %7024 = vmatpush2.bf16.msra.mxu1 %v9152_v21  ;;  %v1264_v19 = vld [vmem:[#allocation6 + $0x1d68] sm:$0xff]  ;;  %v9488_v21 = vcombine.low %v1268_v48, %v1272_v9 }
 0x28d   :  { %7025 = vmatprep.subr.bf16.mxu1 %v9145_v26  ;;  %v1132_v22 = vld [vmem:[#allocation6 + $0x1948] sm:$0xff]  ;;  %v9481_v28 = vcombine.high %v1260_v7, %v1264_v19 }
 0x28e   :  { %7067 = vmatpush2.bf16.msra.mxu0 %v9272_v27  ;;  %v1136_v25 = vld [vmem:[#allocation6 + $0x1968] sm:$0xff] }
 0x28f   :  { %7068 = vmatprep.subr.bf16.mxu0 %v9265_v34  ;;  %v9360_v34 = vcombine.low %v1140_v0, %v1144_v32  ;;  %v1256_v38 = vld [vmem:[#allocation6 + $0x1d28] sm:$0xff]  ;;  %v9352_v58 = vcombine.low %v1132_v22, %v1136_v25 }
 0x290   :  { %7026 = vmatpush2.bf16.msra.mxu1 %v9144_v36  ;;  %v1252_v36 = vld [vmem:[#allocation6 + $0x1d08] sm:$0xff] }
 0x291   :  { %7027 = vmatprep.subr.bf16.mxu1 %v9137_v46  ;;  %v1128_v54 = vld [vmem:[#allocation6 + $0x1928] sm:$0xff]  ;;  %v9472_v63 = vcombine.low %v1252_v36, %v1256_v38 }
 0x292   :  { %7069 = vmatpush2.bf16.msra.mxu0 %v9264_v35  ;;  %v9353_v35 = vcombine.high %v1132_v22, %v1136_v25  ;;  %v1244_v53 = vld [vmem:[#allocation6 + $0x1cc8] sm:$0xff] }
 0x293   :  { %7070 = vmatprep.subr.bf16.mxu0 %v9257_v44  ;;  %v9480_v44 = vcombine.low %v1260_v7, %v1264_v19  ;;  %v1236_v4 = vld [vmem:[#allocation6 + $0x1c88] sm:$0xff] }
 0x294   :  { %7028 = vmatpush2.bf16.msra.mxu1 %v9136_v52  ;;  %v1124_v52 = vld [vmem:[#allocation6 + $0x1908] sm:$0xff] }
 0x295   :  { %7029 = vmatprep.subr.bf16.mxu1 %v9129_v49  ;;  %v9473_v49 = vcombine.high %v1252_v36, %v1256_v38  ;;  %v9345_v61 = vcombine.high %v1124_v52, %v1128_v54  ;;  %v9344_v3 = vcombine.low %v1124_v52, %v1128_v54  ;;  %v1108_v9 = vld [vmem:[#allocation6 + $0x1888] sm:$0xff] }
 0x296   :  { %7071 = vmatpush2.bf16.msra.mxu0 %v9256_v57  ;;  %v1228_v32 = vld [vmem:[#allocation6 + $0x1c48] sm:$0xff] }
 0x297   :  { %7072 = vmatprep.subr.bf16.mxu0 %v9249_v59  ;;  %v1248_v59 = vld [vmem:[#allocation6 + $0x1ce8] sm:$0xff] }
 0x298   :  { %7030 = vmatpush2.bf16.msra.mxu1 %v9128_v60  ;;  %v9464_v48 = vcombine.low %v1244_v53, %v1248_v59  ;;  %v1100_v19 = vld [vmem:[#allocation6 + $0x1848] sm:$0xff] }
 0x299   :  { %7031 = vmatprep.subr.bf16.mxu1 %v9121_v1  ;;  %v1120_v1 = vld [vmem:[#allocation6 + $0x18e8] sm:$0xff] }
 0x29a   :  { %7073 = vmatpush2.bf16.msra.mxu0 %v9248_v2  ;;  %v9465_v2 = vcombine.high %v1244_v53, %v1248_v59  ;;  %v1220_v22 = vld [vmem:[#allocation6 + $0x1c08] sm:$0xff] }
 0x29b   :  { %7124 = vmatprep.subr.bf16.mxu0 %v9497_v5  ;;  %v1240_v5 = vld [vmem:[#allocation6 + $0x1ca8] sm:$0xff] }
 0x29c   :  { %7032 = vmatpush2.bf16.msra.mxu1 %v9120_v8  ;;  %v9456_v7 = vcombine.low %v1236_v4, %v1240_v5  ;;  %v1224_v25 = vld [vmem:[#allocation6 + $0x1c28] sm:$0xff] }
 0x29d   :  { %v6830_v20 = vpop.f32.mrf.mxu0  ;;  %7075 = vmatmul.mubr.bf16.vlgmr.msra.gmra.mxu0 %v10126_v13  ;;  %7083 = vmatprep.subr.bf16.mxu1 %v9369_v10  ;;  %v1112_v10 = vld [vmem:[#allocation6 + $0x18a8] sm:$0xff] }
 0x29e   :  { %7125 = vmatpush1.bf16.msra.mxu0 %v9496_v11  ;;  %7156 = vmatprep.mubr.bf16.mxu0 %v10124_v12  ;;  %v9457_v11 = vcombine.high %v1236_v4, %v1240_v5  ;;  %v1340_v38 = vld [vmem:[#allocation6 + $0x1fc8] sm:$0xff] }
 0x29f   :  { %v6789_v26 = vpop.f32.mrf.mxu1  ;;  %v6832_v27 = vpop.f32.mrf.mxu0  ;;  %7034 = vmatmul.mubr.bf16.vlgmr.msra.gmra.mxu1 %v10130_v17  ;;  %7126 = vmatprep.subr.bf16.mxu0 %v9489_v14  ;;  %v1232_v14 = vld [vmem:[#allocation6 + $0x1c68] sm:$0xff] }
 0x2a0   :  { %v6790_v31 = vadd.f32 %v6789_v26, %v10170_v50  ;;  %7084 = vmatpush1.bf16.msra.mxu1 %v9368_v15  ;;  %7115 = vmatprep.mubr.bf16.mxu1 %v10128_v16  ;;  %v9329_v15 = vcombine.high %v1108_v9, %v1112_v10  ;;  %v1204_v53 = vld [vmem:[#allocation6 + $0x1b88] sm:$0xff] }
 0x2a1   :  { %v6791_v42 = vpop.f32.mrf.mxu1  ;;  %v6834_v46 = vpop.f32.mrf.mxu0  ;;  %7085 = vmatprep.subr.bf16.mxu1 %v9361_v39  ;;  %v9449_v39 = vcombine.high %v1228_v32, %v1232_v14  ;;  %v1208_v59 = vld [vmem:[#allocation6 + $0x1ba8] sm:$0xff] }
 0x2a2   :  { %v10179_v47 = vadd.f32 %v6830_v20, %v6790_v31  ;;  %v6792_v51 = vadd.f32 %v6791_v42, %v10172_v56  ;;  %7127 = vmatpush1.bf16.msra.mxu0 %v9488_v21  ;;  %v1116_v56 = vld [vmem:[#allocation6 + $0x18c8] sm:$0xff]  ;;  %v9328_v21 = vcombine.low %v1108_v9, %v1112_v10 }
 0x2a3   :  { %v6793_v55 = vpop.f32.mrf.mxu1  ;;  %v6835_v50 = vpop.f32.mrf.mxu0  ;;  %7128 = vmatprep.subr.bf16.mxu0 %v9481_v28  ;;  %v9337_v8 = vcombine.high %v1116_v56, %v1120_v1  ;;  %v9336_v0 = vcombine.low %v1116_v56, %v1120_v1  ;;  %v1104_v20 = vld [vmem:[#allocation6 + $0x1868] sm:$0xff]  ;;  %v9425_v1 = vcombine.high %v1204_v53, %v1208_v59 }
 0x2a4   :  { %v10182_v57 = vadd.f32 %v6832_v27, %v6792_v51  ;;  %7086 = vmatpush1.bf16.msra.mxu1 %v9360_v34  ;;  %v9321_v26 = vcombine.high %v1100_v19, %v1104_v20  ;;  %v9448_v27 = vcombine.low %v1228_v32, %v1232_v14  ;;  %v1092_v28 = vld [vmem:[#allocation6 + $0x1808] sm:$0xff]  ;;  %v9441_v34 = vcombine.high %v1220_v22, %v1224_v25 }
 0x2a5   :  { %v6794_v60 = vpop.f32.mrf.mxu1  ;;  %7087 = vmatprep.subr.bf16.mxu1 %v9353_v35  ;;  %v1096_v31 = vld [vmem:[#allocation6 + $0x1828] sm:$0xff]  ;;  %v9320_v36 = vcombine.low %v1100_v19, %v1104_v20  ;;  %v9440_v35 = vcombine.low %v1220_v22, %v1224_v25 }
 0x2a6   :  { %7129 = vmatpush1.bf16.msra.mxu0 %v9480_v44  ;;  %v1344_v42 = vld [vmem:[#allocation6 + $0x1fe8] sm:$0xff]  ;;  %v9313_v46 = vcombine.high %v1092_v28, %v1096_v31  ;;  %v9312_v54 = vcombine.low %v1092_v28, %v1096_v31 }
 0x2a7   :  { %7130 = vmatprep.subr.bf16.mxu0 %v9473_v49  ;;  %v1212_v51 = vld [vmem:[#allocation6 + $0x1bc8] sm:$0xff]  ;;  %v9561_v52 = vcombine.high %v1340_v38, %v1344_v42 }
 0x2a8   :  { %7088 = vmatpush1.bf16.msra.mxu1 %v9352_v58  ;;  %v1216_v44 = vld [vmem:[#allocation6 + $0x1be8] sm:$0xff]  ;;  %v9560_v58 = vcombine.low %v1340_v38, %v1344_v42 }
 0x2a9   :  { %7089 = vmatprep.subr.bf16.mxu1 %v9345_v61  ;;  %v1332_v55 = vld [vmem:[#allocation6 + $0x1f88] sm:$0xff]  ;;  %v9433_v49 = vcombine.high %v1212_v51, %v1216_v44  ;;  %v9432_v61 = vcombine.low %v1212_v51, %v1216_v44 }
 0x2aa   :  { %7131 = vmatpush1.bf16.msra.mxu0 %v9472_v63  ;;  %v1336_v50 = vld [vmem:[#allocation6 + $0x1fa8] sm:$0xff] }
 0x2ab   :  { %7132 = vmatprep.subr.bf16.mxu0 %v9465_v2  ;;  %v9553_v60 = vcombine.high %v1332_v55, %v1336_v50  ;;  %v1324_v63 = vld [vmem:[#allocation6 + $0x1f48] sm:$0xff]  ;;  %v9552_v2 = vcombine.low %v1332_v55, %v1336_v50 }
 0x2ac   :  { %7090 = vmatpush1.bf16.msra.mxu1 %v9344_v3  ;;  %v1328_v56 = vld [vmem:[#allocation6 + $0x1f68] sm:$0xff] }
 0x2ad   :  { %7091 = vmatprep.subr.bf16.mxu1 %v9337_v8  ;;  %v1196_v3 = vld [vmem:[#allocation6 + $0x1b48] sm:$0xff]  ;;  %v9545_v5 = vcombine.high %v1324_v63, %v1328_v56  ;;  %v9424_v8 = vcombine.low %v1204_v53, %v1208_v59 }
 0x2ae   :  { %7133 = vmatpush1.bf16.msra.mxu0 %v9464_v48  ;;  %v1200_v4 = vld [vmem:[#allocation6 + $0x1b68] sm:$0xff] }
 0x2af   :  { %7134 = vmatprep.subr.bf16.mxu0 %v9457_v11  ;;  %v1316_v48 = vld [vmem:[#allocation6 + $0x1f08] sm:$0xff]  ;;  %v9417_v10 = vcombine.high %v1196_v3, %v1200_v4  ;;  %v9544_v11 = vcombine.low %v1324_v63, %v1328_v56 }
 0x2b0   :  { %7092 = vmatpush1.bf16.msra.mxu1 %v9336_v0  ;;  %v1320_v9 = vld [vmem:[#allocation6 + $0x1f28] sm:$0xff] }
 0x2b1   :  { %7093 = vmatprep.subr.bf16.mxu1 %v9329_v15  ;;  %v1188_v0 = vld [vmem:[#allocation6 + $0x1b08] sm:$0xff]  ;;  %v9537_v14 = vcombine.high %v1316_v48, %v1320_v9  ;;  %v9416_v15 = vcombine.low %v1196_v3, %v1200_v4  ;;  %v513_v3 = vld [vmem:[#allocation6 + $0x5f0] sm:$0xff] }
 0x2b2   :  { %7135 = vmatpush1.bf16.msra.mxu0 %v9456_v7  ;;  %v1192_v32 = vld [vmem:[#allocation6 + $0x1b28] sm:$0xff] }
 0x2b3   :  { %7136 = vmatprep.subr.bf16.mxu0 %v9449_v39  ;;  %v1308_v7 = vld [vmem:[#allocation6 + $0x1ec8] sm:$0xff]  ;;  %v9409_v20 = vcombine.high %v1188_v0, %v1192_v32  ;;  %v9536_v39 = vcombine.low %v1316_v48, %v1320_v9  ;;  %v385_v48 = vld [vmem:[#allocation6 + $0x1f0] sm:$0xff] }
 0x2b4   :  { %7094 = vmatpush1.bf16.msra.mxu1 %v9328_v21  ;;  %v1312_v19 = vld [vmem:[#allocation6 + $0x1ee8] sm:$0xff] }
 0x2b5   :  { %7095 = vmatprep.subr.bf16.mxu1 %v9321_v26  ;;  %v1180_v21 = vld [vmem:[#allocation6 + $0x1ac8] sm:$0xff]  ;;  %v9529_v25 = vcombine.high %v1308_v7, %v1312_v19  ;;  %v9408_v26 = vcombine.low %v1188_v0, %v1192_v32  ;;  %v501_v0 = vld [vmem:[#allocation6 + $0x590] sm:$0xff] }
 0x2b6   :  { %7137 = vmatpush1.bf16.msra.mxu0 %v9448_v27  ;;  %v1184_v22 = vld [vmem:[#allocation6 + $0x1ae8] sm:$0xff]  ;;  %v505_v32 = vld [vmem:[#allocation6 + $0x5b0] sm:$0xff] }
 0x2b7   :  { %7138 = vmatprep.subr.bf16.mxu0 %v9441_v34  ;;  %v1300_v27 = vld [vmem:[#allocation6 + $0x1e88] sm:$0xff]  ;;  %v9401_v31 = vcombine.high %v1180_v21, %v1184_v22  ;;  %v9528_v34 = vcombine.low %v1308_v7, %v1312_v19  ;;  %v1363_v7 = vsub.s32 3, %v10136_v45  ;;  %v373_v19 = vld [vmem:[#allocation6 + $0x190] sm:$0xff] }
 0x2b8   :  { %7096 = vmatpush1.bf16.msra.mxu1 %v9320_v36  ;;  %v1304_v28 = vld [vmem:[#allocation6 + $0x1ea8] sm:$0xff] }
 0x2b9   :  { %7097 = vmatprep.subr.bf16.mxu1 %v9313_v46  ;;  %v1172_v36 = vld [vmem:[#allocation6 + $0x1a88] sm:$0xff]  ;;  %v9521_v42 = vcombine.high %v1300_v27, %v1304_v28  ;;  %v9400_v46 = vcombine.low %v1180_v21, %v1184_v22  ;;  %v9829_v21 = vld [vmem:[#allocation7] sm:$0xff] }
 0x2ba   :  { %7139 = vmatpush1.bf16.msra.mxu0 %v9440_v35  ;;  %v1176_v38 = vld [vmem:[#allocation6 + $0x1aa8] sm:$0xff] }
 0x2bb   :  { %7140 = vmatprep.subr.bf16.mxu0 %v9561_v52  ;;  %v1292_v35 = vld [vmem:[#allocation6 + $0x1e48] sm:$0xff]  ;;  %v9393_v44 = vcombine.high %v1172_v36, %v1176_v38  ;;  %v9520_v52 = vcombine.low %v1300_v27, %v1304_v28  ;;  %v497_v27 = vld [vmem:[#allocation6 + $0x570] sm:$0xff] }
 0x2bc   :  { %7098 = vmatpush1.bf16.msra.mxu1 %v9312_v54  ;;  %v1296_v51 = vld [vmem:[#allocation6 + $0x1e68] sm:$0xff] }
 0x2bd   :  { %7099 = vmatprep.subr.bf16.mxu1 %v9433_v49  ;;  %v1164_v54 = vld [vmem:[#allocation6 + $0x1a48] sm:$0xff]  ;;  %v9513_v50 = vcombine.high %v1292_v35, %v1296_v51  ;;  %v9392_v49 = vcombine.low %v1172_v36, %v1176_v38  ;;  %v8722_v36 = vcombine.low %v501_v0, %v505_v32  ;;  %v365_v38 = vld [vmem:[#allocation6 + $0x150] sm:$0xff] }
 0x2be   :  { %7141 = vmatpush2.bf16.msra.mxu0 %v9560_v58  ;;  %v1168_v55 = vld [vmem:[#allocation6 + $0x1a68] sm:$0xff] }
 0x2bf   :  { %7142 = vmatprep.subr.bf16.mxu0 %v9553_v60  ;;  %v1284_v58 = vld [vmem:[#allocation6 + $0x1e08] sm:$0xff]  ;;  %v9385_v59 = vcombine.high %v1164_v54, %v1168_v55  ;;  %v9512_v60 = vcombine.low %v1292_v35, %v1296_v51 }
 0x2c0   :  { %7100 = vmatpush2.bf16.msra.mxu1 %v9432_v61  ;;  %v1288_v53 = vld [vmem:[#allocation6 + $0x1e28] sm:$0xff] }
 0x2c1   :  { %7101 = vmatprep.subr.bf16.mxu1 %v9425_v1  ;;  %v1156_v61 = vld [vmem:[#allocation6 + $0x1a08] sm:$0xff]  ;;  %v9505_v56 = vcombine.high %v1284_v58, %v1288_v53  ;;  %v9384_v1 = vcombine.low %v1164_v54, %v1168_v55  ;;  %v485_v54 = vld [vmem:[#allocation6 + $0x510] sm:$0xff] }
 0x2c2   :  { %7143 = vmatpush2.bf16.msra.mxu0 %v9552_v2  ;;  %v1160_v63 = vld [vmem:[#allocation6 + $0x1a28] sm:$0xff]  ;;  %v509_v2 = vld [vmem:[#allocation6 + $0x5d0] sm:$0xff] }
 0x2c3   :  { %7144 = vmatprep.subr.bf16.mxu0 %v9545_v5  ;;  %v9377_v4 = vcombine.high %v1156_v61, %v1160_v63  ;;  %v9504_v5 = vcombine.low %v1284_v58, %v1288_v53  ;;  %v8731_v9 = vcombine.high %v509_v2, %v513_v3  ;;  %v489_v55 = vld [vmem:[#allocation6 + $0x530] sm:$0xff] }
 0x2c4   :  { %7102 = vmatpush2.bf16.msra.mxu1 %v9424_v8  ;;  %v381_v8 = vld [vmem:[#allocation6 + $0x1d0] sm:$0xff] }
 0x2c5   :  { %7103 = vmatprep.subr.bf16.mxu1 %v9417_v10  ;;  %v9376_v10 = vcombine.low %v1156_v61, %v1160_v63  ;;  %v361_v61 = vld [vmem:[#allocation6 + $0x130] sm:$0xff] }
 0x2c6   :  { %7145 = vmatpush2.bf16.msra.mxu0 %v9544_v11  ;;  %v1359_v11 = vsub.s32 2, %v10136_v45 }
 0x2c7   :  { %7146 = vmatprep.subr.bf16.mxu0 %v9537_v14  ;;  %v8603_v14 = vcombine.high %v381_v8, %v385_v48 }
 0x2c8   :  { %7104 = vmatpush2.bf16.msra.mxu1 %v9416_v15  ;;  %v8730_v15 = vcombine.low %v509_v2, %v513_v3  ;;  %v1360_v22 = vrot.slane %v9829_v21, %v1359_v11  ;;  %v8707_v2 = vcombine.high %v485_v54, %v489_v55  ;;  %v349_v11 = vld [vmem:[#allocation6 + $0xd0] sm:$0xff] }
 0x2c9   :  { %7105 = vmatprep.subr.bf16.mxu1 %v9409_v20  ;;  %v377_v20 = vld [vmem:[#allocation6 + $0x1b0] sm:$0xff] }
 0x2ca   :  { %7147 = vmatpush2.bf16.msra.mxu0 %v9536_v39  ;;  %v8723_v39 = vcombine.high %v501_v0, %v505_v32  ;;  %v353_v0 = vld [vmem:[#allocation6 + $0xf0] sm:$0xff] }
 0x2cb   :  { %7148 = vmatprep.subr.bf16.mxu0 %v9529_v25  ;;  %v8602_v25 = vcombine.low %v381_v8, %v385_v48 }
 0x2cc   :  { %7106 = vmatpush2.bf16.msra.mxu1 %v9408_v26  ;;  %v493_v26 = vld [vmem:[#allocation6 + $0x550] sm:$0xff] }
 0x2cd   :  { %7107 = vmatprep.subr.bf16.mxu1 %v9401_v31  ;;  %v8595_v31 = vcombine.high %v373_v19, %v377_v20  ;;  %v8715_v51 = vcombine.high %v493_v26, %v497_v27 }
 0x2ce   :  { %7149 = vmatpush2.bf16.msra.mxu0 %v9528_v34  ;;  %v1364_v34 = vrot.slane %v9829_v21, %v1363_v7  ;;  %v473_v7 = vld [vmem:[#allocation6 + $0x4b0] sm:$0xff] }
 0x2cf   :  { %7150 = vmatprep.subr.bf16.mxu0 %v9521_v42  ;;  %v369_v42 = vld [vmem:[#allocation6 + $0x170] sm:$0xff] }
 0x2d0   :  { %7108 = vmatpush2.bf16.msra.mxu1 %v9400_v46  ;;  %v8587_v58 = vcombine.high %v365_v38, %v369_v42  ;;  %v8586_v3 = vcombine.low %v365_v38, %v369_v42  ;;  %v345_v21 = vld [vmem:[#allocation6 + $0xb0] sm:$0xff] }
 0x2d1   :  { %7109 = vmatprep.subr.bf16.mxu1 %v9393_v44 }
 0x2d2   :  { %7151 = vmatpush2.bf16.msra.mxu0 %v9520_v52  ;;  %v8594_v52 = vcombine.low %v373_v19, %v377_v20  ;;  %v8571_v19 = vcombine.high %v349_v11, %v353_v0 }
 0x2d3   :  { %7152 = vmatprep.subr.bf16.mxu0 %v9513_v50 }
 0x2d4   :  { %7110 = vmatpush2.bf16.msra.mxu1 %v9392_v49 }
 0x2d5   :  { %7111 = vmatprep.subr.bf16.mxu1 %v9385_v59  ;;  %v8714_v59 = vcombine.low %v493_v26, %v497_v27  ;;  %v461_v26 = vld [vmem:[#allocation6 + $0x450] sm:$0xff] }
 0x2d6   :  { %7153 = vmatpush2.bf16.msra.mxu0 %v9512_v60  ;;  %v357_v60 = vld [vmem:[#allocation6 + $0x110] sm:$0xff] }
 0x2d7   :  { %7154 = vmatprep.subr.bf16.mxu0 %v9505_v56  ;;  %v465_v27 = vld [vmem:[#allocation6 + $0x470] sm:$0xff] }
 0x2d8   :  { %7112 = vmatpush2.bf16.msra.mxu1 %v9384_v1  ;;  %v8683_v38 = vcombine.high %v461_v26, %v465_v27 }
 0x2d9   :  { %7113 = vmatprep.subr.bf16.mxu1 %v9377_v4  ;;  %v477_v4 = vld [vmem:[#allocation6 + $0x4d0] sm:$0xff] }
 0x2da   :  { %7155 = vmatpush2.bf16.msra.mxu0 %v9504_v5  ;;  %v481_v5 = vld [vmem:[#allocation6 + $0x4f0] sm:$0xff] }
 0x2db   :  { %7206 = vmatprep.subr.bf16.mxu0 %v8731_v9  ;;  %v8579_v9 = vcombine.high %v357_v60, %v361_v61  ;;  %v8699_v32 = vcombine.high %v477_v4, %v481_v5  ;;  %v8698_v20 = vcombine.low %v477_v4, %v481_v5 }
 0x2dc   :  { %7114 = vmatpush2.bf16.msra.mxu1 %v9376_v10  ;;  %v8706_v10 = vcombine.low %v485_v54, %v489_v55  ;;  %v329_v54 = vld [vmem:[#allocation6 + $0x30] sm:$0xff] }
 0x2dd   :  { %v6912_v28 = vpop.f32.mrf.mxu0  ;;  %7157 = vmatmul.mubr.bf16.vlgmr.msra.gmra.mxu0 %v10142_v41  ;;  %7165 = vmatprep.subr.bf16.mxu1 %v8603_v14  ;;  %v8578_v14 = vcombine.low %v357_v60, %v361_v61  ;;  %v445_v60 = vld [vmem:[#allocation6 + $0x3d0] sm:$0xff] }
 0x2de   :  { %7207 = vmatpush1.bf16.msra.mxu0 %v8730_v15  ;;  %7238 = vmatprep.mubr.bf16.mxu0 %v10068_v33  ;;  %v469_v15 = vld [vmem:[#allocation6 + $0x490] sm:$0xff] }
 0x2df   :  { %v6871_v46 = vpop.f32.mrf.mxu1  ;;  %v6914_v35 = vpop.f32.mrf.mxu0  ;;  %7116 = vmatmul.mubr.bf16.vlgmr.msra.gmra.mxu1 %v10144_v18  ;;  %7208 = vmatprep.subr.bf16.mxu0 %v8723_v39  ;;  %v341_v39 = vld [vmem:[#allocation6 + $0x90] sm:$0xff] }
 0x2e0   :  { %v6872_v44 = vadd.f32 %v6871_v46, %v1360_v22  ;;  %7166 = vmatpush1.bf16.msra.mxu1 %v8602_v25  ;;  %7197 = vmatprep.mubr.bf16.mxu1 %v10074_v40  ;;  %v8691_v22 = vcombine.high %v469_v15, %v473_v7  ;;  %v8570_v25 = vcombine.low %v349_v11, %v353_v0  ;;  %v453_v46 = vld [vmem:[#allocation6 + $0x410] sm:$0xff] }
 0x2e1   :  { %v6873_v50 = vpop.f32.mrf.mxu1  ;;  %v6916_v49 = vpop.f32.mrf.mxu0  ;;  %7167 = vmatprep.subr.bf16.mxu1 %v8595_v31  ;;  %v8690_v31 = vcombine.low %v469_v15, %v473_v7  ;;  %v8562_v42 = vcombine.low %v341_v39, %v345_v21  ;;  %v449_v61 = vld [vmem:[#allocation6 + $0x3f0] sm:$0xff] }
 0x2e2   :  { %v6874_v53 = vadd.f32 %v6873_v50, %v1364_v34  ;;  %7209 = vmatpush1.bf16.msra.mxu0 %v8722_v36  ;;  %v10190_v63 = vadd.f32 %v6912_v28, %v6872_v44  ;;  %v8563_v28 = vcombine.high %v341_v39, %v345_v21  ;;  %v333_v34 = vld [vmem:[#allocation6 + $0x50] sm:$0xff]  ;;  %v8682_v44 = vcombine.low %v461_v26, %v465_v27 }
 0x2e3   :  { %v6875_v56 = vpop.f32.mrf.mxu1  ;;  %v6917_v1 = vpop.f32.mrf.mxu0  ;;  %7210 = vmatprep.subr.bf16.mxu0 %v8715_v51  ;;  %v337_v36 = vld [vmem:[#allocation6 + $0x70] sm:$0xff]  ;;  %v8667_v4 = vcombine.high %v445_v60, %v449_v61  ;;  %v8666_v11 = vcombine.low %v445_v60, %v449_v61 }
 0x2e4   :  { %7168 = vmatpush1.bf16.msra.mxu1 %v8594_v52  ;;  %v10192_v8 = vadd.f32 %v6914_v35, %v6874_v53  ;;  %v457_v35 = vld [vmem:[#allocation6 + $0x430] sm:$0xff]  ;;  %v8555_v51 = vcombine.high %v333_v34, %v337_v36  ;;  %v8554_v50 = vcombine.low %v333_v34, %v337_v36 }
 0x2e5   :  { %v6876_v48 = vpop.f32.mrf.mxu1  ;;  %7169 = vmatprep.subr.bf16.mxu1 %v8587_v58  ;;  %v325_v52 = vld [vmem:[#allocation6 + $0x10] sm:$0xff]  ;;  %v8675_v55 = vcombine.high %v453_v46, %v457_v35 }
 0x2e6   :  { %7211 = vmatpush1.bf16.msra.mxu0 %v8714_v59  ;;  %v573_v49 = vld [vmem:[#allocation6 + $0x7d0] sm:$0xff]  ;;  %v8547_v53 = vcombine.high %v325_v52, %v329_v54  ;;  %v8674_v59 = vcombine.low %v453_v46, %v457_v35  ;;  %v8546_v1 = vcombine.low %v325_v52, %v329_v54 }
 0x2e7   :  { %7212 = vmatprep.subr.bf16.mxu0 %v8707_v2  ;;  %v577_v58 = vld [vmem:[#allocation6 + $0x7f0] sm:$0xff] }
 0x2e8   :  { %7170 = vmatpush1.bf16.msra.mxu1 %v8586_v3  ;;  %v8795_v56 = vcombine.high %v573_v49, %v577_v58  ;;  %v565_v2 = vld [vmem:[#allocation6 + $0x790] sm:$0xff]  ;;  %v8794_v5 = vcombine.low %v573_v49, %v577_v58 }
 0x2e9   :  { %7171 = vmatprep.subr.bf16.mxu1 %v8579_v9  ;;  %v569_v3 = vld [vmem:[#allocation6 + $0x7b0] sm:$0xff] }
 0x2ea   :  { %7213 = vmatpush1.bf16.msra.mxu0 %v8706_v10  ;;  %v437_v48 = vld [vmem:[#allocation6 + $0x390] sm:$0xff]  ;;  %v8787_v10 = vcombine.high %v565_v2, %v569_v3  ;;  %v8786_v15 = vcombine.low %v565_v2, %v569_v3 }
 0x2eb   :  { %7214 = vmatprep.subr.bf16.mxu0 %v8699_v32  ;;  %v441_v9 = vld [vmem:[#allocation6 + $0x3b0] sm:$0xff] }
 0x2ec   :  { %7172 = vmatpush1.bf16.msra.mxu1 %v8578_v14  ;;  %v557_v0 = vld [vmem:[#allocation6 + $0x750] sm:$0xff]  ;;  %v8659_v14 = vcombine.high %v437_v48, %v441_v9  ;;  %v8658_v39 = vcombine.low %v437_v48, %v441_v9 }
 0x2ed   :  { %7173 = vmatprep.subr.bf16.mxu1 %v8571_v19  ;;  %v561_v32 = vld [vmem:[#allocation6 + $0x770] sm:$0xff] }
 0x2ee   :  { %7215 = vmatpush1.bf16.msra.mxu0 %v8698_v20  ;;  %v429_v7 = vld [vmem:[#allocation6 + $0x350] sm:$0xff]  ;;  %v8779_v20 = vcombine.high %v557_v0, %v561_v32  ;;  %v8778_v26 = vcombine.low %v557_v0, %v561_v32 }
 0x2ef   :  { %7216 = vmatprep.subr.bf16.mxu0 %v8691_v22  ;;  %v433_v19 = vld [vmem:[#allocation6 + $0x370] sm:$0xff] }
 0x2f0   :  { %7174 = vmatpush1.bf16.msra.mxu1 %v8570_v25  ;;  %v549_v21 = vld [vmem:[#allocation6 + $0x710] sm:$0xff]  ;;  %v8651_v25 = vcombine.high %v429_v7, %v433_v19  ;;  %v8650_v34 = vcombine.low %v429_v7, %v433_v19 }
 0x2f1   :  { %7175 = vmatprep.subr.bf16.mxu1 %v8563_v28  ;;  %v553_v22 = vld [vmem:[#allocation6 + $0x730] sm:$0xff] }
 0x2f2   :  { %7217 = vmatpush1.bf16.msra.mxu0 %v8690_v31  ;;  %v421_v27 = vld [vmem:[#allocation6 + $0x310] sm:$0xff]  ;;  %v8771_v31 = vcombine.high %v549_v21, %v553_v22  ;;  %v8770_v46 = vcombine.low %v549_v21, %v553_v22 }
 0x2f3   :  { %7218 = vmatprep.subr.bf16.mxu0 %v8683_v38  ;;  %v425_v28 = vld [vmem:[#allocation6 + $0x330] sm:$0xff] }
 0x2f4   :  { %7176 = vmatpush1.bf16.msra.mxu1 %v8562_v42  ;;  %v541_v36 = vld [vmem:[#allocation6 + $0x6d0] sm:$0xff]  ;;  %v8643_v42 = vcombine.high %v421_v27, %v425_v28  ;;  %v8642_v52 = vcombine.low %v421_v27, %v425_v28 }
 0x2f5   :  { %7177 = vmatprep.subr.bf16.mxu1 %v8555_v51  ;;  %v545_v38 = vld [vmem:[#allocation6 + $0x6f0] sm:$0xff] }
 0x2f6   :  { %7219 = vmatpush1.bf16.msra.mxu0 %v8682_v44  ;;  %v413_v35 = vld [vmem:[#allocation6 + $0x2d0] sm:$0xff]  ;;  %v8763_v44 = vcombine.high %v541_v36, %v545_v38  ;;  %v8762_v49 = vcombine.low %v541_v36, %v545_v38 }
 0x2f7   :  { %7220 = vmatprep.subr.bf16.mxu0 %v8675_v55  ;;  %v417_v51 = vld [vmem:[#allocation6 + $0x2f0] sm:$0xff] }
 0x2f8   :  { %7178 = vmatpush1.bf16.msra.mxu1 %v8554_v50  ;;  %v533_v54 = vld [vmem:[#allocation6 + $0x690] sm:$0xff]  ;;  %v8635_v50 = vcombine.high %v413_v35, %v417_v51  ;;  %v8634_v60 = vcombine.low %v413_v35, %v417_v51 }
 0x2f9   :  { %7179 = vmatprep.subr.bf16.mxu1 %v8547_v53  ;;  %v537_v55 = vld [vmem:[#allocation6 + $0x6b0] sm:$0xff] }
 0x2fa   :  { %7221 = vmatpush1.bf16.msra.mxu0 %v8674_v59  ;;  %v405_v58 = vld [vmem:[#allocation6 + $0x290] sm:$0xff]  ;;  %v8755_v59 = vcombine.high %v533_v54, %v537_v55  ;;  %v8754_v2 = vcombine.low %v533_v54, %v537_v55 }
 0x2fb   :  { %7222 = vmatprep.subr.bf16.mxu0 %v8795_v56  ;;  %v409_v53 = vld [vmem:[#allocation6 + $0x2b0] sm:$0xff] }
 0x2fc   :  { %7180 = vmatpush1.bf16.msra.mxu1 %v8546_v1  ;;  %v525_v61 = vld [vmem:[#allocation6 + $0x650] sm:$0xff]  ;;  %v8627_v1 = vcombine.high %v405_v58, %v409_v53  ;;  %v8626_v48 = vcombine.low %v405_v58, %v409_v53 }
 0x2fd   :  { %7181 = vmatprep.subr.bf16.mxu1 %v8667_v4  ;;  %v529_v56 = vld [vmem:[#allocation6 + $0x670] sm:$0xff] }
 0x2fe   :  { %7223 = vmatpush2.bf16.msra.mxu0 %v8794_v5  ;;  %v397_v3 = vld [vmem:[#allocation6 + $0x250] sm:$0xff]  ;;  %v8747_v5 = vcombine.high %v525_v61, %v529_v56  ;;  %v8746_v0 = vcombine.low %v525_v61, %v529_v56 }
 0x2ff   :  { %7224 = vmatprep.subr.bf16.mxu0 %v8787_v10  ;;  %v401_v4 = vld [vmem:[#allocation6 + $0x270] sm:$0xff] }
 0x300   :  { %7182 = vmatpush2.bf16.msra.mxu1 %v8666_v11  ;;  %v517_v9 = vld [vmem:[#allocation6 + $0x610] sm:$0xff]  ;;  %v8619_v11 = vcombine.high %v397_v3, %v401_v4  ;;  %v8618_v7 = vcombine.low %v397_v3, %v401_v4 }
 0x301   :  { %7183 = vmatprep.subr.bf16.mxu1 %v8659_v14  ;;  %v521_v10 = vld [vmem:[#allocation6 + $0x630] sm:$0xff] }
 0x302   :  { %7225 = vmatpush2.bf16.msra.mxu0 %v8786_v15  ;;  %v389_v32 = vld [vmem:[#allocation6 + $0x210] sm:$0xff]  ;;  %v8739_v15 = vcombine.high %v517_v9, %v521_v10  ;;  %v8738_v21 = vcombine.low %v517_v9, %v521_v10 }
 0x303   :  { %7226 = vmatprep.subr.bf16.mxu0 %v8779_v20  ;;  %v393_v14 = vld [vmem:[#allocation6 + $0x230] sm:$0xff] }
 0x304   :  { %7184 = vmatpush2.bf16.msra.mxu1 %v8658_v39  ;;  %v765_v19 = vld [vmem:[#allocation6 + $0xdd0] sm:$0xff]  ;;  %v8611_v39 = vcombine.high %v389_v32, %v393_v14  ;;  %v8610_v27 = vcombine.low %v389_v32, %v393_v14 }
 0x305   :  { %7185 = vmatprep.subr.bf16.mxu1 %v8651_v25  ;;  %v769_v20 = vld [vmem:[#allocation6 + $0xdf0] sm:$0xff] }
 0x306   :  { %7227 = vmatpush2.bf16.msra.mxu0 %v8778_v26  ;;  %v637_v22 = vld [vmem:[#allocation6 + $0x9d0] sm:$0xff]  ;;  %v8987_v26 = vcombine.high %v765_v19, %v769_v20  ;;  %v8986_v36 = vcombine.low %v765_v19, %v769_v20 }
 0x307   :  { %7228 = vmatprep.subr.bf16.mxu0 %v8771_v31  ;;  %v641_v25 = vld [vmem:[#allocation6 + $0x9f0] sm:$0xff] }
 0x308   :  { %7186 = vmatpush2.bf16.msra.mxu1 %v8650_v34  ;;  %v757_v28 = vld [vmem:[#allocation6 + $0xd90] sm:$0xff]  ;;  %v8859_v34 = vcombine.high %v637_v22, %v641_v25  ;;  %v8858_v35 = vcombine.low %v637_v22, %v641_v25 }
 0x309   :  { %7187 = vmatprep.subr.bf16.mxu1 %v8643_v42  ;;  %v761_v31 = vld [vmem:[#allocation6 + $0xdb0] sm:$0xff] }
 0x30a   :  { %7229 = vmatpush2.bf16.msra.mxu0 %v8770_v46  ;;  %v629_v38 = vld [vmem:[#allocation6 + $0x990] sm:$0xff]  ;;  %v8979_v46 = vcombine.high %v757_v28, %v761_v31  ;;  %v8978_v55 = vcombine.low %v757_v28, %v761_v31 }
 0x30b   :  { %7230 = vmatprep.subr.bf16.mxu0 %v8763_v44  ;;  %v633_v42 = vld [vmem:[#allocation6 + $0x9b0] sm:$0xff] }
 0x30c   :  { %7188 = vmatpush2.bf16.msra.mxu1 %v8642_v52  ;;  %v749_v51 = vld [vmem:[#allocation6 + $0xd50] sm:$0xff]  ;;  %v8851_v54 = vcombine.high %v629_v38, %v633_v42  ;;  %v8850_v61 = vcombine.low %v629_v38, %v633_v42 }
 0x30d   :  { %7189 = vmatprep.subr.bf16.mxu1 %v8635_v50  ;;  %v753_v44 = vld [vmem:[#allocation6 + $0xd70] sm:$0xff] }
 0x30e   :  { %7231 = vmatpush2.bf16.msra.mxu0 %v8762_v49  ;;  %v621_v50 = vld [vmem:[#allocation6 + $0x950] sm:$0xff] }
 0x30f   :  { %7232 = vmatprep.subr.bf16.mxu0 %v8755_v59  ;;  %v625_v49 = vld [vmem:[#allocation6 + $0x970] sm:$0xff]  ;;  %v8971_v59 = vcombine.high %v749_v51, %v753_v44 }
 0x310   :  { %7190 = vmatpush2.bf16.msra.mxu1 %v8634_v60  ;;  %v741_v56 = vld [vmem:[#allocation6 + $0xd10] sm:$0xff]  ;;  %v8843_v4 = vcombine.high %v621_v50, %v625_v49  ;;  %v8842_v14 = vcombine.low %v621_v50, %v625_v49 }
 0x311   :  { %7191 = vmatprep.subr.bf16.mxu1 %v8627_v1  ;;  %v745_v1 = vld [vmem:[#allocation6 + $0xd30] sm:$0xff] }
 0x312   :  { %7233 = vmatpush2.bf16.msra.mxu0 %v8754_v2  ;;  %v613_v9 = vld [vmem:[#allocation6 + $0x910] sm:$0xff]  ;;  %v8963_v32 = vcombine.high %v741_v56, %v745_v1 }
 0x313   :  { %7234 = vmatprep.subr.bf16.mxu0 %v8747_v5  ;;  %v617_v10 = vld [vmem:[#allocation6 + $0x930] sm:$0xff] }
 0x314   :  { %7192 = vmatpush2.bf16.msra.mxu1 %v8626_v48  ;;  %v8970_v48 = vcombine.low %v749_v51, %v753_v44  ;;  %v609_v22 = vld [vmem:[#allocation6 + $0x8f0] sm:$0xff] }
 0x315   :  { %7193 = vmatprep.subr.bf16.mxu1 %v8619_v11  ;;  %v729_v28 = vld [vmem:[#allocation6 + $0xcb0] sm:$0xff] }
 0x316   :  { %7235 = vmatpush2.bf16.msra.mxu0 %v8746_v0  ;;  %v601_v38 = vld [vmem:[#allocation6 + $0x8b0] sm:$0xff] }
 0x317   :  { %7236 = vmatprep.subr.bf16.mxu0 %v8739_v15  ;;  %v733_v15 = vld [vmem:[#allocation6 + $0xcd0] sm:$0xff] }
 0x318   :  { %7194 = vmatpush2.bf16.msra.mxu1 %v8618_v7  ;;  %v737_v7 = vld [vmem:[#allocation6 + $0xcf0] sm:$0xff] }
 0x319   :  { %7195 = vmatprep.subr.bf16.mxu1 %v8611_v39  ;;  %v8835_v39 = vcombine.high %v613_v9, %v617_v10  ;;  %v8955_v25 = vcombine.high %v733_v15, %v737_v7  ;;  %v721_v51 = vld [vmem:[#allocation6 + $0xc70] sm:$0xff] }
 0x31a   :  { %7237 = vmatpush2.bf16.msra.mxu0 %v8738_v21  ;;  %v605_v21 = vld [vmem:[#allocation6 + $0x8d0] sm:$0xff] }
 0x31b   :  { %7288 = vmatprep.subr.bf16.mxu0 %v8987_v26  ;;  %v8834_v26 = vcombine.low %v613_v9, %v617_v10  ;;  %v8827_v31 = vcombine.high %v605_v21, %v609_v22  ;;  %v701_v9 = vld [vmem:[#allocation6 + $0xbd0] sm:$0xff] }
 0x31c   :  { %7196 = vmatpush2.bf16.msra.mxu1 %v8610_v27  ;;  %v725_v27 = vld [vmem:[#allocation6 + $0xc90] sm:$0xff] }
 0x31d   :  { %v6994_v52 = vpop.f32.mrf.mxu0  ;;  %7239 = vmatmul.mubr.bf16.vlgmr.msra.gmra.mxu0 %v10070_v37  ;;  %7247 = vmatprep.subr.bf16.mxu1 %v8859_v34  ;;  %v8954_v34 = vcombine.low %v733_v15, %v737_v7  ;;  %v8947_v42 = vcombine.high %v725_v27, %v729_v28  ;;  %v705_v10 = vld [vmem:[#allocation6 + $0xbf0] sm:$0xff] }
 0x31e   :  { %7289 = vmatpush1.bf16.msra.mxu0 %v8986_v36  ;;  %7320 = vmatprep.mubr.bf16.mxu0 %v10084_v62  ;;  %v597_v36 = vld [vmem:[#allocation6 + $0x890] sm:$0xff]  ;;  %v8923_v15 = vcombine.high %v701_v9, %v705_v10 }
 0x31f   :  { %v6953_v58 = vpop.f32.mrf.mxu1  ;;  %v6996_v53 = vpop.f32.mrf.mxu0  ;;  %7198 = vmatmul.mubr.bf16.vlgmr.msra.gmra.mxu1 %v10077_v43  ;;  %7290 = vmatprep.subr.bf16.mxu0 %v8979_v46  ;;  %v8826_v46 = vcombine.low %v605_v21, %v609_v22  ;;  %v8819_v44 = vcombine.high %v597_v36, %v601_v38  ;;  %v8818_v49 = vcombine.low %v597_v36, %v601_v38  ;;  %v813_v22 = vld [vmem:[#allocation6 + $0xf50] sm:$0xff] }
 0x320   :  { %v6954_v60 = vadd.f32 %v6953_v58, %v10190_v63  ;;  %7248 = vmatpush1.bf16.msra.mxu1 %v8858_v35  ;;  %7279 = vmatprep.mubr.bf16.mxu1 %v10089_v6  ;;  %v717_v35 = vld [vmem:[#allocation6 + $0xc50] sm:$0xff]  ;;  %v8922_v21 = vcombine.low %v701_v9, %v705_v10 }
 0x321   :  { %v6955_v2 = vpop.f32.mrf.mxu1  ;;  %v6998_v3 = vpop.f32.mrf.mxu0  ;;  %7249 = vmatprep.subr.bf16.mxu1 %v8851_v54  ;;  %v589_v54 = vld [vmem:[#allocation6 + $0x850] sm:$0xff]  ;;  %v8939_v50 = vcombine.high %v717_v35, %v721_v51 }
 0x322   :  { %v6956_v5 = vadd.f32 %v6955_v2, %v10192_v8  ;;  %7291 = vmatpush1.bf16.msra.mxu0 %v8978_v55  ;;  %v10200_v11 = vadd.f32 %v6994_v52, %v6954_v60  ;;  %v8962_v8 = vcombine.low %v741_v56, %v745_v1  ;;  %v8946_v52 = vcombine.low %v725_v27, %v729_v28  ;;  %v593_v55 = vld [vmem:[#allocation6 + $0x870] sm:$0xff] }
 0x323   :  { %v6957_v0 = vpop.f32.mrf.mxu1  ;;  %v6999_v63 = vpop.f32.mrf.mxu0  ;;  %7292 = vmatprep.subr.bf16.mxu0 %v8971_v59  ;;  %v709_v58 = vld [vmem:[#allocation6 + $0xc10] sm:$0xff]  ;;  %v8811_v59 = vcombine.high %v589_v54, %v593_v55  ;;  %v8938_v60 = vcombine.low %v717_v35, %v721_v51  ;;  %v8810_v2 = vcombine.low %v589_v54, %v593_v55 }
 0x324   :  { %7250 = vmatpush1.bf16.msra.mxu1 %v8850_v61  ;;  %v10202_v19 = vadd.f32 %v6996_v53, %v6956_v5  ;;  %v713_v53 = vld [vmem:[#allocation6 + $0xc30] sm:$0xff] }
 0x325   :  { %v6958_v20 = vpop.f32.mrf.mxu1  ;;  %7251 = vmatprep.subr.bf16.mxu1 %v8843_v4  ;;  %v581_v61 = vld [vmem:[#allocation6 + $0x810] sm:$0xff]  ;;  %v8931_v1 = vcombine.high %v709_v58, %v713_v53 }
 0x326   :  { %7293 = vmatpush1.bf16.msra.mxu0 %v8970_v48  ;;  %v585_v56 = vld [vmem:[#allocation6 + $0x830] sm:$0xff]  ;;  %v8930_v48 = vcombine.low %v709_v58, %v713_v53 }
 0x327   :  { %7294 = vmatprep.subr.bf16.mxu0 %v8963_v32  ;;  %v829_v3 = vld [vmem:[#allocation6 + $0xfd0] sm:$0xff]  ;;  %v8803_v5 = vcombine.high %v581_v61, %v585_v56  ;;  %v8802_v63 = vcombine.low %v581_v61, %v585_v56 }
 0x328   :  { %7252 = vmatpush1.bf16.msra.mxu1 %v8842_v14  ;;  %v833_v4 = vld [vmem:[#allocation6 + $0xff0] sm:$0xff] }
 0x329   :  { %7253 = vmatprep.subr.bf16.mxu1 %v8835_v39  ;;  %v9051_v0 = vcombine.high %v829_v3, %v833_v4  ;;  %v821_v32 = vld [vmem:[#allocation6 + $0xf90] sm:$0xff]  ;;  %v9050_v7 = vcombine.low %v829_v3, %v833_v4 }
 0x32a   :  { %7295 = vmatpush1.bf16.msra.mxu0 %v8962_v8  ;;  %v825_v14 = vld [vmem:[#allocation6 + $0xfb0] sm:$0xff] }
 0x32b   :  { %7296 = vmatprep.subr.bf16.mxu0 %v8955_v25  ;;  %v693_v20 = vld [vmem:[#allocation6 + $0xb90] sm:$0xff]  ;;  %v9043_v8 = vcombine.high %v821_v32, %v825_v14  ;;  %v9042_v27 = vcombine.low %v821_v32, %v825_v14 }
 0x32c   :  { %7254 = vmatpush1.bf16.msra.mxu1 %v8834_v26  ;;  %v697_v39 = vld [vmem:[#allocation6 + $0xbb0] sm:$0xff] }
 0x32d   :  { %7255 = vmatprep.subr.bf16.mxu1 %v8827_v31  ;;  %v817_v25 = vld [vmem:[#allocation6 + $0xf70] sm:$0xff]  ;;  %v8915_v26 = vcombine.high %v693_v20, %v697_v39  ;;  %v8914_v36 = vcombine.low %v693_v20, %v697_v39 }
 0x32e   :  { %7297 = vmatpush1.bf16.msra.mxu0 %v8954_v34  ;;  %v685_v28 = vld [vmem:[#allocation6 + $0xb50] sm:$0xff]  ;;  %v9035_v34 = vcombine.high %v813_v22, %v817_v25  ;;  %v9034_v35 = vcombine.low %v813_v22, %v817_v25 }
 0x32f   :  { %7298 = vmatprep.subr.bf16.mxu0 %v8947_v42  ;;  %v689_v31 = vld [vmem:[#allocation6 + $0xb70] sm:$0xff] }
 0x330   :  { %7256 = vmatpush1.bf16.msra.mxu1 %v8826_v46  ;;  %v805_v38 = vld [vmem:[#allocation6 + $0xf10] sm:$0xff]  ;;  %v8907_v46 = vcombine.high %v685_v28, %v689_v31  ;;  %v8906_v54 = vcombine.low %v685_v28, %v689_v31 }
 0x331   :  { %7257 = vmatprep.subr.bf16.mxu1 %v8819_v44  ;;  %v809_v42 = vld [vmem:[#allocation6 + $0xf30] sm:$0xff] }
 0x332   :  { %7299 = vmatpush1.bf16.msra.mxu0 %v8946_v52  ;;  %v677_v51 = vld [vmem:[#allocation6 + $0xb10] sm:$0xff]  ;;  %v9027_v52 = vcombine.high %v805_v38, %v809_v42  ;;  %v9026_v58 = vcombine.low %v805_v38, %v809_v42 }
 0x333   :  { %7300 = vmatprep.subr.bf16.mxu0 %v8939_v50  ;;  %v681_v44 = vld [vmem:[#allocation6 + $0xb30] sm:$0xff] }
 0x334   :  { %7258 = vmatpush1.bf16.msra.mxu1 %v8818_v49  ;;  %v797_v55 = vld [vmem:[#allocation6 + $0xed0] sm:$0xff]  ;;  %v8899_v49 = vcombine.high %v677_v51, %v681_v44  ;;  %v8898_v61 = vcombine.low %v677_v51, %v681_v44 }
 0x335   :  { %7259 = vmatprep.subr.bf16.mxu1 %v8811_v59  ;;  %v801_v50 = vld [vmem:[#allocation6 + $0xef0] sm:$0xff] }
 0x336   :  { %7301 = vmatpush1.bf16.msra.mxu0 %v8938_v60  ;;  %v669_v53 = vld [vmem:[#allocation6 + $0xad0] sm:$0xff]  ;;  %v9019_v60 = vcombine.high %v797_v55, %v801_v50  ;;  %v9018_v3 = vcombine.low %v797_v55, %v801_v50 }
 0x337   :  { %7302 = vmatprep.subr.bf16.mxu0 %v8931_v1  ;;  %v673_v59 = vld [vmem:[#allocation6 + $0xaf0] sm:$0xff] }
 0x338   :  { %7260 = vmatpush1.bf16.msra.mxu1 %v8810_v2  ;;  %v789_v56 = vld [vmem:[#allocation6 + $0xe90] sm:$0xff]  ;;  %v8891_v2 = vcombine.high %v669_v53, %v673_v59  ;;  %v8890_v9 = vcombine.low %v669_v53, %v673_v59 }
 0x339   :  { %7261 = vmatprep.subr.bf16.mxu1 %v8803_v5  ;;  %v793_v1 = vld [vmem:[#allocation6 + $0xeb0] sm:$0xff] }
 0x33a   :  { %7303 = vmatpush1.bf16.msra.mxu0 %v8930_v48  ;;  %v661_v4 = vld [vmem:[#allocation6 + $0xa90] sm:$0xff]  ;;  %v9011_v48 = vcombine.high %v789_v56, %v793_v1  ;;  %v9010_v32 = vcombine.low %v789_v56, %v793_v1 }
 0x33b   :  { %7304 = vmatprep.subr.bf16.mxu0 %v9051_v0  ;;  %v665_v5 = vld [vmem:[#allocation6 + $0xab0] sm:$0xff] }
 0x33c   :  { %7262 = vmatpush1.bf16.msra.mxu1 %v8802_v63  ;;  %v781_v10 = vld [vmem:[#allocation6 + $0xe50] sm:$0xff]  ;;  %v8883_v63 = vcombine.high %v661_v4, %v665_v5  ;;  %v8882_v20 = vcombine.low %v661_v4, %v665_v5 }
 0x33d   :  { %7263 = vmatprep.subr.bf16.mxu1 %v8923_v15  ;;  %v785_v0 = vld [vmem:[#allocation6 + $0xe70] sm:$0xff] }
 0x33e   :  { %7305 = vmatpush2.bf16.msra.mxu0 %v9050_v7  ;;  %v653_v14 = vld [vmem:[#allocation6 + $0xa50] sm:$0xff]  ;;  %v9003_v7 = vcombine.high %v781_v10, %v785_v0  ;;  %v9002_v22 = vcombine.low %v781_v10, %v785_v0 }
 0x33f   :  { %7306 = vmatprep.subr.bf16.mxu0 %v9043_v8  ;;  %v657_v15 = vld [vmem:[#allocation6 + $0xa70] sm:$0xff] }
 0x340   :  { %7264 = vmatpush2.bf16.msra.mxu1 %v8922_v21  ;;  %v773_v39 = vld [vmem:[#allocation6 + $0xe10] sm:$0xff]  ;;  %v8875_v21 = vcombine.high %v653_v14, %v657_v15  ;;  %v8874_v28 = vcombine.low %v653_v14, %v657_v15 }
 0x341   :  { %7265 = vmatprep.subr.bf16.mxu1 %v8915_v26  ;;  %v777_v8 = vld [vmem:[#allocation6 + $0xe30] sm:$0xff] }
 0x342   :  { %7307 = vmatpush2.bf16.msra.mxu0 %v9042_v27  ;;  %v645_v25 = vld [vmem:[#allocation6 + $0xa10] sm:$0xff]  ;;  %v8995_v27 = vcombine.high %v773_v39, %v777_v8  ;;  %v8994_v38 = vcombine.low %v773_v39, %v777_v8 }
 0x343   :  { %7308 = vmatprep.subr.bf16.mxu0 %v9035_v34  ;;  %v649_v26 = vld [vmem:[#allocation6 + $0xa30] sm:$0xff] }
 0x344   :  { %7266 = vmatpush2.bf16.msra.mxu1 %v8914_v36  ;;  %v1021_v31 = vld [vmem:[#allocation6 + $0x15d0] sm:$0xff]  ;;  %v8867_v36 = vcombine.high %v645_v25, %v649_v26  ;;  %v8866_v51 = vcombine.low %v645_v25, %v649_v26 }
 0x345   :  { %7267 = vmatprep.subr.bf16.mxu1 %v8907_v46  ;;  %v1025_v34 = vld [vmem:[#allocation6 + $0x15f0] sm:$0xff] }
 0x346   :  { %7309 = vmatpush2.bf16.msra.mxu0 %v9034_v35  ;;  %v893_v42 = vld [vmem:[#allocation6 + $0x11d0] sm:$0xff]  ;;  %v9243_v35 = vcombine.high %v1021_v31, %v1025_v34  ;;  %v9242_v55 = vcombine.low %v1021_v31, %v1025_v34 }
 0x347   :  { %7310 = vmatprep.subr.bf16.mxu0 %v9027_v52  ;;  %v897_v46 = vld [vmem:[#allocation6 + $0x11f0] sm:$0xff] }
 0x348   :  { %7268 = vmatpush2.bf16.msra.mxu1 %v8906_v54  ;;  %v1013_v44 = vld [vmem:[#allocation6 + $0x1590] sm:$0xff]  ;;  %v9115_v54 = vcombine.high %v893_v42, %v897_v46  ;;  %v9114_v53 = vcombine.low %v893_v42, %v897_v46 }
 0x349   :  { %7269 = vmatprep.subr.bf16.mxu1 %v8899_v49  ;;  %v1017_v52 = vld [vmem:[#allocation6 + $0x15b0] sm:$0xff] }
 0x34a   :  { %7311 = vmatpush2.bf16.msra.mxu0 %v9026_v58  ;;  %v885_v50 = vld [vmem:[#allocation6 + $0x1190] sm:$0xff]  ;;  %v9235_v58 = vcombine.high %v1013_v44, %v1017_v52  ;;  %v9234_v1 = vcombine.low %v1013_v44, %v1017_v52 }
 0x34b   :  { %7312 = vmatprep.subr.bf16.mxu0 %v9019_v60  ;;  %v889_v49 = vld [vmem:[#allocation6 + $0x11b0] sm:$0xff] }
 0x34c   :  { %7270 = vmatpush2.bf16.msra.mxu1 %v8898_v61  ;;  %v1005_v59 = vld [vmem:[#allocation6 + $0x1550] sm:$0xff]  ;;  %v9107_v56 = vcombine.high %v885_v50, %v889_v49  ;;  %v9106_v10 = vcombine.low %v885_v50, %v889_v49 }
 0x34d   :  { %7271 = vmatprep.subr.bf16.mxu1 %v8891_v2  ;;  %v1009_v60 = vld [vmem:[#allocation6 + $0x1570] sm:$0xff] }
 0x34e   :  { %7313 = vmatpush2.bf16.msra.mxu0 %v9018_v3  ;;  %v877_v2 = vld [vmem:[#allocation6 + $0x1150] sm:$0xff] }
 0x34f   :  { %7314 = vmatprep.subr.bf16.mxu0 %v9011_v48  ;;  %v881_v3 = vld [vmem:[#allocation6 + $0x1170] sm:$0xff]  ;;  %v9227_v48 = vcombine.high %v1005_v59, %v1009_v60 }
 0x350   :  { %7272 = vmatpush2.bf16.msra.mxu1 %v8890_v9  ;;  %v997_v0 = vld [vmem:[#allocation6 + $0x1510] sm:$0xff]  ;;  %v9099_v15 = vcombine.high %v877_v2, %v881_v3  ;;  %v9098_v26 = vcombine.low %v877_v2, %v881_v3 }
 0x351   :  { %7273 = vmatprep.subr.bf16.mxu1 %v8883_v63  ;;  %v1001_v63 = vld [vmem:[#allocation6 + $0x1530] sm:$0xff] }
 0x352   :  { %7315 = vmatpush2.bf16.msra.mxu0 %v9010_v32  ;;  %v869_v39 = vld [vmem:[#allocation6 + $0x1110] sm:$0xff]  ;;  %v9219_v25 = vcombine.high %v997_v0, %v1001_v63 }
 0x353   :  { %7316 = vmatprep.subr.bf16.mxu0 %v9003_v7  ;;  %v873_v8 = vld [vmem:[#allocation6 + $0x1130] sm:$0xff] }
 0x354   :  { %7274 = vmatpush2.bf16.msra.mxu1 %v8882_v20  ;;  %v9226_v20 = vcombine.low %v1005_v59, %v1009_v60  ;;  %v865_v42 = vld [vmem:[#allocation6 + $0x10f0] sm:$0xff] }
 0x355   :  { %7275 = vmatprep.subr.bf16.mxu1 %v8875_v21  ;;  %v985_v44 = vld [vmem:[#allocation6 + $0x14b0] sm:$0xff] }
 0x356   :  { %7317 = vmatpush2.bf16.msra.mxu0 %v9002_v22  ;;  %v857_v50 = vld [vmem:[#allocation6 + $0x10b0] sm:$0xff] }
 0x357   :  { %7318 = vmatprep.subr.bf16.mxu0 %v8995_v27  ;;  %v989_v27 = vld [vmem:[#allocation6 + $0x14d0] sm:$0xff] }
 0x358   :  { %7276 = vmatpush2.bf16.msra.mxu1 %v8874_v28  ;;  %v993_v28 = vld [vmem:[#allocation6 + $0x14f0] sm:$0xff] }
 0x359   :  { %7277 = vmatprep.subr.bf16.mxu1 %v8867_v36  ;;  %v9091_v36 = vcombine.high %v869_v39, %v873_v8  ;;  %v9211_v46 = vcombine.high %v989_v27, %v993_v28  ;;  %v977_v59 = vld [vmem:[#allocation6 + $0x1470] sm:$0xff] }
 0x35a   :  { %7319 = vmatpush2.bf16.msra.mxu0 %v8994_v38  ;;  %v861_v38 = vld [vmem:[#allocation6 + $0x10d0] sm:$0xff] }
 0x35b   :  { %7370 = vmatprep.subr.bf16.mxu0 %v9243_v35  ;;  %v9090_v35 = vcombine.low %v869_v39, %v873_v8  ;;  %v9083_v52 = vcombine.high %v861_v38, %v865_v42  ;;  %v957_v39 = vld [vmem:[#allocation6 + $0x13d0] sm:$0xff] }
 0x35c   :  { %7278 = vmatpush2.bf16.msra.mxu1 %v8866_v51  ;;  %v981_v51 = vld [vmem:[#allocation6 + $0x1490] sm:$0xff] }
 0x35d   :  { %v7076_v61 = vpop.f32.mrf.mxu0  ;;  %7321 = vmatmul.mubr.bf16.vlgmr.msra.gmra.mxu0 %v10110_v24  ;;  %7329 = vmatprep.subr.bf16.mxu1 %v9115_v54  ;;  %v9210_v54 = vcombine.low %v989_v27, %v993_v28  ;;  %v9203_v49 = vcombine.high %v981_v51, %v985_v44  ;;  %v961_v8 = vld [vmem:[#allocation6 + $0x13f0] sm:$0xff] }
 0x35e   :  { %7371 = vmatpush1.bf16.msra.mxu0 %v9242_v55  ;;  %7402 = vmatprep.mubr.bf16.mxu0 %v10108_v23  ;;  %v853_v55 = vld [vmem:[#allocation6 + $0x1090] sm:$0xff]  ;;  %v9179_v27 = vcombine.high %v957_v39, %v961_v8 }
 0x35f   :  { %v7035_v4 = vpop.f32.mrf.mxu1  ;;  %v7078_v5 = vpop.f32.mrf.mxu0  ;;  %7280 = vmatmul.mubr.bf16.vlgmr.msra.gmra.mxu1 %v10114_v30  ;;  %7372 = vmatprep.subr.bf16.mxu0 %v9235_v58  ;;  %v9082_v58 = vcombine.low %v861_v38, %v865_v42  ;;  %v9075_v60 = vcombine.high %v853_v55, %v857_v50  ;;  %v9074_v3 = vcombine.low %v853_v55, %v857_v50  ;;  %v1069_v42 = vld [vmem:[#allocation6 + $0x1750] sm:$0xff] }
 0x360   :  { %v7036_v9 = vadd.f32 %v7035_v4, %v10200_v11  ;;  %7330 = vmatpush1.bf16.msra.mxu1 %v9114_v53  ;;  %7361 = vmatprep.mubr.bf16.mxu1 %v10112_v29  ;;  %v973_v53 = vld [vmem:[#allocation6 + $0x1450] sm:$0xff]  ;;  %v9178_v38 = vcombine.low %v957_v39, %v961_v8 }
 0x361   :  { %v7037_v32 = vpop.f32.mrf.mxu1  ;;  %v7080_v14 = vpop.f32.mrf.mxu0  ;;  %7331 = vmatprep.subr.bf16.mxu1 %v9107_v56  ;;  %v845_v56 = vld [vmem:[#allocation6 + $0x1050] sm:$0xff]  ;;  %v9195_v2 = vcombine.high %v973_v53, %v977_v59 }
 0x362   :  { %v7038_v7 = vadd.f32 %v7037_v32, %v10202_v19  ;;  %7373 = vmatpush1.bf16.msra.mxu0 %v9234_v1  ;;  %v10210_v21 = vadd.f32 %v7076_v61, %v7036_v9  ;;  %v9218_v19 = vcombine.low %v997_v0, %v1001_v63  ;;  %v9202_v61 = vcombine.low %v981_v51, %v985_v44  ;;  %v849_v1 = vld [vmem:[#allocation6 + $0x1070] sm:$0xff] }
 0x363   :  { %v7039_v22 = vpop.f32.mrf.mxu1  ;;  %v7081_v11 = vpop.f32.mrf.mxu0  ;;  %7374 = vmatprep.subr.bf16.mxu0 %v9227_v48  ;;  %v965_v4 = vld [vmem:[#allocation6 + $0x1410] sm:$0xff]  ;;  %v9067_v48 = vcombine.high %v845_v56, %v849_v1  ;;  %v9194_v9 = vcombine.low %v973_v53, %v977_v59  ;;  %v9066_v32 = vcombine.low %v845_v56, %v849_v1 }
 0x364   :  { %7332 = vmatpush1.bf16.msra.mxu1 %v9106_v10  ;;  %v10212_v31 = vadd.f32 %v7078_v5, %v7038_v7  ;;  %v969_v5 = vld [vmem:[#allocation6 + $0x1430] sm:$0xff] }
 0x365   :  { %v7040_v34 = vpop.f32.mrf.mxu1  ;;  %7333 = vmatprep.subr.bf16.mxu1 %v9099_v15  ;;  %v837_v10 = vld [vmem:[#allocation6 + $0x1010] sm:$0xff]  ;;  %v9187_v63 = vcombine.high %v965_v4, %v969_v5 }
 0x366   :  { %7375 = vmatpush1.bf16.msra.mxu0 %v9226_v20  ;;  %v841_v0 = vld [vmem:[#allocation6 + $0x1030] sm:$0xff]  ;;  %v9186_v20 = vcombine.low %v965_v4, %v969_v5 }
 0x367   :  { %7376 = vmatprep.subr.bf16.mxu0 %v9219_v25  ;;  %v1085_v14 = vld [vmem:[#allocation6 + $0x17d0] sm:$0xff]  ;;  %v9059_v7 = vcombine.high %v837_v10, %v841_v0  ;;  %v9058_v11 = vcombine.low %v837_v10, %v841_v0 }
 0x368   :  { %7334 = vmatpush1.bf16.msra.mxu1 %v9098_v26  ;;  %v1089_v15 = vld [vmem:[#allocation6 + $0x17f0] sm:$0xff] }
 0x369   :  { %7335 = vmatprep.subr.bf16.mxu1 %v9091_v36  ;;  %v9307_v22 = vcombine.high %v1085_v14, %v1089_v15  ;;  %v1077_v25 = vld [vmem:[#allocation6 + $0x1790] sm:$0xff]  ;;  %v9306_v28 = vcombine.low %v1085_v14, %v1089_v15 }
 0x36a   :  { %7377 = vmatpush1.bf16.msra.mxu0 %v9218_v19  ;;  %v1081_v26 = vld [vmem:[#allocation6 + $0x17b0] sm:$0xff] }
 0x36b   :  { %7378 = vmatprep.subr.bf16.mxu0 %v9211_v46  ;;  %v949_v34 = vld [vmem:[#allocation6 + $0x1390] sm:$0xff]  ;;  %v9299_v19 = vcombine.high %v1077_v25, %v1081_v26  ;;  %v9298_v51 = vcombine.low %v1077_v25, %v1081_v26 }
 0x36c   :  { %7336 = vmatpush1.bf16.msra.mxu1 %v9090_v35  ;;  %v953_v36 = vld [vmem:[#allocation6 + $0x13b0] sm:$0xff] }
 0x36d   :  { %7337 = vmatprep.subr.bf16.mxu1 %v9083_v52  ;;  %v1073_v46 = vld [vmem:[#allocation6 + $0x1770] sm:$0xff]  ;;  %v9171_v35 = vcombine.high %v949_v34, %v953_v36  ;;  %v9170_v55 = vcombine.low %v949_v34, %v953_v36 }
 0x36e   :  { %7379 = vmatpush1.bf16.msra.mxu0 %v9210_v54  ;;  %v941_v44 = vld [vmem:[#allocation6 + $0x1350] sm:$0xff]  ;;  %v9291_v54 = vcombine.high %v1069_v42, %v1073_v46  ;;  %v9290_v53 = vcombine.low %v1069_v42, %v1073_v46 }
 0x36f   :  { %7380 = vmatprep.subr.bf16.mxu0 %v9203_v49  ;;  %v945_v52 = vld [vmem:[#allocation6 + $0x1370] sm:$0xff] }
 0x370   :  { %7338 = vmatpush1.bf16.msra.mxu1 %v9082_v58  ;;  %v1061_v50 = vld [vmem:[#allocation6 + $0x1710] sm:$0xff]  ;;  %v9163_v58 = vcombine.high %v941_v44, %v945_v52  ;;  %v9162_v56 = vcombine.low %v941_v44, %v945_v52 }
 0x371   :  { %7339 = vmatprep.subr.bf16.mxu1 %v9075_v60  ;;  %v1065_v49 = vld [vmem:[#allocation6 + $0x1730] sm:$0xff] }
 0x372   :  { %7381 = vmatpush1.bf16.msra.mxu0 %v9202_v61  ;;  %v933_v59 = vld [vmem:[#allocation6 + $0x1310] sm:$0xff]  ;;  %v9283_v61 = vcombine.high %v1061_v50, %v1065_v49  ;;  %v9282_v4 = vcombine.low %v1061_v50, %v1065_v49 }
 0x373   :  { %7382 = vmatprep.subr.bf16.mxu0 %v9195_v2  ;;  %v937_v60 = vld [vmem:[#allocation6 + $0x1330] sm:$0xff] }
 0x374   :  { %7340 = vmatpush1.bf16.msra.mxu1 %v9074_v3  ;;  %v1053_v1 = vld [vmem:[#allocation6 + $0x16d0] sm:$0xff]  ;;  %v9155_v3 = vcombine.high %v933_v59, %v937_v60  ;;  %v9154_v10 = vcombine.low %v933_v59, %v937_v60 }
 0x375   :  { %7341 = vmatprep.subr.bf16.mxu1 %v9067_v48  ;;  %v1057_v2 = vld [vmem:[#allocation6 + $0x16f0] sm:$0xff] }
 0x376   :  { %7383 = vmatpush1.bf16.msra.mxu0 %v9194_v9  ;;  %v925_v5 = vld [vmem:[#allocation6 + $0x12d0] sm:$0xff]  ;;  %v9275_v9 = vcombine.high %v1053_v1, %v1057_v2  ;;  %v9274_v14 = vcombine.low %v1053_v1, %v1057_v2 }
 0x377   :  { %7384 = vmatprep.subr.bf16.mxu0 %v9187_v63  ;;  %v929_v48 = vld [vmem:[#allocation6 + $0x12f0] sm:$0xff] }
 0x378   :  { %7342 = vmatpush1.bf16.msra.mxu1 %v9066_v32  ;;  %v1045_v0 = vld [vmem:[#allocation6 + $0x1690] sm:$0xff]  ;;  %v9147_v32 = vcombine.high %v925_v5, %v929_v48  ;;  %v9146_v39 = vcombine.low %v925_v5, %v929_v48 }
 0x379   :  { %7343 = vmatprep.subr.bf16.mxu1 %v9059_v7  ;;  %v1049_v63 = vld [vmem:[#allocation6 + $0x16b0] sm:$0xff] }
 0x37a   :  { %7385 = vmatpush1.bf16.msra.mxu0 %v9186_v20  ;;  %v917_v15 = vld [vmem:[#allocation6 + $0x1290] sm:$0xff]  ;;  %v9267_v20 = vcombine.high %v1045_v0, %v1049_v63  ;;  %v9266_v25 = vcombine.low %v1045_v0, %v1049_v63 }
 0x37b   :  { %7386 = vmatprep.subr.bf16.mxu0 %v9307_v22  ;;  %v921_v7 = vld [vmem:[#allocation6 + $0x12b0] sm:$0xff] }
 0x37c   :  { %7344 = vmatpush1.bf16.msra.mxu1 %v9058_v11  ;;  %v1037_v8 = vld [vmem:[#allocation6 + $0x1650] sm:$0xff]  ;;  %v9139_v11 = vcombine.high %v917_v15, %v921_v7  ;;  %v9138_v34 = vcombine.low %v917_v15, %v921_v7 }
 0x37d   :  { %7345 = vmatprep.subr.bf16.mxu1 %v9179_v27  ;;  %v1041_v22 = vld [vmem:[#allocation6 + $0x1670] sm:$0xff] }
 0x37e   :  { %7387 = vmatpush2.bf16.msra.mxu0 %v9306_v28  ;;  %v909_v26 = vld [vmem:[#allocation6 + $0x1250] sm:$0xff]  ;;  %v9259_v28 = vcombine.high %v1037_v8, %v1041_v22  ;;  %v9258_v42 = vcombine.low %v1037_v8, %v1041_v22 }
 0x37f   :  { %7388 = vmatprep.subr.bf16.mxu0 %v9299_v19  ;;  %v913_v27 = vld [vmem:[#allocation6 + $0x1270] sm:$0xff] }
 0x380   :  { %7346 = vmatpush2.bf16.msra.mxu1 %v9178_v38  ;;  %v1029_v36 = vld [vmem:[#allocation6 + $0x1610] sm:$0xff]  ;;  %v9131_v38 = vcombine.high %v909_v26, %v913_v27  ;;  %v9130_v44 = vcombine.low %v909_v26, %v913_v27 }
 0x381   :  { %7347 = vmatprep.subr.bf16.mxu1 %v9171_v35  ;;  %v1033_v19 = vld [vmem:[#allocation6 + $0x1630] sm:$0xff] }
 0x382   :  { %7389 = vmatpush2.bf16.msra.mxu0 %v9298_v51  ;;  %v901_v46 = vld [vmem:[#allocation6 + $0x1210] sm:$0xff]  ;;  %v9251_v51 = vcombine.high %v1029_v36, %v1033_v19  ;;  %v9250_v50 = vcombine.low %v1029_v36, %v1033_v19 }
 0x383   :  { %7390 = vmatprep.subr.bf16.mxu0 %v9291_v54  ;;  %v905_v35 = vld [vmem:[#allocation6 + $0x1230] sm:$0xff] }
 0x384   :  { %7348 = vmatpush2.bf16.msra.mxu1 %v9170_v55  ;;  %v1277_v52 = vld [vmem:[#allocation6 + $0x1dd0] sm:$0xff]  ;;  %v9123_v55 = vcombine.high %v901_v46, %v905_v35  ;;  %v9122_v59 = vcombine.low %v901_v46, %v905_v35 }
 0x385   :  { %7349 = vmatprep.subr.bf16.mxu1 %v9163_v58  ;;  %v1281_v54 = vld [vmem:[#allocation6 + $0x1df0] sm:$0xff] }
 0x386   :  { %7391 = vmatpush2.bf16.msra.mxu0 %v9290_v53  ;;  %v1149_v49 = vld [vmem:[#allocation6 + $0x19d0] sm:$0xff]  ;;  %v9499_v53 = vcombine.high %v1277_v52, %v1281_v54  ;;  %v9498_v1 = vcombine.low %v1277_v52, %v1281_v54 }
 0x387   :  { %7392 = vmatprep.subr.bf16.mxu0 %v9283_v61  ;;  %v1153_v58 = vld [vmem:[#allocation6 + $0x19f0] sm:$0xff] }
 0x388   :  { %7350 = vmatpush2.bf16.msra.mxu1 %v9162_v56  ;;  %v1269_v60 = vld [vmem:[#allocation6 + $0x1d90] sm:$0xff]  ;;  %v9371_v56 = vcombine.high %v1149_v49, %v1153_v58  ;;  %v9370_v5 = vcombine.low %v1149_v49, %v1153_v58 }
 0x389   :  { %7351 = vmatprep.subr.bf16.mxu1 %v9155_v3  ;;  %v1273_v61 = vld [vmem:[#allocation6 + $0x1db0] sm:$0xff] }
 0x38a   :  { %7393 = vmatpush2.bf16.msra.mxu0 %v9282_v4  ;;  %v1141_v2 = vld [vmem:[#allocation6 + $0x1990] sm:$0xff]  ;;  %v9491_v4 = vcombine.high %v1269_v60, %v1273_v61  ;;  %v9490_v63 = vcombine.low %v1269_v60, %v1273_v61 }
 0x38b   :  { %7394 = vmatprep.subr.bf16.mxu0 %v9275_v9  ;;  %v1145_v3 = vld [vmem:[#allocation6 + $0x19b0] sm:$0xff] }
 0x38c   :  { %7352 = vmatpush2.bf16.msra.mxu1 %v9154_v10  ;;  %v1261_v48 = vld [vmem:[#allocation6 + $0x1d50] sm:$0xff]  ;;  %v9363_v0 = vcombine.high %v1141_v2, %v1145_v3  ;;  %v9362_v8 = vcombine.low %v1141_v2, %v1145_v3 }
 0x38d   :  { %7353 = vmatprep.subr.bf16.mxu1 %v9147_v32  ;;  %v1265_v9 = vld [vmem:[#allocation6 + $0x1d70] sm:$0xff] }
 0x38e   :  { %7395 = vmatpush2.bf16.msra.mxu0 %v9274_v14  ;;  %v1133_v32 = vld [vmem:[#allocation6 + $0x1950] sm:$0xff]  ;;  %v9482_v36 = vcombine.low %v1261_v48, %v1265_v9 }
 0x38f   :  { %7396 = vmatprep.subr.bf16.mxu0 %v9267_v20  ;;  %v1137_v14 = vld [vmem:[#allocation6 + $0x1970] sm:$0xff]  ;;  %v9483_v20 = vcombine.high %v1261_v48, %v1265_v9 }
 0x390   :  { %7354 = vmatpush2.bf16.msra.mxu1 %v9146_v39  ;;  %v1253_v22 = vld [vmem:[#allocation6 + $0x1d10] sm:$0xff]  ;;  %v9355_v27 = vcombine.high %v1133_v32, %v1137_v14 }
 0x391   :  { %7355 = vmatprep.subr.bf16.mxu1 %v9139_v11  ;;  %v1257_v11 = vld [vmem:[#allocation6 + $0x1d30] sm:$0xff] }
 0x392   :  { %7397 = vmatpush2.bf16.msra.mxu0 %v9266_v25  ;;  %v1125_v19 = vld [vmem:[#allocation6 + $0x1910] sm:$0xff]  ;;  %v9475_v46 = vcombine.high %v1253_v22, %v1257_v11 }
 0x393   :  { %7398 = vmatprep.subr.bf16.mxu0 %v9259_v28  ;;  %v1249_v52 = vld [vmem:[#allocation6 + $0x1cf0] sm:$0xff] }
 0x394   :  { %7356 = vmatpush2.bf16.msra.mxu1 %v9138_v34  ;;  %v1121_v49 = vld [vmem:[#allocation6 + $0x18f0] sm:$0xff] }
 0x395   :  { %7357 = vmatprep.subr.bf16.mxu1 %v9131_v38  ;;  %v1129_v38 = vld [vmem:[#allocation6 + $0x1930] sm:$0xff] }
 0x396   :  { %7399 = vmatpush2.bf16.msra.mxu0 %v9258_v42  ;;  %v1241_v60 = vld [vmem:[#allocation6 + $0x1cb0] sm:$0xff] }
 0x397   :  { %7400 = vmatprep.subr.bf16.mxu0 %v9251_v51  ;;  %v9354_v51 = vcombine.low %v1133_v32, %v1137_v14  ;;  %v1113_v2 = vld [vmem:[#allocation6 + $0x18b0] sm:$0xff] }
 0x398   :  { %7358 = vmatpush2.bf16.msra.mxu1 %v9130_v44  ;;  %v1245_v44 = vld [vmem:[#allocation6 + $0x1cd0] sm:$0xff] }
 0x399   :  { %7359 = vmatprep.subr.bf16.mxu1 %v9123_v55  ;;  %v9347_v55 = vcombine.high %v1125_v19, %v1129_v38  ;;  %v9467_v58 = vcombine.high %v1245_v44, %v1249_v52  ;;  %v1233_v48 = vld [vmem:[#allocation6 + $0x1c70] sm:$0xff] }
 0x39a   :  { %7401 = vmatpush2.bf16.msra.mxu0 %v9250_v50  ;;  %v9474_v50 = vcombine.low %v1253_v22, %v1257_v11  ;;  %v1097_v22 = vld [vmem:[#allocation6 + $0x1830] sm:$0xff] }
 0x39b   :  { %7452 = vmatprep.subr.bf16.mxu0 %v9499_v53  ;;  %v9346_v53 = vcombine.low %v1125_v19, %v1129_v38  ;;  %v1213_v19 = vld [vmem:[#allocation6 + $0x1bd0] sm:$0xff] }
 0x39c   :  { %7360 = vmatpush2.bf16.msra.mxu1 %v9122_v59  ;;  %v1237_v59 = vld [vmem:[#allocation6 + $0x1c90] sm:$0xff] }
 0x39d   :  { %v7158_v10 = vpop.f32.mrf.mxu0  ;;  %7403 = vmatmul.mubr.bf16.vlgmr.msra.gmra.mxu0 %v10126_v13  ;;  %7411 = vmatprep.subr.bf16.mxu1 %v9371_v56  ;;  %v9466_v56 = vcombine.low %v1245_v44, %v1249_v52  ;;  %v9459_v3 = vcombine.high %v1237_v59, %v1241_v60  ;;  %v1217_v38 = vld [vmem:[#allocation6 + $0x1bf0] sm:$0xff] }
 0x39e   :  { %7453 = vmatpush1.bf16.msra.mxu0 %v9498_v1  ;;  %7484 = vmatprep.mubr.bf16.mxu0 %v10124_v12  ;;  %v1109_v1 = vld [vmem:[#allocation6 + $0x1890] sm:$0xff]  ;;  %v9435_v44 = vcombine.high %v1213_v19, %v1217_v38 }
 0x39f   :  { %v7117_v15 = vpop.f32.mrf.mxu1  ;;  %v7160_v7 = vpop.f32.mrf.mxu0  ;;  %7362 = vmatmul.mubr.bf16.vlgmr.msra.gmra.mxu1 %v10130_v17  ;;  %7454 = vmatprep.subr.bf16.mxu0 %v9491_v4  ;;  %v9331_v9 = vcombine.high %v1109_v1, %v1113_v2  ;;  %v9330_v14 = vcombine.low %v1109_v1, %v1113_v2  ;;  %v1317_v2 = vld [vmem:[#allocation6 + $0x1f10] sm:$0xff] }
 0x3a0   :  { %v7118_v39 = vadd.f32 %v7117_v15, %v10210_v21  ;;  %7412 = vmatpush1.bf16.msra.mxu1 %v9370_v5  ;;  %7443 = vmatprep.mubr.bf16.mxu1 %v10128_v16  ;;  %v1229_v5 = vld [vmem:[#allocation6 + $0x1c50] sm:$0xff] }
 0x3a1   :  { %v7119_v25 = vpop.f32.mrf.mxu1  ;;  %v7162_v26 = vpop.f32.mrf.mxu0  ;;  %7413 = vmatprep.subr.bf16.mxu1 %v9363_v0  ;;  %v1101_v0 = vld [vmem:[#allocation6 + $0x1850] sm:$0xff]  ;;  %v9451_v32 = vcombine.high %v1229_v5, %v1233_v48 }
 0x3a2   :  { %v10219_v28 = vadd.f32 %v7158_v10, %v7118_v39  ;;  %v7120_v34 = vadd.f32 %v7119_v25, %v10212_v31  ;;  %7455 = vmatpush1.bf16.msra.mxu0 %v9490_v63  ;;  %v1117_v31 = vld [vmem:[#allocation6 + $0x18d0] sm:$0xff]  ;;  %v9458_v10 = vcombine.low %v1237_v59, %v1241_v60  ;;  %v9450_v39 = vcombine.low %v1229_v5, %v1233_v48 }
 0x3a3   :  { %v7121_v42 = vpop.f32.mrf.mxu1  ;;  %v7163_v21 = vpop.f32.mrf.mxu0  ;;  %7456 = vmatprep.subr.bf16.mxu0 %v9483_v20  ;;  %v9339_v61 = vcombine.high %v1117_v31, %v1121_v49  ;;  %v9338_v4 = vcombine.low %v1117_v31, %v1121_v49  ;;  %v1105_v63 = vld [vmem:[#allocation6 + $0x1870] sm:$0xff]  ;;  %v9434_v31 = vcombine.low %v1213_v19, %v1217_v38 }
 0x3a4   :  { %v10222_v35 = vadd.f32 %v7160_v7, %v7120_v34  ;;  %7414 = vmatpush1.bf16.msra.mxu1 %v9362_v8  ;;  %v1221_v15 = vld [vmem:[#allocation6 + $0x1c10] sm:$0xff]  ;;  %v9323_v20 = vcombine.high %v1101_v0, %v1105_v63  ;;  %v9322_v25 = vcombine.low %v1101_v0, %v1105_v63 }
 0x3a5   :  { %v7122_v54 = vpop.f32.mrf.mxu1  ;;  %7415 = vmatprep.subr.bf16.mxu1 %v9355_v27  ;;  %v1225_v7 = vld [vmem:[#allocation6 + $0x1c30] sm:$0xff] }
 0x3a6   :  { %7457 = vmatpush1.bf16.msra.mxu0 %v9482_v36  ;;  %v1093_v8 = vld [vmem:[#allocation6 + $0x1810] sm:$0xff]  ;;  %v9443_v11 = vcombine.high %v1221_v15, %v1225_v7  ;;  %v9442_v36 = vcombine.low %v1221_v15, %v1225_v7 }
 0x3a7   :  { %7458 = vmatprep.subr.bf16.mxu0 %v9475_v46  ;;  %v1341_v26 = vld [vmem:[#allocation6 + $0x1fd0] sm:$0xff]  ;;  %v9315_v34 = vcombine.high %v1093_v8, %v1097_v22  ;;  %v9314_v21 = vcombine.low %v1093_v8, %v1097_v22 }
 0x3a8   :  { %7416 = vmatpush1.bf16.msra.mxu1 %v9354_v51  ;;  %v1345_v27 = vld [vmem:[#allocation6 + $0x1ff0] sm:$0xff] }
 0x3a9   :  { %7417 = vmatprep.subr.bf16.mxu1 %v9347_v55  ;;  %v9563_v42 = vcombine.high %v1341_v26, %v1345_v27  ;;  %v1333_v46 = vld [vmem:[#allocation6 + $0x1f90] sm:$0xff]  ;;  %v9562_v52 = vcombine.low %v1341_v26, %v1345_v27 }
 0x3aa   :  { %7459 = vmatpush1.bf16.msra.mxu0 %v9474_v50  ;;  %v1337_v51 = vld [vmem:[#allocation6 + $0x1fb0] sm:$0xff] }
 0x3ab   :  { %7460 = vmatprep.subr.bf16.mxu0 %v9467_v58  ;;  %v1205_v54 = vld [vmem:[#allocation6 + $0x1b90] sm:$0xff]  ;;  %v9555_v50 = vcombine.high %v1333_v46, %v1337_v51  ;;  %v9554_v59 = vcombine.low %v1333_v46, %v1337_v51 }
 0x3ac   :  { %7418 = vmatpush1.bf16.msra.mxu1 %v9346_v53  ;;  %v1209_v55 = vld [vmem:[#allocation6 + $0x1bb0] sm:$0xff] }
 0x3ad   :  { %7419 = vmatprep.subr.bf16.mxu1 %v9339_v61  ;;  %v1325_v49 = vld [vmem:[#allocation6 + $0x1f50] sm:$0xff]  ;;  %v9427_v53 = vcombine.high %v1205_v54, %v1209_v55  ;;  %v9426_v1 = vcombine.low %v1205_v54, %v1209_v55 }
 0x3ae   :  { %7461 = vmatpush1.bf16.msra.mxu0 %v9466_v56  ;;  %v1329_v58 = vld [vmem:[#allocation6 + $0x1f70] sm:$0xff] }
 0x3af   :  { %7462 = vmatprep.subr.bf16.mxu0 %v9459_v3  ;;  %v1197_v60 = vld [vmem:[#allocation6 + $0x1b50] sm:$0xff]  ;;  %v9547_v56 = vcombine.high %v1325_v49, %v1329_v58  ;;  %v9546_v5 = vcombine.low %v1325_v49, %v1329_v58 }
 0x3b0   :  { %7420 = vmatpush1.bf16.msra.mxu1 %v9338_v4  ;;  %v1201_v61 = vld [vmem:[#allocation6 + $0x1b70] sm:$0xff] }
 0x3b1   :  { %7421 = vmatprep.subr.bf16.mxu1 %v9331_v9  ;;  %v1321_v3 = vld [vmem:[#allocation6 + $0x1f30] sm:$0xff]  ;;  %v9419_v4 = vcombine.high %v1197_v60, %v1201_v61  ;;  %v9418_v0 = vcombine.low %v1197_v60, %v1201_v61  ;;  %v510_v61 = vld [vmem:[#allocation6 + $0x5d8] sm:$0xff] }
 0x3b2   :  { %7463 = vmatpush1.bf16.msra.mxu0 %v9458_v10  ;;  %v1189_v48 = vld [vmem:[#allocation6 + $0x1b10] sm:$0xff]  ;;  %v9539_v10 = vcombine.high %v1317_v2, %v1321_v3  ;;  %v9538_v15 = vcombine.low %v1317_v2, %v1321_v3  ;;  %v382_v3 = vld [vmem:[#allocation6 + $0x1d8] sm:$0xff] }
 0x3b3   :  { %7464 = vmatprep.subr.bf16.mxu0 %v9451_v32  ;;  %v1193_v9 = vld [vmem:[#allocation6 + $0x1b30] sm:$0xff] }
 0x3b4   :  { %7422 = vmatpush1.bf16.msra.mxu1 %v9330_v14  ;;  %v1309_v63 = vld [vmem:[#allocation6 + $0x1ed0] sm:$0xff]  ;;  %v9411_v14 = vcombine.high %v1189_v48, %v1193_v9  ;;  %v9410_v8 = vcombine.low %v1189_v48, %v1193_v9  ;;  %v1367_v9 = vsub.s32 4, %v10136_v45 }
 0x3b5   :  { %7423 = vmatprep.subr.bf16.mxu1 %v9323_v20  ;;  %v1313_v32 = vld [vmem:[#allocation6 + $0x1ef0] sm:$0xff] }
 0x3b6   :  { %7465 = vmatpush1.bf16.msra.mxu0 %v9450_v39  ;;  %v1181_v7 = vld [vmem:[#allocation6 + $0x1ad0] sm:$0xff]  ;;  %v9531_v39 = vcombine.high %v1309_v63, %v1313_v32  ;;  %v9530_v26 = vcombine.low %v1309_v63, %v1313_v32 }
 0x3b7   :  { %7466 = vmatprep.subr.bf16.mxu0 %v9443_v11  ;;  %v1185_v20 = vld [vmem:[#allocation6 + $0x1af0] sm:$0xff] }
 0x3b8   :  { %7424 = vmatpush1.bf16.msra.mxu1 %v9322_v25  ;;  %v1301_v22 = vld [vmem:[#allocation6 + $0x1e90] sm:$0xff]  ;;  %v9403_v25 = vcombine.high %v1181_v7, %v1185_v20  ;;  %v9402_v19 = vcombine.low %v1181_v7, %v1185_v20  ;;  %v378_v7 = vld [vmem:[#allocation6 + $0x1b8] sm:$0xff] }
 0x3b9   :  { %7425 = vmatprep.subr.bf16.mxu1 %v9315_v34  ;;  %v1305_v11 = vld [vmem:[#allocation6 + $0x1eb0] sm:$0xff] }
 0x3ba   :  { %7467 = vmatpush1.bf16.msra.mxu0 %v9442_v36  ;;  %v1173_v27 = vld [vmem:[#allocation6 + $0x1a90] sm:$0xff]  ;;  %v9523_v36 = vcombine.high %v1301_v22, %v1305_v11  ;;  %v9522_v46 = vcombine.low %v1301_v22, %v1305_v11  ;;  %v494_v11 = vld [vmem:[#allocation6 + $0x558] sm:$0xff] }
 0x3bb   :  { %7468 = vmatprep.subr.bf16.mxu0 %v9563_v42  ;;  %v1177_v34 = vld [vmem:[#allocation6 + $0x1ab0] sm:$0xff] }
 0x3bc   :  { %7426 = vmatpush1.bf16.msra.mxu1 %v9314_v21  ;;  %v1293_v38 = vld [vmem:[#allocation6 + $0x1e50] sm:$0xff]  ;;  %v9395_v21 = vcombine.high %v1173_v27, %v1177_v34  ;;  %v9394_v54 = vcombine.low %v1173_v27, %v1177_v34 }
 0x3bd   :  { %7427 = vmatprep.subr.bf16.mxu1 %v9435_v44  ;;  %v1297_v42 = vld [vmem:[#allocation6 + $0x1e70] sm:$0xff] }
 0x3be   :  { %7469 = vmatpush2.bf16.msra.mxu0 %v9562_v52  ;;  %v1165_v51 = vld [vmem:[#allocation6 + $0x1a50] sm:$0xff]  ;;  %v9515_v52 = vcombine.high %v1293_v38, %v1297_v42  ;;  %v9514_v49 = vcombine.low %v1293_v38, %v1297_v42  ;;  %v370_v38 = vld [vmem:[#allocation6 + $0x178] sm:$0xff] }
 0x3bf   :  { %7470 = vmatprep.subr.bf16.mxu0 %v9555_v50  ;;  %v1169_v44 = vld [vmem:[#allocation6 + $0x1a70] sm:$0xff] }
 0x3c0   :  { %7428 = vmatpush2.bf16.msra.mxu1 %v9434_v31  ;;  %v1285_v55 = vld [vmem:[#allocation6 + $0x1e10] sm:$0xff]  ;;  %v9387_v31 = vcombine.high %v1165_v51, %v1169_v44  ;;  %v9386_v60 = vcombine.low %v1165_v51, %v1169_v44 }
 0x3c1   :  { %7429 = vmatprep.subr.bf16.mxu1 %v9427_v53  ;;  %v1289_v50 = vld [vmem:[#allocation6 + $0x1e30] sm:$0xff] }
 0x3c2   :  { %7471 = vmatpush2.bf16.msra.mxu0 %v9554_v59  ;;  %v1157_v58 = vld [vmem:[#allocation6 + $0x1a10] sm:$0xff]  ;;  %v9507_v59 = vcombine.high %v1285_v55, %v1289_v50  ;;  %v9506_v2 = vcombine.low %v1285_v55, %v1289_v50 }
 0x3c3   :  { %7472 = vmatprep.subr.bf16.mxu0 %v9547_v56  ;;  %v1161_v53 = vld [vmem:[#allocation6 + $0x1a30] sm:$0xff]  ;;  %v514_v56 = vld [vmem:[#allocation6 + $0x5f8] sm:$0xff] }
 0x3c4   :  { %7430 = vmatpush2.bf16.msra.mxu1 %v9426_v1  ;;  %v9379_v1 = vcombine.high %v1157_v58, %v1161_v53  ;;  %v9378_v48 = vcombine.low %v1157_v58, %v1161_v53  ;;  %v8732_v32 = vcombine.low %v510_v61, %v514_v56  ;;  %v358_v58 = vld [vmem:[#allocation6 + $0x118] sm:$0xff] }
 0x3c5   :  { %7431 = vmatprep.subr.bf16.mxu1 %v9419_v4  ;;  %v386_v4 = vld [vmem:[#allocation6 + $0x1f8] sm:$0xff] }
 0x3c6   :  { %7473 = vmatpush2.bf16.msra.mxu0 %v9546_v5  ;;  %v8733_v5 = vcombine.high %v510_v61, %v514_v56  ;;  %v8605_v63 = vcombine.high %v382_v3, %v386_v4  ;;  %v8604_v22 = vcombine.low %v382_v3, %v386_v4  ;;  %v362_v53 = vld [vmem:[#allocation6 + $0x138] sm:$0xff] }
 0x3c7   :  { %7474 = vmatprep.subr.bf16.mxu0 %v9539_v10  ;;  %v502_v10 = vld [vmem:[#allocation6 + $0x598] sm:$0xff] }
 0x3c8   :  { %7432 = vmatpush2.bf16.msra.mxu1 %v9418_v0  ;;  %v506_v0 = vld [vmem:[#allocation6 + $0x5b8] sm:$0xff] }
 0x3c9   :  { %7433 = vmatprep.subr.bf16.mxu1 %v9411_v14  ;;  %v1371_v14 = vsub.s32 5, %v10136_v45  ;;  %v8725_v20 = vcombine.high %v502_v10, %v506_v0 }
 0x3ca   :  { %7475 = vmatpush2.bf16.msra.mxu0 %v9538_v15  ;;  %v374_v15 = vld [vmem:[#allocation6 + $0x198] sm:$0xff] }
 0x3cb   :  { %7476 = vmatprep.subr.bf16.mxu0 %v9531_v39  ;;  %v9830_v39 = vld [vmem:[#allocation7] sm:$0xff]  ;;  %v8597_v27 = vcombine.high %v374_v15, %v378_v7  ;;  %v8596_v44 = vcombine.low %v374_v15, %v378_v7 }
 0x3cc   :  { %7434 = vmatpush2.bf16.msra.mxu1 %v9410_v8  ;;  %v1368_v8 = vrot.slane %v9830_v39, %v1367_v9  ;;  %v1372_v34 = vrot.slane %v9830_v39, %v1371_v14  ;;  %v350_v9 = vld [vmem:[#allocation6 + $0xd8] sm:$0xff] }
 0x3cd   :  { %7435 = vmatprep.subr.bf16.mxu1 %v9403_v25  ;;  %v498_v25 = vld [vmem:[#allocation6 + $0x578] sm:$0xff] }
 0x3ce   :  { %7477 = vmatpush2.bf16.msra.mxu0 %v9530_v26  ;;  %v474_v14 = vld [vmem:[#allocation6 + $0x4b8] sm:$0xff] }
 0x3cf   :  { %7478 = vmatprep.subr.bf16.mxu0 %v9523_v36  ;;  %v8724_v36 = vcombine.low %v502_v10, %v506_v0  ;;  %v354_v10 = vld [vmem:[#allocation6 + $0xf8] sm:$0xff] }
 0x3d0   :  { %7436 = vmatpush2.bf16.msra.mxu1 %v9402_v19  ;;  %v366_v19 = vld [vmem:[#allocation6 + $0x158] sm:$0xff]  ;;  %v8573_v15 = vcombine.high %v350_v9, %v354_v10 }
 0x3d1   :  { %7437 = vmatprep.subr.bf16.mxu1 %v9395_v21  ;;  %v346_v39 = vld [vmem:[#allocation6 + $0xb8] sm:$0xff] }
 0x3d2   :  { %7479 = vmatpush2.bf16.msra.mxu0 %v9522_v46  ;;  %v8717_v46 = vcombine.high %v494_v11, %v498_v25 }
 0x3d3   :  { %7480 = vmatprep.subr.bf16.mxu0 %v9515_v52  ;;  %v486_v52 = vld [vmem:[#allocation6 + $0x518] sm:$0xff] }
 0x3d4   :  { %7438 = vmatpush2.bf16.msra.mxu1 %v9394_v54  ;;  %v490_v54 = vld [vmem:[#allocation6 + $0x538] sm:$0xff] }
 0x3d5   :  { %7439 = vmatprep.subr.bf16.mxu1 %v9387_v31  ;;  %v8709_v56 = vcombine.high %v486_v52, %v490_v54 }
 0x3d6   :  { %7481 = vmatpush2.bf16.msra.mxu0 %v9514_v49  ;;  %v8716_v49 = vcombine.low %v494_v11, %v498_v25  ;;  %v462_v11 = vld [vmem:[#allocation6 + $0x458] sm:$0xff] }
 0x3d7   :  { %7482 = vmatprep.subr.bf16.mxu0 %v9507_v59  ;;  %v466_v25 = vld [vmem:[#allocation6 + $0x478] sm:$0xff] }
 0x3d8   :  { %7440 = vmatpush2.bf16.msra.mxu1 %v9386_v60 }
 0x3d9   :  { %7441 = vmatprep.subr.bf16.mxu1 %v9379_v1  ;;  %v478_v1 = vld [vmem:[#allocation6 + $0x4d8] sm:$0xff] }
 0x3da   :  { %7483 = vmatpush2.bf16.msra.mxu0 %v9506_v2  ;;  %v482_v2 = vld [vmem:[#allocation6 + $0x4f8] sm:$0xff] }
 0x3db   :  { %7534 = vmatprep.subr.bf16.mxu0 %v8733_v5  ;;  %v8581_v5 = vcombine.high %v358_v58, %v362_v53  ;;  %v8701_v0 = vcombine.high %v478_v1, %v482_v2  ;;  %v8700_v7 = vcombine.low %v478_v1, %v482_v2 }
 0x3dc   :  { %7442 = vmatpush2.bf16.msra.mxu1 %v9378_v48  ;;  %v8708_v48 = vcombine.low %v486_v52, %v490_v54  ;;  %v330_v52 = vld [vmem:[#allocation6 + $0x38] sm:$0xff] }
 0x3dd   :  { %v7240_v26 = vpop.f32.mrf.mxu0  ;;  %7485 = vmatmul.mubr.bf16.vlgmr.msra.gmra.mxu0 %v10142_v41  ;;  %7493 = vmatprep.subr.bf16.mxu1 %v8605_v63  ;;  %v8580_v63 = vcombine.low %v358_v58, %v362_v53  ;;  %v446_v58 = vld [vmem:[#allocation6 + $0x3d8] sm:$0xff] }
 0x3de   :  { %7535 = vmatpush1.bf16.msra.mxu0 %v8732_v32  ;;  %7566 = vmatprep.mubr.bf16.mxu0 %v10068_v33  ;;  %v8589_v33 = vcombine.high %v366_v19, %v370_v38  ;;  %v470_v32 = vld [vmem:[#allocation6 + $0x498] sm:$0xff] }
 0x3df   :  { %v7199_v42 = vpop.f32.mrf.mxu1  ;;  %v7242_v21 = vpop.f32.mrf.mxu0  ;;  %7444 = vmatmul.mubr.bf16.vlgmr.msra.gmra.mxu1 %v10144_v18  ;;  %7536 = vmatprep.subr.bf16.mxu0 %v8725_v20  ;;  %v342_v20 = vld [vmem:[#allocation6 + $0x98] sm:$0xff] }
 0x3e0   :  { %v7200_v51 = vadd.f32 %v7199_v42, %v1368_v8  ;;  %7494 = vmatpush1.bf16.msra.mxu1 %v8604_v22  ;;  %7525 = vmatprep.mubr.bf16.mxu1 %v10074_v40  ;;  %v8588_v40 = vcombine.low %v366_v19, %v370_v38  ;;  %v8693_v8 = vcombine.high %v470_v32, %v474_v14  ;;  %v454_v42 = vld [vmem:[#allocation6 + $0x418] sm:$0xff] }
 0x3e1   :  { %v7201_v55 = vpop.f32.mrf.mxu1  ;;  %v7244_v50 = vpop.f32.mrf.mxu0  ;;  %7495 = vmatprep.subr.bf16.mxu1 %v8597_v27  ;;  %v8572_v22 = vcombine.low %v350_v9, %v354_v10  ;;  %v8692_v27 = vcombine.low %v470_v32, %v474_v14  ;;  %v8685_v19 = vcombine.high %v462_v11, %v466_v25  ;;  %v8564_v38 = vcombine.low %v342_v20, %v346_v39  ;;  %v450_v53 = vld [vmem:[#allocation6 + $0x3f8] sm:$0xff] }
 0x3e2   :  { %v7202_v31 = vadd.f32 %v7201_v55, %v1372_v34  ;;  %7537 = vmatpush1.bf16.msra.mxu0 %v8724_v36  ;;  %v10230_v59 = vadd.f32 %v7240_v26, %v7200_v51  ;;  %v8565_v26 = vcombine.high %v342_v20, %v346_v39  ;;  %v334_v34 = vld [vmem:[#allocation6 + $0x58] sm:$0xff]  ;;  %v8684_v51 = vcombine.low %v462_v11, %v466_v25 }
 0x3e3   :  { %v7203_v60 = vpop.f32.mrf.mxu1  ;;  %v7245_v61 = vpop.f32.mrf.mxu0  ;;  %7538 = vmatprep.subr.bf16.mxu0 %v8717_v46  ;;  %v338_v36 = vld [vmem:[#allocation6 + $0x78] sm:$0xff]  ;;  %v8669_v1 = vcombine.high %v446_v58, %v450_v53  ;;  %v8668_v9 = vcombine.low %v446_v58, %v450_v53 }
 0x3e4   :  { %7496 = vmatpush1.bf16.msra.mxu1 %v8596_v44  ;;  %v10232_v3 = vadd.f32 %v7242_v21, %v7202_v31  ;;  %v458_v21 = vld [vmem:[#allocation6 + $0x438] sm:$0xff]  ;;  %v8557_v46 = vcombine.high %v334_v34, %v338_v36  ;;  %v8556_v55 = vcombine.low %v334_v34, %v338_v36 }
 0x3e5   :  { %v7204_v4 = vpop.f32.mrf.mxu1  ;;  %7497 = vmatprep.subr.bf16.mxu1 %v8589_v33  ;;  %v326_v44 = vld [vmem:[#allocation6 + $0x18] sm:$0xff]  ;;  %v8677_v54 = vcombine.high %v454_v42, %v458_v21 }
 0x3e6   :  { %7539 = vmatpush1.bf16.msra.mxu0 %v8716_v49  ;;  %v574_v50 = vld [vmem:[#allocation6 + $0x7d8] sm:$0xff]  ;;  %v8549_v31 = vcombine.high %v326_v44, %v330_v52  ;;  %v8676_v49 = vcombine.low %v454_v42, %v458_v21  ;;  %v8548_v61 = vcombine.low %v326_v44, %v330_v52 }
 0x3e7   :  { %7540 = vmatprep.subr.bf16.mxu0 %v8709_v56  ;;  %v578_v33 = vld [vmem:[#allocation6 + $0x7f8] sm:$0xff] }
 0x3e8   :  { %7498 = vmatpush1.bf16.msra.mxu1 %v8588_v40  ;;  %v8797_v60 = vcombine.high %v574_v50, %v578_v33  ;;  %v566_v56 = vld [vmem:[#allocation6 + $0x798] sm:$0xff]  ;;  %v8796_v2 = vcombine.low %v574_v50, %v578_v33 }
 0x3e9   :  { %7499 = vmatprep.subr.bf16.mxu1 %v8581_v5  ;;  %v570_v40 = vld [vmem:[#allocation6 + $0x7b8] sm:$0xff] }
 0x3ea   :  { %7541 = vmatpush1.bf16.msra.mxu0 %v8708_v48  ;;  %v438_v4 = vld [vmem:[#allocation6 + $0x398] sm:$0xff]  ;;  %v8789_v48 = vcombine.high %v566_v56, %v570_v40  ;;  %v8788_v32 = vcombine.low %v566_v56, %v570_v40 }
 0x3eb   :  { %7542 = vmatprep.subr.bf16.mxu0 %v8701_v0  ;;  %v442_v5 = vld [vmem:[#allocation6 + $0x3b8] sm:$0xff] }
 0x3ec   :  { %7500 = vmatpush1.bf16.msra.mxu1 %v8580_v63  ;;  %v558_v10 = vld [vmem:[#allocation6 + $0x758] sm:$0xff]  ;;  %v8661_v63 = vcombine.high %v438_v4, %v442_v5  ;;  %v8660_v20 = vcombine.low %v438_v4, %v442_v5 }
 0x3ed   :  { %7501 = vmatprep.subr.bf16.mxu1 %v8573_v15  ;;  %v562_v0 = vld [vmem:[#allocation6 + $0x778] sm:$0xff] }
 0x3ee   :  { %7543 = vmatpush1.bf16.msra.mxu0 %v8700_v7  ;;  %v430_v14 = vld [vmem:[#allocation6 + $0x358] sm:$0xff]  ;;  %v8781_v7 = vcombine.high %v558_v10, %v562_v0  ;;  %v8780_v11 = vcombine.low %v558_v10, %v562_v0 }
 0x3ef   :  { %7544 = vmatprep.subr.bf16.mxu0 %v8693_v8  ;;  %v434_v15 = vld [vmem:[#allocation6 + $0x378] sm:$0xff] }
 0x3f0   :  { %7502 = vmatpush1.bf16.msra.mxu1 %v8572_v22  ;;  %v550_v39 = vld [vmem:[#allocation6 + $0x718] sm:$0xff]  ;;  %v8653_v22 = vcombine.high %v430_v14, %v434_v15  ;;  %v8652_v34 = vcombine.low %v430_v14, %v434_v15 }
 0x3f1   :  { %7503 = vmatprep.subr.bf16.mxu1 %v8565_v26  ;;  %v554_v8 = vld [vmem:[#allocation6 + $0x738] sm:$0xff] }
 0x3f2   :  { %7545 = vmatpush1.bf16.msra.mxu0 %v8692_v27  ;;  %v422_v25 = vld [vmem:[#allocation6 + $0x318] sm:$0xff]  ;;  %v8773_v27 = vcombine.high %v550_v39, %v554_v8  ;;  %v8772_v42 = vcombine.low %v550_v39, %v554_v8 }
 0x3f3   :  { %7546 = vmatprep.subr.bf16.mxu0 %v8685_v19  ;;  %v426_v26 = vld [vmem:[#allocation6 + $0x338] sm:$0xff] }
 0x3f4   :  { %7504 = vmatpush1.bf16.msra.mxu1 %v8564_v38  ;;  %v542_v36 = vld [vmem:[#allocation6 + $0x6d8] sm:$0xff]  ;;  %v8645_v38 = vcombine.high %v422_v25, %v426_v26  ;;  %v8644_v44 = vcombine.low %v422_v25, %v426_v26 }
 0x3f5   :  { %7505 = vmatprep.subr.bf16.mxu1 %v8557_v46  ;;  %v546_v19 = vld [vmem:[#allocation6 + $0x6f8] sm:$0xff] }
 0x3f6   :  { %7547 = vmatpush1.bf16.msra.mxu0 %v8684_v51  ;;  %v414_v21 = vld [vmem:[#allocation6 + $0x2d8] sm:$0xff]  ;;  %v8765_v51 = vcombine.high %v542_v36, %v546_v19  ;;  %v8764_v50 = vcombine.low %v542_v36, %v546_v19 }
 0x3f7   :  { %7548 = vmatprep.subr.bf16.mxu0 %v8677_v54  ;;  %v418_v46 = vld [vmem:[#allocation6 + $0x2f8] sm:$0xff] }
 0x3f8   :  { %7506 = vmatpush1.bf16.msra.mxu1 %v8556_v55  ;;  %v534_v52 = vld [vmem:[#allocation6 + $0x698] sm:$0xff]  ;;  %v8637_v55 = vcombine.high %v414_v21, %v418_v46  ;;  %v8636_v58 = vcombine.low %v414_v21, %v418_v46 }
 0x3f9   :  { %7507 = vmatprep.subr.bf16.mxu1 %v8549_v31  ;;  %v538_v54 = vld [vmem:[#allocation6 + $0x6b8] sm:$0xff] }
 0x3fa   :  { %7549 = vmatpush1.bf16.msra.mxu0 %v8676_v49  ;;  %v406_v33 = vld [vmem:[#allocation6 + $0x298] sm:$0xff]  ;;  %v8757_v49 = vcombine.high %v534_v52, %v538_v54  ;;  %v8756_v56 = vcombine.low %v534_v52, %v538_v54 }
 0x3fb   :  { %7550 = vmatprep.subr.bf16.mxu0 %v8797_v60  ;;  %v410_v31 = vld [vmem:[#allocation6 + $0x2b8] sm:$0xff] }
 0x3fc   :  { %7508 = vmatpush1.bf16.msra.mxu1 %v8548_v61  ;;  %v526_v53 = vld [vmem:[#allocation6 + $0x658] sm:$0xff]  ;;  %v8629_v61 = vcombine.high %v406_v33, %v410_v31  ;;  %v8628_v4 = vcombine.low %v406_v33, %v410_v31 }
 0x3fd   :  { %7509 = vmatprep.subr.bf16.mxu1 %v8669_v1  ;;  %v530_v60 = vld [vmem:[#allocation6 + $0x678] sm:$0xff] }
 0x3fe   :  { %7551 = vmatpush2.bf16.msra.mxu0 %v8796_v2  ;;  %v398_v40 = vld [vmem:[#allocation6 + $0x258] sm:$0xff]  ;;  %v8749_v2 = vcombine.high %v526_v53, %v530_v60  ;;  %v8748_v10 = vcombine.low %v526_v53, %v530_v60 }
 0x3ff   :  { %7552 = vmatprep.subr.bf16.mxu0 %v8789_v48  ;;  %v402_v1 = vld [vmem:[#allocation6 + $0x278] sm:$0xff] }
 0x400   :  { %7510 = vmatpush2.bf16.msra.mxu1 %v8668_v9  ;;  %v518_v5 = vld [vmem:[#allocation6 + $0x618] sm:$0xff]  ;;  %v8621_v9 = vcombine.high %v398_v40, %v402_v1  ;;  %v8620_v14 = vcombine.low %v398_v40, %v402_v1 }
 0x401   :  { %7511 = vmatprep.subr.bf16.mxu1 %v8661_v63  ;;  %v522_v48 = vld [vmem:[#allocation6 + $0x638] sm:$0xff] }
 0x402   :  { %7553 = vmatpush2.bf16.msra.mxu0 %v8788_v32  ;;  %v390_v0 = vld [vmem:[#allocation6 + $0x218] sm:$0xff]  ;;  %v8741_v32 = vcombine.high %v518_v5, %v522_v48  ;;  %v8740_v39 = vcombine.low %v518_v5, %v522_v48 }
 0x403   :  { %7554 = vmatprep.subr.bf16.mxu0 %v8781_v7  ;;  %v394_v63 = vld [vmem:[#allocation6 + $0x238] sm:$0xff] }
 0x404   :  { %7512 = vmatpush2.bf16.msra.mxu1 %v8660_v20  ;;  %v766_v15 = vld [vmem:[#allocation6 + $0xdd8] sm:$0xff]  ;;  %v8613_v20 = vcombine.high %v390_v0, %v394_v63  ;;  %v8612_v25 = vcombine.low %v390_v0, %v394_v63 }
 0x405   :  { %7513 = vmatprep.subr.bf16.mxu1 %v8653_v22  ;;  %v770_v7 = vld [vmem:[#allocation6 + $0xdf8] sm:$0xff] }
 0x406   :  { %7555 = vmatpush2.bf16.msra.mxu0 %v8780_v11  ;;  %v638_v8 = vld [vmem:[#allocation6 + $0x9d8] sm:$0xff]  ;;  %v8989_v11 = vcombine.high %v766_v15, %v770_v7  ;;  %v8988_v36 = vcombine.low %v766_v15, %v770_v7 }
 0x407   :  { %7556 = vmatprep.subr.bf16.mxu0 %v8773_v27  ;;  %v642_v22 = vld [vmem:[#allocation6 + $0x9f8] sm:$0xff] }
 0x408   :  { %7514 = vmatpush2.bf16.msra.mxu1 %v8652_v34  ;;  %v758_v26 = vld [vmem:[#allocation6 + $0xd98] sm:$0xff]  ;;  %v8861_v34 = vcombine.high %v638_v8, %v642_v22  ;;  %v8860_v21 = vcombine.low %v638_v8, %v642_v22 }
 0x409   :  { %7515 = vmatprep.subr.bf16.mxu1 %v8645_v38  ;;  %v762_v27 = vld [vmem:[#allocation6 + $0xdb8] sm:$0xff] }
 0x40a   :  { %7557 = vmatpush2.bf16.msra.mxu0 %v8772_v42  ;;  %v630_v19 = vld [vmem:[#allocation6 + $0x998] sm:$0xff]  ;;  %v8981_v42 = vcombine.high %v758_v26, %v762_v27  ;;  %v8980_v54 = vcombine.low %v758_v26, %v762_v27 }
 0x40b   :  { %7558 = vmatprep.subr.bf16.mxu0 %v8765_v51  ;;  %v634_v38 = vld [vmem:[#allocation6 + $0x9b8] sm:$0xff] }
 0x40c   :  { %7516 = vmatpush2.bf16.msra.mxu1 %v8644_v44  ;;  %v750_v46 = vld [vmem:[#allocation6 + $0xd58] sm:$0xff]  ;;  %v8853_v52 = vcombine.high %v630_v19, %v634_v38 }
 0x40d   :  { %7517 = vmatprep.subr.bf16.mxu1 %v8637_v55  ;;  %v754_v51 = vld [vmem:[#allocation6 + $0xd78] sm:$0xff] }
 0x40e   :  { %7559 = vmatpush2.bf16.msra.mxu0 %v8764_v50  ;;  %v622_v55 = vld [vmem:[#allocation6 + $0x958] sm:$0xff]  ;;  %v8972_v1 = vcombine.low %v750_v46, %v754_v51 }
 0x40f   :  { %7560 = vmatprep.subr.bf16.mxu0 %v8757_v49  ;;  %v626_v50 = vld [vmem:[#allocation6 + $0x978] sm:$0xff]  ;;  %v8973_v49 = vcombine.high %v750_v46, %v754_v51 }
 0x410   :  { %7518 = vmatpush2.bf16.msra.mxu1 %v8636_v58  ;;  %v742_v53 = vld [vmem:[#allocation6 + $0xd18] sm:$0xff] }
 0x411   :  { %7519 = vmatprep.subr.bf16.mxu1 %v8629_v61  ;;  %v746_v60 = vld [vmem:[#allocation6 + $0xd38] sm:$0xff] }
 0x412   :  { %7561 = vmatpush2.bf16.msra.mxu0 %v8756_v56  ;;  %v8965_v48 = vcombine.high %v742_v53, %v746_v60  ;;  %v610_v15 = vld [vmem:[#allocation6 + $0x8f8] sm:$0xff] }
 0x413   :  { %7562 = vmatprep.subr.bf16.mxu0 %v8749_v2  ;;  %v614_v2 = vld [vmem:[#allocation6 + $0x918] sm:$0xff] }
 0x414   :  { %7520 = vmatpush2.bf16.msra.mxu1 %v8628_v4  ;;  %v730_v8 = vld [vmem:[#allocation6 + $0xcb8] sm:$0xff] }
 0x415   :  { %7521 = vmatprep.subr.bf16.mxu1 %v8621_v9  ;;  %v734_v9 = vld [vmem:[#allocation6 + $0xcd8] sm:$0xff] }
 0x416   :  { %7563 = vmatpush2.bf16.msra.mxu0 %v8748_v10  ;;  %v738_v10 = vld [vmem:[#allocation6 + $0xcf8] sm:$0xff] }
 0x417   :  { %7564 = vmatprep.subr.bf16.mxu0 %v8741_v32  ;;  %v8957_v7 = vcombine.high %v734_v9, %v738_v10  ;;  %v602_v26 = vld [vmem:[#allocation6 + $0x8b8] sm:$0xff] }
 0x418   :  { %7522 = vmatpush2.bf16.msra.mxu1 %v8620_v14  ;;  %v606_v14 = vld [vmem:[#allocation6 + $0x8d8] sm:$0xff] }
 0x419   :  { %7523 = vmatprep.subr.bf16.mxu1 %v8613_v20  ;;  %v8829_v22 = vcombine.high %v606_v14, %v610_v15  ;;  %v594_v46 = vld [vmem:[#allocation6 + $0x878] sm:$0xff] }
 0x41a   :  { %7565 = vmatpush2.bf16.msra.mxu0 %v8740_v39  ;;  %v726_v39 = vld [vmem:[#allocation6 + $0xc98] sm:$0xff] }
 0x41b   :  { %7616 = vmatprep.subr.bf16.mxu0 %v8989_v11  ;;  %v8956_v11 = vcombine.low %v734_v9, %v738_v10  ;;  %v8949_v27 = vcombine.high %v726_v39, %v730_v8 }
 0x41c   :  { %7524 = vmatpush2.bf16.msra.mxu1 %v8612_v25  ;;  %v598_v25 = vld [vmem:[#allocation6 + $0x898] sm:$0xff] }
 0x41d   :  { %v7322_v44 = vpop.f32.mrf.mxu0  ;;  %7567 = vmatmul.mubr.bf16.vlgmr.msra.gmra.mxu0 %v10070_v37  ;;  %7575 = vmatprep.subr.bf16.mxu1 %v8861_v34  ;;  %v8852_v37 = vcombine.low %v630_v19, %v634_v38  ;;  %v8828_v34 = vcombine.low %v606_v14, %v610_v15  ;;  %v722_v19 = vld [vmem:[#allocation6 + $0xc78] sm:$0xff]  ;;  %v8821_v38 = vcombine.high %v598_v25, %v602_v26 }
 0x41e   :  { %7617 = vmatpush1.bf16.msra.mxu0 %v8988_v36  ;;  %7648 = vmatprep.mubr.bf16.mxu0 %v10084_v62  ;;  %v8845_v62 = vcombine.high %v622_v55, %v626_v50  ;;  %v718_v36 = vld [vmem:[#allocation6 + $0xc58] sm:$0xff] }
 0x41f   :  { %v7281_v33 = vpop.f32.mrf.mxu1  ;;  %v7324_v31 = vpop.f32.mrf.mxu0  ;;  %7526 = vmatmul.mubr.bf16.vlgmr.msra.gmra.mxu1 %v10077_v43  ;;  %7618 = vmatprep.subr.bf16.mxu0 %v8981_v42  ;;  %v618_v43 = vld [vmem:[#allocation6 + $0x938] sm:$0xff]  ;;  %v8948_v42 = vcombine.low %v726_v39, %v730_v8  ;;  %v8941_v51 = vcombine.high %v718_v36, %v722_v19 }
 0x420   :  { %v7282_v58 = vadd.f32 %v7281_v33, %v10230_v59  ;;  %7576 = vmatpush1.bf16.msra.mxu1 %v8860_v21  ;;  %7607 = vmatprep.mubr.bf16.mxu1 %v10089_v6  ;;  %v8844_v6 = vcombine.low %v622_v55, %v626_v50  ;;  %v8837_v32 = vcombine.high %v614_v2, %v618_v43  ;;  %v590_v21 = vld [vmem:[#allocation6 + $0x858] sm:$0xff] }
 0x421   :  { %v7283_v61 = vpop.f32.mrf.mxu1  ;;  %v7326_v56 = vpop.f32.mrf.mxu0  ;;  %7577 = vmatprep.subr.bf16.mxu1 %v8853_v52  ;;  %v8836_v20 = vcombine.low %v614_v2, %v618_v43  ;;  %v710_v52 = vld [vmem:[#allocation6 + $0xc18] sm:$0xff]  ;;  %v8813_v55 = vcombine.high %v590_v21, %v594_v46  ;;  %v8940_v50 = vcombine.low %v718_v36, %v722_v19 }
 0x422   :  { %v7284_v40 = vadd.f32 %v7283_v61, %v10232_v3  ;;  %7619 = vmatpush1.bf16.msra.mxu0 %v8980_v54  ;;  %v10240_v4 = vadd.f32 %v7322_v44, %v7282_v58  ;;  %v8964_v3 = vcombine.low %v742_v53, %v746_v60  ;;  %v8820_v44 = vcombine.low %v598_v25, %v602_v26  ;;  %v714_v54 = vld [vmem:[#allocation6 + $0xc38] sm:$0xff] }
 0x423   :  { %v7285_v5 = vpop.f32.mrf.mxu1  ;;  %v7327_v59 = vpop.f32.mrf.mxu0  ;;  %7620 = vmatprep.subr.bf16.mxu0 %v8973_v49  ;;  %v582_v33 = vld [vmem:[#allocation6 + $0x818] sm:$0xff]  ;;  %v8933_v49 = vcombine.high %v710_v52, %v714_v54  ;;  %v8812_v58 = vcombine.low %v590_v21, %v594_v46  ;;  %v8932_v61 = vcombine.low %v710_v52, %v714_v54 }
 0x424   :  { %7578 = vmatpush1.bf16.msra.mxu1 %v8852_v37  ;;  %v10242_v0 = vadd.f32 %v7324_v31, %v7284_v40  ;;  %v586_v31 = vld [vmem:[#allocation6 + $0x838] sm:$0xff] }
 0x425   :  { %v7286_v63 = vpop.f32.mrf.mxu1  ;;  %7579 = vmatprep.subr.bf16.mxu1 %v8845_v62  ;;  %v830_v37 = vld [vmem:[#allocation6 + $0xfd8] sm:$0xff]  ;;  %v8805_v60 = vcombine.high %v582_v33, %v586_v31 }
 0x426   :  { %7621 = vmatpush1.bf16.msra.mxu0 %v8972_v1  ;;  %v834_v53 = vld [vmem:[#allocation6 + $0xff8] sm:$0xff]  ;;  %v8804_v1 = vcombine.low %v582_v33, %v586_v31 }
 0x427   :  { %7622 = vmatprep.subr.bf16.mxu0 %v8965_v48  ;;  %v702_v56 = vld [vmem:[#allocation6 + $0xbd8] sm:$0xff]  ;;  %v9053_v40 = vcombine.high %v830_v37, %v834_v53  ;;  %v9052_v59 = vcombine.low %v830_v37, %v834_v53 }
 0x428   :  { %7580 = vmatpush1.bf16.msra.mxu1 %v8844_v6  ;;  %v706_v62 = vld [vmem:[#allocation6 + $0xbf8] sm:$0xff] }
 0x429   :  { %7581 = vmatprep.subr.bf16.mxu1 %v8837_v32  ;;  %v822_v2 = vld [vmem:[#allocation6 + $0xf98] sm:$0xff]  ;;  %v8925_v5 = vcombine.high %v702_v56, %v706_v62  ;;  %v8924_v10 = vcombine.low %v702_v56, %v706_v62 }
 0x42a   :  { %7623 = vmatpush1.bf16.msra.mxu0 %v8964_v3  ;;  %v826_v43 = vld [vmem:[#allocation6 + $0xfb8] sm:$0xff] }
 0x42b   :  { %7624 = vmatprep.subr.bf16.mxu0 %v8957_v7  ;;  %v694_v48 = vld [vmem:[#allocation6 + $0xb98] sm:$0xff]  ;;  %v9045_v9 = vcombine.high %v822_v2, %v826_v43  ;;  %v9044_v14 = vcombine.low %v822_v2, %v826_v43 }
 0x42c   :  { %7582 = vmatpush1.bf16.msra.mxu1 %v8836_v20  ;;  %v698_v6 = vld [vmem:[#allocation6 + $0xbb8] sm:$0xff] }
 0x42d   :  { %7583 = vmatprep.subr.bf16.mxu1 %v8829_v22  ;;  %v814_v63 = vld [vmem:[#allocation6 + $0xf58] sm:$0xff]  ;;  %v8917_v3 = vcombine.high %v694_v48, %v698_v6  ;;  %v8916_v39 = vcombine.low %v694_v48, %v698_v6 }
 0x42e   :  { %7625 = vmatpush1.bf16.msra.mxu0 %v8956_v11  ;;  %v818_v32 = vld [vmem:[#allocation6 + $0xf78] sm:$0xff] }
 0x42f   :  { %7626 = vmatprep.subr.bf16.mxu0 %v8949_v27  ;;  %v686_v15 = vld [vmem:[#allocation6 + $0xb58] sm:$0xff]  ;;  %v9037_v20 = vcombine.high %v814_v63, %v818_v32  ;;  %v9036_v25 = vcombine.low %v814_v63, %v818_v32 }
 0x430   :  { %7584 = vmatpush1.bf16.msra.mxu1 %v8828_v34  ;;  %v690_v7 = vld [vmem:[#allocation6 + $0xb78] sm:$0xff] }
 0x431   :  { %7585 = vmatprep.subr.bf16.mxu1 %v8821_v38  ;;  %v806_v8 = vld [vmem:[#allocation6 + $0xf18] sm:$0xff]  ;;  %v8909_v11 = vcombine.high %v686_v15, %v690_v7  ;;  %v8908_v36 = vcombine.low %v686_v15, %v690_v7 }
 0x432   :  { %7627 = vmatpush1.bf16.msra.mxu0 %v8948_v42  ;;  %v810_v22 = vld [vmem:[#allocation6 + $0xf38] sm:$0xff] }
 0x433   :  { %7628 = vmatprep.subr.bf16.mxu0 %v8941_v51  ;;  %v678_v26 = vld [vmem:[#allocation6 + $0xb18] sm:$0xff]  ;;  %v9029_v34 = vcombine.high %v806_v8, %v810_v22  ;;  %v9028_v21 = vcombine.low %v806_v8, %v810_v22 }
 0x434   :  { %7586 = vmatpush1.bf16.msra.mxu1 %v8820_v44  ;;  %v682_v27 = vld [vmem:[#allocation6 + $0xb38] sm:$0xff] }
 0x435   :  { %7587 = vmatprep.subr.bf16.mxu1 %v8813_v55  ;;  %v798_v19 = vld [vmem:[#allocation6 + $0xed8] sm:$0xff]  ;;  %v8901_v42 = vcombine.high %v678_v26, %v682_v27  ;;  %v8900_v52 = vcombine.low %v678_v26, %v682_v27 }
 0x436   :  { %7629 = vmatpush1.bf16.msra.mxu0 %v8940_v50  ;;  %v802_v38 = vld [vmem:[#allocation6 + $0xef8] sm:$0xff] }
 0x437   :  { %7630 = vmatprep.subr.bf16.mxu0 %v8933_v49  ;;  %v670_v46 = vld [vmem:[#allocation6 + $0xad8] sm:$0xff]  ;;  %v9021_v44 = vcombine.high %v798_v19, %v802_v38  ;;  %v9020_v33 = vcombine.low %v798_v19, %v802_v38 }
 0x438   :  { %7588 = vmatpush1.bf16.msra.mxu1 %v8812_v58  ;;  %v674_v51 = vld [vmem:[#allocation6 + $0xaf8] sm:$0xff] }
 0x439   :  { %7589 = vmatprep.subr.bf16.mxu1 %v8805_v60  ;;  %v790_v54 = vld [vmem:[#allocation6 + $0xe98] sm:$0xff]  ;;  %v8893_v50 = vcombine.high %v670_v46, %v674_v51  ;;  %v8892_v37 = vcombine.low %v670_v46, %v674_v51 }
 0x43a   :  { %7631 = vmatpush1.bf16.msra.mxu0 %v8932_v61  ;;  %v794_v55 = vld [vmem:[#allocation6 + $0xeb8] sm:$0xff] }
 0x43b   :  { %7632 = vmatprep.subr.bf16.mxu0 %v9053_v40  ;;  %v662_v31 = vld [vmem:[#allocation6 + $0xa98] sm:$0xff]  ;;  %v9013_v58 = vcombine.high %v790_v54, %v794_v55  ;;  %v9012_v56 = vcombine.low %v790_v54, %v794_v55 }
 0x43c   :  { %7590 = vmatpush1.bf16.msra.mxu1 %v8804_v1  ;;  %v666_v49 = vld [vmem:[#allocation6 + $0xab8] sm:$0xff] }
 0x43d   :  { %7591 = vmatprep.subr.bf16.mxu1 %v8925_v5  ;;  %v782_v53 = vld [vmem:[#allocation6 + $0xe58] sm:$0xff]  ;;  %v8885_v61 = vcombine.high %v662_v31, %v666_v49  ;;  %v8884_v2 = vcombine.low %v662_v31, %v666_v49 }
 0x43e   :  { %7633 = vmatpush2.bf16.msra.mxu0 %v9052_v59  ;;  %v786_v60 = vld [vmem:[#allocation6 + $0xe78] sm:$0xff] }
 0x43f   :  { %7634 = vmatprep.subr.bf16.mxu0 %v9045_v9  ;;  %v654_v62 = vld [vmem:[#allocation6 + $0xa58] sm:$0xff]  ;;  %v9005_v1 = vcombine.high %v782_v53, %v786_v60  ;;  %v9004_v48 = vcombine.low %v782_v53, %v786_v60 }
 0x440   :  { %7592 = vmatpush2.bf16.msra.mxu1 %v8924_v10  ;;  %v658_v40 = vld [vmem:[#allocation6 + $0xa78] sm:$0xff] }
 0x441   :  { %7593 = vmatprep.subr.bf16.mxu1 %v8917_v3  ;;  %v774_v43 = vld [vmem:[#allocation6 + $0xe18] sm:$0xff]  ;;  %v8877_v59 = vcombine.high %v654_v62, %v658_v40  ;;  %v8876_v63 = vcombine.low %v654_v62, %v658_v40 }
 0x442   :  { %7635 = vmatpush2.bf16.msra.mxu0 %v9044_v14  ;;  %v778_v5 = vld [vmem:[#allocation6 + $0xe38] sm:$0xff] }
 0x443   :  { %7636 = vmatprep.subr.bf16.mxu0 %v9037_v20  ;;  %v646_v6 = vld [vmem:[#allocation6 + $0xa18] sm:$0xff]  ;;  %v8997_v10 = vcombine.high %v774_v43, %v778_v5  ;;  %v8996_v15 = vcombine.low %v774_v43, %v778_v5 }
 0x444   :  { %7594 = vmatpush2.bf16.msra.mxu1 %v8916_v39  ;;  %v650_v9 = vld [vmem:[#allocation6 + $0xa38] sm:$0xff] }
 0x445   :  { %7595 = vmatprep.subr.bf16.mxu1 %v8909_v11  ;;  %v1022_v32 = vld [vmem:[#allocation6 + $0x15d8] sm:$0xff]  ;;  %v8869_v14 = vcombine.high %v646_v6, %v650_v9  ;;  %v8868_v8 = vcombine.low %v646_v6, %v650_v9 }
 0x446   :  { %7637 = vmatpush2.bf16.msra.mxu0 %v9036_v25  ;;  %v1026_v3 = vld [vmem:[#allocation6 + $0x15f8] sm:$0xff] }
 0x447   :  { %7638 = vmatprep.subr.bf16.mxu0 %v9029_v34  ;;  %v894_v7 = vld [vmem:[#allocation6 + $0x11d8] sm:$0xff]  ;;  %v9245_v39 = vcombine.high %v1022_v32, %v1026_v3  ;;  %v9244_v26 = vcombine.low %v1022_v32, %v1026_v3 }
 0x448   :  { %7596 = vmatpush2.bf16.msra.mxu1 %v8908_v36  ;;  %v898_v20 = vld [vmem:[#allocation6 + $0x11f8] sm:$0xff] }
 0x449   :  { %7597 = vmatprep.subr.bf16.mxu1 %v8901_v42  ;;  %v1014_v22 = vld [vmem:[#allocation6 + $0x1598] sm:$0xff]  ;;  %v9117_v25 = vcombine.high %v894_v7, %v898_v20  ;;  %v9116_v19 = vcombine.low %v894_v7, %v898_v20 }
 0x44a   :  { %7639 = vmatpush2.bf16.msra.mxu0 %v9028_v21  ;;  %v1018_v11 = vld [vmem:[#allocation6 + $0x15b8] sm:$0xff] }
 0x44b   :  { %7640 = vmatprep.subr.bf16.mxu0 %v9021_v44  ;;  %v886_v27 = vld [vmem:[#allocation6 + $0x1198] sm:$0xff]  ;;  %v9237_v36 = vcombine.high %v1014_v22, %v1018_v11  ;;  %v9236_v51 = vcombine.low %v1014_v22, %v1018_v11 }
 0x44c   :  { %7598 = vmatpush2.bf16.msra.mxu1 %v8900_v52  ;;  %v890_v34 = vld [vmem:[#allocation6 + $0x11b8] sm:$0xff] }
 0x44d   :  { %7599 = vmatprep.subr.bf16.mxu1 %v8893_v50  ;;  %v1006_v38 = vld [vmem:[#allocation6 + $0x1558] sm:$0xff]  ;;  %v9109_v46 = vcombine.high %v886_v27, %v890_v34 }
 0x44e   :  { %7641 = vmatpush2.bf16.msra.mxu0 %v9020_v33  ;;  %v1010_v42 = vld [vmem:[#allocation6 + $0x1578] sm:$0xff] }
 0x44f   :  { %7642 = vmatprep.subr.bf16.mxu0 %v9013_v58  ;;  %v878_v44 = vld [vmem:[#allocation6 + $0x1158] sm:$0xff]  ;;  %v9229_v50 = vcombine.high %v1006_v38, %v1010_v42  ;;  %v9228_v60 = vcombine.low %v1006_v38, %v1010_v42 }
 0x450   :  { %7600 = vmatpush2.bf16.msra.mxu1 %v8892_v37  ;;  %v882_v52 = vld [vmem:[#allocation6 + $0x1178] sm:$0xff] }
 0x451   :  { %7601 = vmatprep.subr.bf16.mxu1 %v8885_v61  ;;  %v998_v31 = vld [vmem:[#allocation6 + $0x1518] sm:$0xff] }
 0x452   :  { %7643 = vmatpush2.bf16.msra.mxu0 %v9012_v56  ;;  %v1002_v49 = vld [vmem:[#allocation6 + $0x1538] sm:$0xff] }
 0x453   :  { %7644 = vmatprep.subr.bf16.mxu0 %v9005_v1  ;;  %v870_v61 = vld [vmem:[#allocation6 + $0x1118] sm:$0xff]  ;;  %v9221_v40 = vcombine.high %v998_v31, %v1002_v49 }
 0x454   :  { %7602 = vmatpush2.bf16.msra.mxu1 %v8884_v2  ;;  %v990_v1 = vld [vmem:[#allocation6 + $0x14d8] sm:$0xff] }
 0x455   :  { %7603 = vmatprep.subr.bf16.mxu1 %v8877_v59  ;;  %v994_v2 = vld [vmem:[#allocation6 + $0x14f8] sm:$0xff] }
 0x456   :  { %7645 = vmatpush2.bf16.msra.mxu0 %v9004_v48  ;;  %v862_v48 = vld [vmem:[#allocation6 + $0x10d8] sm:$0xff]  ;;  %v9213_v9 = vcombine.high %v990_v1, %v994_v2 }
 0x457   :  { %7646 = vmatprep.subr.bf16.mxu0 %v8997_v10  ;;  %v866_v6 = vld [vmem:[#allocation6 + $0x10f8] sm:$0xff] }
 0x458   :  { %7604 = vmatpush2.bf16.msra.mxu1 %v8876_v63  ;;  %v982_v63 = vld [vmem:[#allocation6 + $0x1498] sm:$0xff]  ;;  %v9085_v3 = vcombine.high %v862_v48, %v866_v6 }
 0x459   :  { %7605 = vmatprep.subr.bf16.mxu1 %v8869_v14  ;;  %v986_v32 = vld [vmem:[#allocation6 + $0x14b8] sm:$0xff]  ;;  %v9212_v14 = vcombine.low %v990_v1, %v994_v2 }
 0x45a   :  { %7647 = vmatpush2.bf16.msra.mxu0 %v8996_v15  ;;  %v854_v15 = vld [vmem:[#allocation6 + $0x1098] sm:$0xff]  ;;  %v9205_v20 = vcombine.high %v982_v63, %v986_v32 }
 0x45b   :  { %7698 = vmatprep.subr.bf16.mxu0 %v9245_v39  ;;  %v858_v7 = vld [vmem:[#allocation6 + $0x10b8] sm:$0xff]  ;;  %v9084_v39 = vcombine.low %v862_v48, %v866_v6 }
 0x45c   :  { %7606 = vmatpush2.bf16.msra.mxu1 %v8868_v8  ;;  %v974_v8 = vld [vmem:[#allocation6 + $0x1458] sm:$0xff]  ;;  %v9077_v11 = vcombine.high %v854_v15, %v858_v7 }
 0x45d   :  { %v7404_v21 = vpop.f32.mrf.mxu0  ;;  %7649 = vmatmul.mubr.bf16.vlgmr.msra.gmra.mxu0 %v10110_v24  ;;  %7657 = vmatprep.subr.bf16.mxu1 %v9117_v25  ;;  %v9108_v24 = vcombine.low %v886_v27, %v890_v34  ;;  %v978_v22 = vld [vmem:[#allocation6 + $0x1478] sm:$0xff]  ;;  %v9204_v25 = vcombine.low %v982_v63, %v986_v32 }
 0x45e   :  { %7699 = vmatpush1.bf16.msra.mxu0 %v9244_v26  ;;  %7730 = vmatprep.mubr.bf16.mxu0 %v10108_v23  ;;  %v9101_v23 = vcombine.high %v878_v44, %v882_v52  ;;  %v846_v26 = vld [vmem:[#allocation6 + $0x1058] sm:$0xff]  ;;  %v9197_v34 = vcombine.high %v974_v8, %v978_v22 }
 0x45f   :  { %v7363_v54 = vpop.f32.mrf.mxu1  ;;  %v7406_v55 = vpop.f32.mrf.mxu0  ;;  %7608 = vmatmul.mubr.bf16.vlgmr.msra.gmra.mxu1 %v10114_v30  ;;  %7700 = vmatprep.subr.bf16.mxu0 %v9237_v36  ;;  %v874_v30 = vld [vmem:[#allocation6 + $0x1138] sm:$0xff]  ;;  %v9076_v36 = vcombine.low %v854_v15, %v858_v7 }
 0x460   :  { %v7364_v33 = vadd.f32 %v7363_v54, %v10240_v4  ;;  %7658 = vmatpush1.bf16.msra.mxu1 %v9116_v19  ;;  %7689 = vmatprep.mubr.bf16.mxu1 %v10112_v29  ;;  %v9100_v29 = vcombine.low %v878_v44, %v882_v52  ;;  %v9093_v59 = vcombine.high %v870_v61, %v874_v30  ;;  %v850_v27 = vld [vmem:[#allocation6 + $0x1078] sm:$0xff] }
 0x461   :  { %v7365_v58 = vpop.f32.mrf.mxu1  ;;  %v7408_v37 = vpop.f32.mrf.mxu0  ;;  %7659 = vmatprep.subr.bf16.mxu1 %v9109_v46  ;;  %v9092_v10 = vcombine.low %v870_v61, %v874_v30  ;;  %v966_v19 = vld [vmem:[#allocation6 + $0x1418] sm:$0xff]  ;;  %v9069_v42 = vcombine.high %v846_v26, %v850_v27  ;;  %v9068_v52 = vcombine.low %v846_v26, %v850_v27 }
 0x462   :  { %v7366_v53 = vadd.f32 %v7365_v58, %v10242_v0  ;;  %7701 = vmatpush1.bf16.msra.mxu0 %v9236_v51  ;;  %v10250_v56 = vadd.f32 %v7404_v21, %v7364_v33  ;;  %v9220_v0 = vcombine.low %v998_v31, %v1002_v49  ;;  %v970_v38 = vld [vmem:[#allocation6 + $0x1438] sm:$0xff]  ;;  %v9196_v21 = vcombine.low %v974_v8, %v978_v22 }
 0x463   :  { %v7367_v62 = vpop.f32.mrf.mxu1  ;;  %v7409_v4 = vpop.f32.mrf.mxu0  ;;  %7702 = vmatprep.subr.bf16.mxu0 %v9229_v50  ;;  %v838_v46 = vld [vmem:[#allocation6 + $0x1018] sm:$0xff]  ;;  %v9189_v44 = vcombine.high %v966_v19, %v970_v38  ;;  %v9188_v33 = vcombine.low %v966_v19, %v970_v38 }
 0x464   :  { %7660 = vmatpush1.bf16.msra.mxu1 %v9108_v24  ;;  %v10252_v43 = vadd.f32 %v7406_v55, %v7366_v53  ;;  %v842_v51 = vld [vmem:[#allocation6 + $0x1038] sm:$0xff] }
 0x465   :  { %v7368_v5 = vpop.f32.mrf.mxu1  ;;  %7661 = vmatprep.subr.bf16.mxu1 %v9101_v23  ;;  %v1086_v54 = vld [vmem:[#allocation6 + $0x17d8] sm:$0xff]  ;;  %v9061_v50 = vcombine.high %v838_v46, %v842_v51  ;;  %v9060_v58 = vcombine.low %v838_v46, %v842_v51 }
 0x466   :  { %7703 = vmatpush1.bf16.msra.mxu0 %v9228_v60  ;;  %v1090_v55 = vld [vmem:[#allocation6 + $0x17f8] sm:$0xff] }
 0x467   :  { %7704 = vmatprep.subr.bf16.mxu0 %v9221_v40  ;;  %v958_v24 = vld [vmem:[#allocation6 + $0x13d8] sm:$0xff]  ;;  %v9309_v49 = vcombine.high %v1086_v54, %v1090_v55  ;;  %v9308_v60 = vcombine.low %v1086_v54, %v1090_v55 }
 0x468   :  { %7662 = vmatpush1.bf16.msra.mxu1 %v9100_v29  ;;  %v962_v31 = vld [vmem:[#allocation6 + $0x13f8] sm:$0xff] }
 0x469   :  { %7663 = vmatprep.subr.bf16.mxu1 %v9093_v59  ;;  %v1078_v37 = vld [vmem:[#allocation6 + $0x1798] sm:$0xff]  ;;  %v9181_v53 = vcombine.high %v958_v24, %v962_v31  ;;  %v9180_v4 = vcombine.low %v958_v24, %v962_v31 }
 0x46a   :  { %7705 = vmatpush1.bf16.msra.mxu0 %v9220_v0  ;;  %v1082_v23 = vld [vmem:[#allocation6 + $0x17b8] sm:$0xff] }
 0x46b   :  { %7706 = vmatprep.subr.bf16.mxu0 %v9213_v9  ;;  %v950_v61 = vld [vmem:[#allocation6 + $0x1398] sm:$0xff]  ;;  %v9301_v62 = vcombine.high %v1078_v37, %v1082_v23  ;;  %v9300_v2 = vcombine.low %v1078_v37, %v1082_v23 }
 0x46c   :  { %7664 = vmatpush1.bf16.msra.mxu1 %v9092_v10  ;;  %v954_v30 = vld [vmem:[#allocation6 + $0x13b8] sm:$0xff] }
 0x46d   :  { %7665 = vmatprep.subr.bf16.mxu1 %v9085_v3  ;;  %v1070_v40 = vld [vmem:[#allocation6 + $0x1758] sm:$0xff]  ;;  %v9173_v1 = vcombine.high %v950_v61, %v954_v30  ;;  %v9172_v48 = vcombine.low %v950_v61, %v954_v30 }
 0x46e   :  { %7707 = vmatpush1.bf16.msra.mxu0 %v9212_v14  ;;  %v1074_v29 = vld [vmem:[#allocation6 + $0x1778] sm:$0xff] }
 0x46f   :  { %7708 = vmatprep.subr.bf16.mxu0 %v9205_v20  ;;  %v942_v5 = vld [vmem:[#allocation6 + $0x1358] sm:$0xff]  ;;  %v9293_v0 = vcombine.high %v1070_v40, %v1074_v29  ;;  %v9292_v63 = vcombine.low %v1070_v40, %v1074_v29 }
 0x470   :  { %7666 = vmatpush1.bf16.msra.mxu1 %v9084_v39  ;;  %v946_v59 = vld [vmem:[#allocation6 + $0x1378] sm:$0xff] }
 0x471   :  { %7667 = vmatprep.subr.bf16.mxu1 %v9077_v11  ;;  %v1062_v6 = vld [vmem:[#allocation6 + $0x1718] sm:$0xff]  ;;  %v9165_v10 = vcombine.high %v942_v5, %v946_v59  ;;  %v9164_v15 = vcombine.low %v942_v5, %v946_v59 }
 0x472   :  { %7709 = vmatpush1.bf16.msra.mxu0 %v9204_v25  ;;  %v1066_v9 = vld [vmem:[#allocation6 + $0x1738] sm:$0xff] }
 0x473   :  { %7710 = vmatprep.subr.bf16.mxu0 %v9197_v34  ;;  %v934_v32 = vld [vmem:[#allocation6 + $0x1318] sm:$0xff]  ;;  %v9285_v14 = vcombine.high %v1062_v6, %v1066_v9  ;;  %v9284_v8 = vcombine.low %v1062_v6, %v1066_v9 }
 0x474   :  { %7668 = vmatpush1.bf16.msra.mxu1 %v9076_v36  ;;  %v938_v3 = vld [vmem:[#allocation6 + $0x1338] sm:$0xff] }
 0x475   :  { %7669 = vmatprep.subr.bf16.mxu1 %v9069_v42  ;;  %v1054_v7 = vld [vmem:[#allocation6 + $0x16d8] sm:$0xff]  ;;  %v9157_v39 = vcombine.high %v934_v32, %v938_v3  ;;  %v9156_v26 = vcombine.low %v934_v32, %v938_v3 }
 0x476   :  { %7711 = vmatpush1.bf16.msra.mxu0 %v9196_v21  ;;  %v1058_v20 = vld [vmem:[#allocation6 + $0x16f8] sm:$0xff] }
 0x477   :  { %7712 = vmatprep.subr.bf16.mxu0 %v9189_v44  ;;  %v926_v22 = vld [vmem:[#allocation6 + $0x12d8] sm:$0xff]  ;;  %v9277_v25 = vcombine.high %v1054_v7, %v1058_v20  ;;  %v9276_v19 = vcombine.low %v1054_v7, %v1058_v20 }
 0x478   :  { %7670 = vmatpush1.bf16.msra.mxu1 %v9068_v52  ;;  %v930_v11 = vld [vmem:[#allocation6 + $0x12f8] sm:$0xff] }
 0x479   :  { %7671 = vmatprep.subr.bf16.mxu1 %v9061_v50  ;;  %v1046_v27 = vld [vmem:[#allocation6 + $0x1698] sm:$0xff]  ;;  %v9149_v36 = vcombine.high %v926_v22, %v930_v11  ;;  %v9148_v46 = vcombine.low %v926_v22, %v930_v11 }
 0x47a   :  { %7713 = vmatpush1.bf16.msra.mxu0 %v9188_v33  ;;  %v1050_v34 = vld [vmem:[#allocation6 + $0x16b8] sm:$0xff] }
 0x47b   :  { %7714 = vmatprep.subr.bf16.mxu0 %v9309_v49  ;;  %v918_v38 = vld [vmem:[#allocation6 + $0x1298] sm:$0xff]  ;;  %v9269_v21 = vcombine.high %v1046_v27, %v1050_v34  ;;  %v9268_v54 = vcombine.low %v1046_v27, %v1050_v34 }
 0x47c   :  { %7672 = vmatpush1.bf16.msra.mxu1 %v9060_v58  ;;  %v922_v42 = vld [vmem:[#allocation6 + $0x12b8] sm:$0xff] }
 0x47d   :  { %7673 = vmatprep.subr.bf16.mxu1 %v9181_v53  ;;  %v1038_v51 = vld [vmem:[#allocation6 + $0x1658] sm:$0xff]  ;;  %v9141_v52 = vcombine.high %v918_v38, %v922_v42  ;;  %v9140_v24 = vcombine.low %v918_v38, %v922_v42 }
 0x47e   :  { %7715 = vmatpush2.bf16.msra.mxu0 %v9308_v60  ;;  %v1042_v44 = vld [vmem:[#allocation6 + $0x1678] sm:$0xff] }
 0x47f   :  { %7716 = vmatprep.subr.bf16.mxu0 %v9301_v62  ;;  %v910_v55 = vld [vmem:[#allocation6 + $0x1258] sm:$0xff]  ;;  %v9261_v33 = vcombine.high %v1038_v51, %v1042_v44  ;;  %v9260_v37 = vcombine.low %v1038_v51, %v1042_v44 }
 0x480   :  { %7674 = vmatpush2.bf16.msra.mxu1 %v9180_v4  ;;  %v914_v50 = vld [vmem:[#allocation6 + $0x1278] sm:$0xff] }
 0x481   :  { %7675 = vmatprep.subr.bf16.mxu1 %v9173_v1  ;;  %v1030_v31 = vld [vmem:[#allocation6 + $0x1618] sm:$0xff]  ;;  %v9133_v58 = vcombine.high %v910_v55, %v914_v50  ;;  %v9132_v61 = vcombine.low %v910_v55, %v914_v50 }
 0x482   :  { %7717 = vmatpush2.bf16.msra.mxu0 %v9300_v2  ;;  %v1034_v49 = vld [vmem:[#allocation6 + $0x1638] sm:$0xff] }
 0x483   :  { %7718 = vmatprep.subr.bf16.mxu0 %v9293_v0  ;;  %v902_v23 = vld [vmem:[#allocation6 + $0x1218] sm:$0xff]  ;;  %v9253_v60 = vcombine.high %v1030_v31, %v1034_v49  ;;  %v9252_v40 = vcombine.low %v1030_v31, %v1034_v49 }
 0x484   :  { %7676 = vmatpush2.bf16.msra.mxu1 %v9172_v48  ;;  %v906_v53 = vld [vmem:[#allocation6 + $0x1238] sm:$0xff] }
 0x485   :  { %7677 = vmatprep.subr.bf16.mxu1 %v9165_v10  ;;  %v1278_v30 = vld [vmem:[#allocation6 + $0x1dd8] sm:$0xff]  ;;  %v9125_v4 = vcombine.high %v902_v23, %v906_v53  ;;  %v9124_v5 = vcombine.low %v902_v23, %v906_v53 }
 0x486   :  { %7719 = vmatpush2.bf16.msra.mxu0 %v9292_v63  ;;  %v1282_v62 = vld [vmem:[#allocation6 + $0x1df8] sm:$0xff] }
 0x487   :  { %7720 = vmatprep.subr.bf16.mxu0 %v9285_v14  ;;  %v1150_v29 = vld [vmem:[#allocation6 + $0x19d8] sm:$0xff]  ;;  %v9501_v2 = vcombine.high %v1278_v30, %v1282_v62  ;;  %v9500_v6 = vcombine.low %v1278_v30, %v1282_v62 }
 0x488   :  { %7678 = vmatpush2.bf16.msra.mxu1 %v9164_v15  ;;  %v1154_v1 = vld [vmem:[#allocation6 + $0x19f8] sm:$0xff] }
 0x489   :  { %7679 = vmatprep.subr.bf16.mxu1 %v9157_v39  ;;  %v1270_v59 = vld [vmem:[#allocation6 + $0x1d98] sm:$0xff]  ;;  %v9373_v48 = vcombine.high %v1150_v29, %v1154_v1  ;;  %v9372_v32 = vcombine.low %v1150_v29, %v1154_v1 }
 0x48a   :  { %7721 = vmatpush2.bf16.msra.mxu0 %v9284_v8  ;;  %v1274_v0 = vld [vmem:[#allocation6 + $0x1db8] sm:$0xff] }
 0x48b   :  { %7722 = vmatprep.subr.bf16.mxu0 %v9277_v25  ;;  %v1142_v9 = vld [vmem:[#allocation6 + $0x1998] sm:$0xff]  ;;  %v9493_v63 = vcombine.high %v1270_v59, %v1274_v0  ;;  %v9492_v20 = vcombine.low %v1270_v59, %v1274_v0 }
 0x48c   :  { %7680 = vmatpush2.bf16.msra.mxu1 %v9156_v26  ;;  %v1146_v10 = vld [vmem:[#allocation6 + $0x19b8] sm:$0xff] }
 0x48d   :  { %7681 = vmatprep.subr.bf16.mxu1 %v9149_v36  ;;  %v1262_v3 = vld [vmem:[#allocation6 + $0x1d58] sm:$0xff]  ;;  %v9365_v7 = vcombine.high %v1142_v9, %v1146_v10 }
 0x48e   :  { %7723 = vmatpush2.bf16.msra.mxu0 %v9276_v19  ;;  %v1266_v14 = vld [vmem:[#allocation6 + $0x1d78] sm:$0xff] }
 0x48f   :  { %7724 = vmatprep.subr.bf16.mxu0 %v9269_v21  ;;  %v1134_v39 = vld [vmem:[#allocation6 + $0x1958] sm:$0xff]  ;;  %v9485_v25 = vcombine.high %v1262_v3, %v1266_v14 }
 0x490   :  { %7682 = vmatpush2.bf16.msra.mxu1 %v9148_v46  ;;  %v1138_v8 = vld [vmem:[#allocation6 + $0x1978] sm:$0xff] }
 0x491   :  { %7683 = vmatprep.subr.bf16.mxu1 %v9141_v52  ;;  %v1254_v27 = vld [vmem:[#allocation6 + $0x1d18] sm:$0xff]  ;;  %v9356_v52 = vcombine.low %v1134_v39, %v1138_v8 }
 0x492   :  { %7725 = vmatpush2.bf16.msra.mxu0 %v9268_v54  ;;  %v1258_v34 = vld [vmem:[#allocation6 + $0x1d38] sm:$0xff] }
 0x493   :  { %7726 = vmatprep.subr.bf16.mxu0 %v9261_v33  ;;  %v1126_v21 = vld [vmem:[#allocation6 + $0x1918] sm:$0xff]  ;;  %v9477_v44 = vcombine.high %v1254_v27, %v1258_v34 }
 0x494   :  { %7684 = vmatpush2.bf16.msra.mxu1 %v9140_v24  ;;  %v1130_v46 = vld [vmem:[#allocation6 + $0x1938] sm:$0xff]  ;;  %v9476_v24 = vcombine.low %v1254_v27, %v1258_v34 }
 0x495   :  { %7685 = vmatprep.subr.bf16.mxu1 %v9133_v58  ;;  %v1246_v54 = vld [vmem:[#allocation6 + $0x1cd8] sm:$0xff]  ;;  %v9349_v33 = vcombine.high %v1126_v21, %v1130_v46  ;;  %v9348_v58 = vcombine.low %v1126_v21, %v1130_v46 }
 0x496   :  { %7727 = vmatpush2.bf16.msra.mxu0 %v9260_v37  ;;  %v1250_v55 = vld [vmem:[#allocation6 + $0x1cf8] sm:$0xff] }
 0x497   :  { %7728 = vmatprep.subr.bf16.mxu0 %v9253_v60  ;;  %v1122_v31 = vld [vmem:[#allocation6 + $0x18f8] sm:$0xff]  ;;  %v9469_v49 = vcombine.high %v1246_v54, %v1250_v55  ;;  %v9468_v60 = vcombine.low %v1246_v54, %v1250_v55 }
 0x498   :  { %7686 = vmatpush2.bf16.msra.mxu1 %v9132_v61  ;;  %v1238_v37 = vld [vmem:[#allocation6 + $0x1c98] sm:$0xff] }
 0x499   :  { %7687 = vmatprep.subr.bf16.mxu1 %v9125_v4  ;;  %v1242_v23 = vld [vmem:[#allocation6 + $0x1cb8] sm:$0xff] }
 0x49a   :  { %7729 = vmatpush2.bf16.msra.mxu0 %v9252_v40  ;;  %v1110_v61 = vld [vmem:[#allocation6 + $0x1898] sm:$0xff]  ;;  %v9461_v62 = vcombine.high %v1238_v37, %v1242_v23 }
 0x49b   :  { %7780 = vmatprep.subr.bf16.mxu0 %v9501_v2  ;;  %v1114_v30 = vld [vmem:[#allocation6 + $0x18b8] sm:$0xff]  ;;  %v9460_v2 = vcombine.low %v1238_v37, %v1242_v23 }
 0x49c   :  { %7688 = vmatpush2.bf16.msra.mxu1 %v9124_v5  ;;  %v1230_v40 = vld [vmem:[#allocation6 + $0x1c58] sm:$0xff]  ;;  %v9333_v1 = vcombine.high %v1110_v61, %v1114_v30 }
 0x49d   :  { %v7486_v15 = vpop.f32.mrf.mxu0  ;;  %7731 = vmatmul.mubr.bf16.vlgmr.msra.gmra.mxu0 %v10126_v13  ;;  %7739 = vmatprep.subr.bf16.mxu1 %v9373_v48  ;;  %v9364_v13 = vcombine.low %v1142_v9, %v1146_v10  ;;  %v1234_v29 = vld [vmem:[#allocation6 + $0x1c78] sm:$0xff]  ;;  %v9332_v48 = vcombine.low %v1110_v61, %v1114_v30 }
 0x49e   :  { %7781 = vmatpush1.bf16.msra.mxu0 %v9500_v6  ;;  %7812 = vmatprep.mubr.bf16.mxu0 %v10124_v12  ;;  %v9357_v12 = vcombine.high %v1134_v39, %v1138_v8  ;;  %v1102_v5 = vld [vmem:[#allocation6 + $0x1858] sm:$0xff]  ;;  %v9453_v0 = vcombine.high %v1230_v40, %v1234_v29 }
 0x49f   :  { %v7445_v22 = vpop.f32.mrf.mxu1  ;;  %v7488_v11 = vpop.f32.mrf.mxu0  ;;  %7690 = vmatmul.mubr.bf16.vlgmr.msra.gmra.mxu1 %v10130_v17  ;;  %7782 = vmatprep.subr.bf16.mxu0 %v9493_v63  ;;  %v9484_v17 = vcombine.low %v1262_v3, %v1266_v14  ;;  %v1106_v59 = vld [vmem:[#allocation6 + $0x1878] sm:$0xff]  ;;  %v9452_v63 = vcombine.low %v1230_v40, %v1234_v29 }
 0x4a0   :  { %v7446_v26 = vadd.f32 %v7445_v22, %v10250_v56  ;;  %7740 = vmatpush1.bf16.msra.mxu1 %v9372_v32  ;;  %7771 = vmatprep.mubr.bf16.mxu1 %v10128_v16  ;;  %v1222_v6 = vld [vmem:[#allocation6 + $0x1c18] sm:$0xff]  ;;  %v9325_v10 = vcombine.high %v1102_v5, %v1106_v59 }
 0x4a1   :  { %v7447_v36 = vpop.f32.mrf.mxu1  ;;  %v7490_v19 = vpop.f32.mrf.mxu0  ;;  %7741 = vmatprep.subr.bf16.mxu1 %v9365_v7  ;;  %v1226_v9 = vld [vmem:[#allocation6 + $0x1c38] sm:$0xff] }
 0x4a2   :  { %v10259_v38 = vadd.f32 %v7486_v15, %v7446_v26  ;;  %v7448_v42 = vadd.f32 %v7447_v36, %v10252_v43  ;;  %7783 = vmatpush1.bf16.msra.mxu0 %v9492_v20  ;;  %v1118_v43 = vld [vmem:[#allocation6 + $0x18d8] sm:$0xff]  ;;  %v9445_v14 = vcombine.high %v1222_v6, %v1226_v9  ;;  %v9324_v15 = vcombine.low %v1102_v5, %v1106_v59 }
 0x4a3   :  { %v7449_v51 = vpop.f32.mrf.mxu1  ;;  %v7491_v56 = vpop.f32.mrf.mxu0  ;;  %7784 = vmatprep.subr.bf16.mxu0 %v9485_v25  ;;  %v9341_v53 = vcombine.high %v1118_v43, %v1122_v31  ;;  %v9340_v4 = vcombine.low %v1118_v43, %v1122_v31  ;;  %v1094_v32 = vld [vmem:[#allocation6 + $0x1818] sm:$0xff]  ;;  %v9444_v8 = vcombine.low %v1222_v6, %v1226_v9 }
 0x4a4   :  { %v10262_v16 = vadd.f32 %v7488_v11, %v7448_v42  ;;  %7742 = vmatpush1.bf16.msra.mxu1 %v9364_v13  ;;  %v1098_v3 = vld [vmem:[#allocation6 + $0x1838] sm:$0xff] }
 0x4a5   :  { %v7450_v50 = vpop.f32.mrf.mxu1  ;;  %7743 = vmatprep.subr.bf16.mxu1 %v9357_v12  ;;  %v1342_v7 = vld [vmem:[#allocation6 + $0x1fd8] sm:$0xff]  ;;  %v9317_v39 = vcombine.high %v1094_v32, %v1098_v3  ;;  %v9316_v26 = vcombine.low %v1094_v32, %v1098_v3 }
 0x4a6   :  { %7785 = vmatpush1.bf16.msra.mxu0 %v9484_v17  ;;  %v1346_v20 = vld [vmem:[#allocation6 + $0x1ff8] sm:$0xff] }
 0x4a7   :  { %7786 = vmatprep.subr.bf16.mxu0 %v9477_v44  ;;  %v1214_v22 = vld [vmem:[#allocation6 + $0x1bd8] sm:$0xff]  ;;  %v9565_v25 = vcombine.high %v1342_v7, %v1346_v20  ;;  %v9564_v36 = vcombine.low %v1342_v7, %v1346_v20 }
 0x4a8   :  { %7744 = vmatpush1.bf16.msra.mxu1 %v9356_v52  ;;  %v1218_v11 = vld [vmem:[#allocation6 + $0x1bf8] sm:$0xff] }
 0x4a9   :  { %7745 = vmatprep.subr.bf16.mxu1 %v9349_v33  ;;  %v1334_v13 = vld [vmem:[#allocation6 + $0x1f98] sm:$0xff]  ;;  %v9437_v34 = vcombine.high %v1214_v22, %v1218_v11  ;;  %v9436_v17 = vcombine.low %v1214_v22, %v1218_v11 }
 0x4aa   :  { %7787 = vmatpush1.bf16.msra.mxu0 %v9476_v24  ;;  %v1338_v27 = vld [vmem:[#allocation6 + $0x1fb8] sm:$0xff] }
 0x4ab   :  { %7788 = vmatprep.subr.bf16.mxu0 %v9469_v49  ;;  %v1206_v19 = vld [vmem:[#allocation6 + $0x1b98] sm:$0xff]  ;;  %v9557_v42 = vcombine.high %v1334_v13, %v1338_v27  ;;  %v9556_v56 = vcombine.low %v1334_v13, %v1338_v27 }
 0x4ac   :  { %7746 = vmatpush1.bf16.msra.mxu1 %v9348_v58  ;;  %v1210_v12 = vld [vmem:[#allocation6 + $0x1bb8] sm:$0xff] }
 0x4ad   :  { %7747 = vmatprep.subr.bf16.mxu1 %v9341_v53  ;;  %v1326_v21 = vld [vmem:[#allocation6 + $0x1f58] sm:$0xff]  ;;  %v9429_v51 = vcombine.high %v1206_v19, %v1210_v12  ;;  %v9428_v55 = vcombine.low %v1206_v19, %v1210_v12  ;;  %v7824_v19 = vmax.f32 %v10222_v35, 0.0 }
 0x4ae   :  { %7789 = vmatpush1.bf16.msra.mxu0 %v9468_v60  ;;  %v1330_v46 = vld [vmem:[#allocation6 + $0x1f78] sm:$0xff] }
 0x4af   :  { %7790 = vmatprep.subr.bf16.mxu0 %v9461_v62  ;;  %v1198_v44 = vld [vmem:[#allocation6 + $0x1b58] sm:$0xff]  ;;  %v9549_v54 = vcombine.high %v1326_v21, %v1330_v46  ;;  %v9548_v43 = vcombine.low %v1326_v21, %v1330_v46  ;;  %v7822_v21 = vmax.f32 %v10182_v57, 0.0  ;;  %v9766_v46 = vld [vmem:[#allocation9 + $0xb8] sm:$0xff]  }
 0x4b0   :  { %7748 = vmatpush1.bf16.msra.mxu1 %v9340_v4  ;;  %v1202_v52 = vld [vmem:[#allocation6 + $0x1b78] sm:$0xff] }
 0x4b1   :  { %7749 = vmatprep.subr.bf16.mxu1 %v9333_v1  ;;  %v1318_v50 = vld [vmem:[#allocation6 + $0x1f18] sm:$0xff]  ;;  %v9421_v24 = vcombine.high %v1198_v44, %v1202_v52  ;;  %v9420_v37 = vcombine.low %v1198_v44, %v1202_v52  ;;  %v7832_v44 = vpack.c.bf16 %v7824_v19, %v7824_v19  ;;  %v9831_v52 = vld [vmem:[#allocation7] sm:$0xff] }
 0x4b2   :  { %7791 = vmatpush1.bf16.msra.mxu0 %v9460_v2  ;;  %v1322_v33 = vld [vmem:[#allocation6 + $0x1f38] sm:$0xff] }
 0x4b3   :  { %7792 = vmatprep.subr.bf16.mxu0 %v9453_v0  ;;  %v1190_v31 = vld [vmem:[#allocation6 + $0x1b18] sm:$0xff]  ;;  %v9541_v58 = vcombine.high %v1318_v50, %v1322_v33  ;;  %v9540_v61 = vcombine.low %v1318_v50, %v1322_v33  ;;  %v7830_v33 = vpack.c.bf16 %v7822_v21, %v7822_v21 }
 0x4b4   :  { %7750 = vmatpush1.bf16.msra.mxu1 %v9332_v48  ;;  %v1194_v49 = vld [vmem:[#allocation6 + $0x1b38] sm:$0xff] }
 0x4b5   :  { %7751 = vmatprep.subr.bf16.mxu1 %v9325_v10  ;;  %v1310_v23 = vld [vmem:[#allocation6 + $0x1ed8] sm:$0xff]  ;;  %v9413_v60 = vcombine.high %v1190_v31, %v1194_v49  ;;  %v9412_v40 = vcombine.low %v1190_v31, %v1194_v49 }
 0x4b6   :  { %7793 = vmatpush1.bf16.msra.mxu0 %v9452_v63  ;;  %v1314_v53 = vld [vmem:[#allocation6 + $0x1ef8] sm:$0xff] }
 0x4b7   :  { %7794 = vmatprep.subr.bf16.mxu0 %v9445_v14  ;;  %v1182_v30 = vld [vmem:[#allocation6 + $0x1ad8] sm:$0xff]  ;;  %v9533_v4 = vcombine.high %v1310_v23, %v1314_v53  ;;  %v9532_v5 = vcombine.low %v1310_v23, %v1314_v53 }
 0x4b8   :  { %7752 = vmatpush1.bf16.msra.mxu1 %v9324_v15  ;;  %v1186_v62 = vld [vmem:[#allocation6 + $0x1af8] sm:$0xff] }
 0x4b9   :  { %7753 = vmatprep.subr.bf16.mxu1 %v9317_v39  ;;  %v1302_v29 = vld [vmem:[#allocation6 + $0x1e98] sm:$0xff]  ;;  %v9405_v2 = vcombine.high %v1182_v30, %v1186_v62  ;;  %v9404_v6 = vcombine.low %v1182_v30, %v1186_v62 }
 0x4ba   :  { %7795 = vmatpush1.bf16.msra.mxu0 %v9444_v8  ;;  %v1306_v1 = vld [vmem:[#allocation6 + $0x1eb8] sm:$0xff] }
 0x4bb   :  { %7796 = vmatprep.subr.bf16.mxu0 %v9565_v25  ;;  %v1174_v59 = vld [vmem:[#allocation6 + $0x1a98] sm:$0xff]  ;;  %v9525_v48 = vcombine.high %v1302_v29, %v1306_v1  ;;  %v9524_v32 = vcombine.low %v1302_v29, %v1306_v1  ;;  %v9779_v1 = vld [vmem:[#allocation9 + $0x60] sm:$0xff]  }
 0x4bc   :  { %7754 = vmatpush1.bf16.msra.mxu1 %v9316_v26  ;;  %v1178_v0 = vld [vmem:[#allocation6 + $0x1ab8] sm:$0xff] }
 0x4bd   :  { %7755 = vmatprep.subr.bf16.mxu1 %v9437_v34  ;;  %v1294_v9 = vld [vmem:[#allocation6 + $0x1e58] sm:$0xff]  ;;  %v9397_v63 = vcombine.high %v1174_v59, %v1178_v0  ;;  %v9396_v7 = vcombine.low %v1174_v59, %v1178_v0  ;;  %v9780_v59 = vld [vmem:[#allocation9 + $0x20] sm:$0xff]   ;;  %v9783_v0 = vld [vmem:[#allocation9 + $0x58] sm:$0xff]  }
 0x4be   :  { %7797 = vmatpush2.bf16.msra.mxu0 %v9564_v36  ;;  %v1298_v10 = vld [vmem:[#allocation6 + $0x1e78] sm:$0xff]  ;;  %v9765_v36 = vld [vmem:[#allocation9 + $0xf8] sm:$0xff]  }
 0x4bf   :  { %7798 = vmatprep.subr.bf16.mxu0 %v9557_v42  ;;  %v1166_v3 = vld [vmem:[#allocation6 + $0x1a58] sm:$0xff]  ;;  %v9517_v15 = vcombine.high %v1294_v9, %v1298_v10  ;;  %v9516_v22 = vcombine.low %v1294_v9, %v1298_v10  ;;  %v1375_v42 = vsub.s32 6, %v10136_v45  ;;  %v9784_v9 = vld [vmem:[#allocation9 + $0x18] sm:$0xff]  }
 0x4c0   :  { %7756 = vmatpush2.bf16.msra.mxu1 %v9436_v17  ;;  %v1170_v14 = vld [vmem:[#allocation6 + $0x1a78] sm:$0xff]  ;;  %v9767_v17 = vld [vmem:[#allocation9 + $0x78] sm:$0xff]  }
 0x4c1   :  { %7757 = vmatprep.subr.bf16.mxu1 %v9429_v51  ;;  %v1286_v20 = vld [vmem:[#allocation6 + $0x1e18] sm:$0xff]  ;;  %v9389_v8 = vcombine.high %v1166_v3, %v1170_v14  ;;  %v9388_v13 = vcombine.low %v1166_v3, %v1170_v14  ;;  %v1379_v51 = vsub.s32 7, %v10136_v45  ;;  %v9773_v45 = vld [vmem:[#allocation9 + $0xe8] sm:$0xff]  }
 0x4c2   :  { %7799 = vmatpush2.bf16.msra.mxu0 %v9556_v56  ;;  %v1290_v39 = vld [vmem:[#allocation6 + $0x1e38] sm:$0xff]  ;;  %v9791_v14 = vld [vmem:[#allocation9 + $0x48] sm:$0xff]  }
 0x4c3   :  { %7800 = vmatprep.subr.bf16.mxu0 %v9549_v54  ;;  %v1158_v11 = vld [vmem:[#allocation6 + $0x1a18] sm:$0xff]  ;;  %v9509_v26 = vcombine.high %v1286_v20, %v1290_v39  ;;  %v9508_v34 = vcombine.low %v1286_v20, %v1290_v39  ;;  %v1376_v54 = vrot.slane %v9831_v52, %v1375_v42  ;;  %v1380_v57 = vrot.slane %v9831_v52, %v1379_v51  ;;  %v9792_v20 = vld [vmem:[#allocation9 + $0x8] sm:$0xff]   ;;  %v9795_v39 = vld [vmem:[#allocation9 + $0x40] sm:$0xff]  }
 0x4c4   :  { %7758 = vmatpush2.bf16.msra.mxu1 %v9428_v55  ;;  %v1162_v25 = vld [vmem:[#allocation6 + $0x1a38] sm:$0xff]  ;;  %v9768_v55 = vld [vmem:[#allocation9 + $0x38] sm:$0xff]   ;;  %v9818_v51 = vld [vmem:[#allocation9 + $0x1a8] sm:$0xff]  }
 0x4c5   :  { %7759 = vmatprep.subr.bf16.mxu1 %v9421_v24  ;;  %v9381_v27 = vcombine.high %v1158_v11, %v1162_v25  ;;  %v9380_v12 = vcombine.low %v1158_v11, %v1162_v25  ;;  %v9769_v56 = vld [vmem:[#allocation9 + $0xf0] sm:$0xff]   ;;  %v9813_v11 = vld [vmem:[#allocation9 + $0x1f8] sm:$0xff]   ;;  %v9796_v25 = vld [vmem:[#allocation9] sm:$0xff]  }
 0x4c6   :  { %7801 = vmatpush2.bf16.msra.mxu0 %v9548_v43  ;;  %v9771_v50 = vld [vmem:[#allocation9 + $0x70] sm:$0xff]   ;;  %v9803_v52 = vld [vmem:[#allocation9 + $0x160] sm:$0xff]  }
 0x4c7   :  { %7802 = vmatprep.subr.bf16.mxu0 %v9541_v58  ;;  %v9770_v24 = vld [vmem:[#allocation9 + $0xb0] sm:$0xff]  }
 0x4c8   :  { %7760 = vmatpush2.bf16.msra.mxu1 %v9420_v37  ;;  %v9772_v58 = vld [vmem:[#allocation9 + $0x30] sm:$0xff]  }
 0x4c9   :  { %7761 = vmatprep.subr.bf16.mxu1 %v9413_v60  ;;  %v9774_v60 = vld [vmem:[#allocation9 + $0xa8] sm:$0xff]   ;;  %v9787_v10 = vld [vmem:[#allocation9 + $0x50] sm:$0xff]  }
 0x4ca   :  { %7803 = vmatpush2.bf16.msra.mxu0 %v9540_v61  ;;  %v9788_v3 = vld [vmem:[#allocation9 + $0x10] sm:$0xff]  }
 0x4cb   :  { %7804 = vmatprep.subr.bf16.mxu0 %v9533_v4  ;;  %v9777_v4 = vld [vmem:[#allocation9 + $0xe0] sm:$0xff]   ;;  %v9815_v19 = vld [vmem:[#allocation9 + $0x1f0] sm:$0xff]  }
 0x4cc   :  { %7762 = vmatpush2.bf16.msra.mxu1 %v9412_v40  ;;  %v9816_v21 = vld [vmem:[#allocation9 + $0x1b0] sm:$0xff]  }
 0x4cd   :  { %7763 = vmatprep.subr.bf16.mxu1 %v9405_v2  ;;  %v9778_v2 = vld [vmem:[#allocation9 + $0xa0] sm:$0xff]  }
 0x4ce   :  { %7805 = vmatpush2.bf16.msra.mxu0 %v9532_v5  ;;  %v9781_v5 = vld [vmem:[#allocation9 + $0xd8] sm:$0xff]  }
 0x4cf   :  { %7806 = vmatprep.subr.bf16.mxu0 %v9525_v48  ;;  %v9782_v48 = vld [vmem:[#allocation9 + $0x98] sm:$0xff]  }
 0x4d0   :  { %7764 = vmatpush2.bf16.msra.mxu1 %v9404_v6  ;;  %v9785_v6 = vld [vmem:[#allocation9 + $0xd0] sm:$0xff]  }
 0x4d1   :  { %7765 = vmatprep.subr.bf16.mxu1 %v9397_v63  ;;  %v9786_v63 = vld [vmem:[#allocation9 + $0x90] sm:$0xff]  }
 0x4d2   :  { %7807 = vmatpush2.bf16.msra.mxu0 %v9524_v32  ;;  %v9789_v32 = vld [vmem:[#allocation9 + $0xc8] sm:$0xff]  }
 0x4d3   :  { %7808 = vmatprep.subr.bf16.mxu0 %v9517_v15  ;;  %v9790_v15 = vld [vmem:[#allocation9 + $0x88] sm:$0xff]  }
 0x4d4   :  { %7766 = vmatpush2.bf16.msra.mxu1 %v9396_v7  ;;  %v9793_v7 = vld [vmem:[#allocation9 + $0xc0] sm:$0xff]  }
 0x4d5   :  { %7767 = vmatprep.subr.bf16.mxu1 %v9389_v8  ;;  %v9794_v8 = vld [vmem:[#allocation9 + $0x80] sm:$0xff]  }
 0x4d6   :  { %7809 = vmatpush2.bf16.msra.mxu0 %v9516_v22  ;;  %v7823_v22 = vmax.f32 %v10219_v28, 0.0  ;;  %v9799_v28 = vld [vmem:[#allocation9 + $0x170] sm:$0xff]  }
 0x4d7   :  { %7810 = vmatprep.subr.bf16.mxu0 %v9509_v26  ;;  %v7821_v26 = vmax.f32 %v10179_v47, 0.0  ;;  %v9817_v47 = vld [vmem:[#allocation9 + $0x1e8] sm:$0xff]  }
 0x4d8   :  { %7768 = vmatpush2.bf16.msra.mxu1 %v9388_v13  ;;  %v9797_v13 = vld [vmem:[#allocation9 + $0x178] sm:$0xff]  }
 0x4d9   :  { %7769 = vmatprep.subr.bf16.mxu1 %v9381_v27  ;;  %v7826_v27 = vmax.f32 %v10262_v16, 0.0  ;;  %v7829_v42 = vpack.c.bf16 %v7821_v26, %v7821_v26  ;;  %v9800_v16 = vld [vmem:[#allocation9 + $0x130] sm:$0xff]  }
 0x4da   :  { %7811 = vmatpush2.bf16.msra.mxu0 %v9508_v34  ;;  %v9814_v34 = vld [vmem:[#allocation9 + $0x1b8] sm:$0xff]  }
 0x4db   :  { %9662 = vmatprep.subr.bf16.mxu0 %v9765_v36  ;;  %v7831_v36 = vpack.c.bf16 %v7823_v22, %v7823_v22 }
 0x4dc   :  { %7770 = vmatpush2.bf16.msra.mxu1 %v9380_v12  ;;  %v9798_v12 = vld [vmem:[#allocation9 + $0x138] sm:$0xff]  }
 0x4dd   :  { %v7568_v35 = vpop.f32.mrf.mxu0  ;;  %7813 = vmatmul.mubr.bf16.vlgmr.msra.gmra.mxu0 %v10142_v41  ;;  %9640 = vmatprep.subr.bf16.mxu1 %v9767_v17  ;;  %v9775_v41 = vld [vmem:[#allocation9 + $0x68] sm:$0xff]   ;;  %v7834_v17 = vpack.c.bf16 %v7826_v27, %v7826_v27 }
 0x4de   :  { %9663 = vmatpush3.bf16.msra.mxu0 %v9766_v46  ;;  %8428 = vmatprep.mubr.bf16.mxu0 %v7832_v44  ;;  %v9801_v46 = vld [vmem:[#allocation9 + $0x168] sm:$0xff]  }
 0x4df   :  { %v7527_v43 = vpop.f32.mrf.mxu1  ;;  %v7570_v31 = vpop.f32.mrf.mxu0  ;;  %7772 = vmatmul.mubr.bf16.vlgmr.msra.gmra.mxu1 %v10144_v18  ;;  %9664 = vmatprep.subr.bf16.mxu0 %v9769_v56  ;;  %v9776_v18 = vld [vmem:[#allocation9 + $0x28] sm:$0xff]   ;;  %v9819_v56 = vld [vmem:[#allocation9 + $0x1e0] sm:$0xff]  }
 0x4e0   :  { %v7528_v49 = vadd.f32 %v7527_v43, %v1376_v54  ;;  %9641 = vmatpush3.bf16.msra.mxu1 %v9768_v55  ;;  %8388 = vmatprep.mubr.bf16.mxu1 %v7830_v33  ;;  %v9802_v44 = vld [vmem:[#allocation9 + $0x128] sm:$0xff]   ;;  %v9820_v54 = vld [vmem:[#allocation9 + $0x1a0] sm:$0xff]   ;;  %v9821_v55 = vld [vmem:[#allocation9 + $0x1d8] sm:$0xff]  }
 0x4e1   :  { %v7529_v37 = vpop.f32.mrf.mxu1  ;;  %v7572_v23 = vpop.f32.mrf.mxu0  ;;  %9642 = vmatprep.subr.bf16.mxu1 %v9771_v50  ;;  %v9805_v50 = vld [vmem:[#allocation9 + $0x158] sm:$0xff]   ;;  %v9808_v43 = vld [vmem:[#allocation9 + $0x110] sm:$0xff]  }
 0x4e2   :  { %v7530_v53 = vadd.f32 %v7529_v37, %v1380_v57  ;;  %9665 = vmatpush3.bf16.msra.mxu0 %v9770_v24  ;;  %v10270_v61 = vadd.f32 %v7568_v35, %v7528_v49  ;;  %v9804_v35 = vld [vmem:[#allocation9 + $0x120] sm:$0xff]   ;;  %v9822_v33 = vld [vmem:[#allocation9 + $0x198] sm:$0xff]   ;;  %v9807_v24 = vld [vmem:[#allocation9 + $0x150] sm:$0xff]   ;;  %v7825_v37 = vmax.f32 %v10259_v38, 0.0 }
 0x4e3   :  { %v7531_v30 = vpop.f32.mrf.mxu1  ;;  %v7573_v62 = vpop.f32.mrf.mxu0  ;;  %9666 = vmatprep.subr.bf16.mxu0 %v9773_v45  ;;  %v9806_v57 = vld [vmem:[#allocation9 + $0x118] sm:$0xff]   ;;  %v9810_v45 = vld [vmem:[#allocation9 + $0x108] sm:$0xff]   ;;  %v9811_v49 = vld [vmem:[#allocation9 + $0x140] sm:$0xff]  }
 0x4e4   :  { %9643 = vmatpush3.bf16.msra.mxu1 %v9772_v58  ;;  %v10272_v40 = vadd.f32 %v7570_v31, %v7530_v53  ;;  %v9809_v31 = vld [vmem:[#allocation9 + $0x148] sm:$0xff]   ;;  %v9812_v58 = vld [vmem:[#allocation9 + $0x100] sm:$0xff]   ;;  %v7833_v23 = vpack.c.bf16 %v7825_v37, %v7825_v37  ;;  %v9823_v53 = vld [vmem:[#allocation9 + $0x1d0] sm:$0xff]  }
 0x4e5   :  { %v7532_v29 = vpop.f32.mrf.mxu1  ;;  %9644 = vmatprep.subr.bf16.mxu1 %v9775_v41  ;;  %v9826_v38 = vld [vmem:[#allocation9 + $0x188] sm:$0xff]  }
 0x4e6   :  { %9667 = vmatpush3.bf16.msra.mxu0 %v9774_v60  ;;  %v9824_v60 = vld [vmem:[#allocation9 + $0x190] sm:$0xff]  }
 0x4e7   :  { %9668 = vmatprep.subr.bf16.mxu0 %v9777_v4 }
 0x4e8   :  { %9645 = vmatpush3.bf16.msra.mxu1 %v9776_v18 }
 0x4e9   :  { %9646 = vmatprep.subr.bf16.mxu1 %v9779_v1  ;;  %v9825_v1 = vld [vmem:[#allocation9 + $0x1c8] sm:$0xff]  }
 0x4ea   :  { %9669 = vmatpush3.bf16.msra.mxu0 %v9778_v2 }
 0x4eb   :  { %9670 = vmatprep.subr.bf16.mxu0 %v9781_v5 }
 0x4ec   :  { %9647 = vmatpush3.bf16.msra.mxu1 %v9780_v59 }
 0x4ed   :  { %9648 = vmatprep.subr.bf16.mxu1 %v9783_v0 }
 0x4ee   :  { %9671 = vmatpush3.bf16.msra.mxu0 %v9782_v48 }
 0x4ef   :  { %9672 = vmatprep.subr.bf16.mxu0 %v9785_v6 }
 0x4f0   :  { %9649 = vmatpush3.bf16.msra.mxu1 %v9784_v9  ;;  %v9827_v9 = vld [vmem:[#allocation9 + $0x1c0] sm:$0xff]  }
 0x4f1   :  { %9650 = vmatprep.subr.bf16.mxu1 %v9787_v10  ;;  %v9828_v10 = vld [vmem:[#allocation9 + $0x180] sm:$0xff]  }
 0x4f2   :  { %9673 = vmatpush3.bf16.msra.mxu0 %v9786_v63 }
 0x4f3   :  { %9674 = vmatprep.subr.bf16.mxu0 %v9789_v32 }
 0x4f4   :  { %9651 = vmatpush3.bf16.msra.mxu1 %v9788_v3 }
 0x4f5   :  { %9652 = vmatprep.subr.bf16.mxu1 %v9791_v14 }
 0x4f6   :  { %9675 = vmatpush3.bf16.msra.mxu0 %v9790_v15 }
 0x4f7   :  { %9676 = vmatprep.subr.bf16.mxu0 %v9793_v7 }
 0x4f8   :  { %9653 = vmatpush3.bf16.msra.mxu1 %v9792_v20 }
 0x4f9   :  { %9654 = vmatprep.subr.bf16.mxu1 %v9795_v39 }
 0x4fa   :  { %9677 = vmatpush3.bf16.msra.mxu0 %v9794_v8 }
 0x4fb   :  { %9706 = vmatprep.subr.bf16.mxu0 %v9813_v11 }
 0x4fc   :  { %9655 = vmatpush3.bf16.msra.mxu1 %v9796_v25 }
 0x4fd   :  { %8429 = vmatmul.mubr.bf16.vlgmr.msra.gmra.mxu0 %v7831_v36  ;;  %9684 = vmatprep.subr.bf16.mxu1 %v9797_v13 }
 0x4fe   :  { %9707 = vmatpush3.bf16.msra.mxu0 %v9814_v34 }
 0x4ff   :  { %8389 = vmatmul.mubr.bf16.vlgmr.msra.gmra.mxu1 %v7829_v42  ;;  %9708 = vmatprep.subr.bf16.mxu0 %v9815_v19 }
 0x500   :  { %9685 = vmatpush3.bf16.msra.mxu1 %v9798_v12  ;;  %8468 = vmatprep.mubr.bf16.mxu1 %v7834_v17 }
 0x501   :  { %9686 = vmatprep.subr.bf16.mxu1 %v9799_v28 }
 0x502   :  { %9709 = vmatpush3.bf16.msra.mxu0 %v9816_v21 }
 0x503   :  { %9710 = vmatprep.subr.bf16.mxu0 %v9817_v47 }
 0x504   :  { %9687 = vmatpush3.bf16.msra.mxu1 %v9800_v16 }
 0x505   :  { %9688 = vmatprep.subr.bf16.mxu1 %v9801_v46 }
 0x506   :  { %9711 = vmatpush3.bf16.msra.mxu0 %v9818_v51 }
 0x507   :  { %9712 = vmatprep.subr.bf16.mxu0 %v9819_v56 }
 0x508   :  { %9689 = vmatpush3.bf16.msra.mxu1 %v9802_v44 }
 0x509   :  { %9690 = vmatprep.subr.bf16.mxu1 %v9803_v52 }
 0x50a   :  { %9713 = vmatpush3.bf16.msra.mxu0 %v9820_v54  ;;  %v9566_v54 = vld [vmem:[#allocation10] ss:$0 sm:$0xff] }
 0x50b   :  { %9714 = vmatprep.subr.bf16.mxu0 %v9821_v55 }
 0x50c   :  { %9691 = vmatpush3.bf16.msra.mxu1 %v9804_v35 }
 0x50d   :  { %9692 = vmatprep.subr.bf16.mxu1 %v9805_v50 }
 0x50e   :  { %9715 = vmatpush3.bf16.msra.mxu0 %v9822_v33 }
 0x50f   :  { %9716 = vmatprep.subr.bf16.mxu0 %v9823_v53 }
 0x510   :  { %9693 = vmatpush3.bf16.msra.mxu1 %v9806_v57 }
 0x511   :  { %9694 = vmatprep.subr.bf16.mxu1 %v9807_v24 }
 0x512   :  { %9717 = vmatpush3.bf16.msra.mxu0 %v9824_v60 }
 0x513   :  { %9718 = vmatprep.subr.bf16.mxu0 %v9825_v1 }
 0x514   :  { %9695 = vmatpush3.bf16.msra.mxu1 %v9808_v43 }
 0x515   :  { %9696 = vmatprep.subr.bf16.mxu1 %v9809_v31 }
 0x516   :  { %9719 = vmatpush3.bf16.msra.mxu0 %v9826_v38 }
 0x517   :  { %9720 = vmatprep.subr.bf16.mxu0 %v9827_v9 }
 0x518   :  { %9697 = vmatpush3.bf16.msra.mxu1 %v9810_v45 }
 0x519   :  { %9698 = vmatprep.subr.bf16.mxu1 %v9811_v49 }
 0x51a   :  { %9721 = vmatpush3.bf16.msra.mxu0 %v9828_v10 }
 0x51c   :  { %9699 = vmatpush3.bf16.msra.mxu1 %v9812_v58 }
 0x51d   :  { %v7650_v41 = vpop.f32.mrf.mxu0 }
 0x51f   :  { %v7609_v30 = vpop.f32.mrf.mxu1  ;;  %v7652_v62 = vpop.f32.mrf.mxu0  ;;  %8469 = vmatmul.mubr.bf16.vlgmr.msra.gmra.mxu1 %v7833_v23 }
 0x520   :  { %v7610_v4 = vadd.f32 %v7609_v30, %v10270_v61 }
 0x521   :  { %v7611_v18 = vpop.f32.mrf.mxu1  ;;  %v7654_v29 = vpop.f32.mrf.mxu0 }
 0x522   :  { %v7612_v2 = vadd.f32 %v7611_v18, %v10272_v40  ;;  %v7651_v5 = vadd.f32 %v7650_v41, %v7610_v4 }
 0x523   :  { %v7613_v59 = vpop.f32.mrf.mxu1  ;;  %v7655_v0 = vpop.f32.mrf.mxu0 }
 0x524   :  { %v7653_v48 = vadd.f32 %v7652_v62, %v7612_v2 }
 0x525   :  { %v7614_v6 = vpop.f32.mrf.mxu1 }
 0x55d   :  { %v7732_v63 = vpop.f32.mrf.mxu0 }
 0x55f   :  { %v7691_v61 = vpop.f32.mrf.mxu1  ;;  %v7734_v32 = vpop.f32.mrf.mxu0 }
 0x560   :  { %v7692_v3 = vadd.f32 %v7691_v61, %v7651_v5 }
 0x561   :  { %v7693_v14 = vpop.f32.mrf.mxu1  ;;  %v7736_v15 = vpop.f32.mrf.mxu0 }
 0x562   :  { %v7694_v7 = vadd.f32 %v7693_v14, %v7653_v48  ;;  %v7733_v40 = vadd.f32 %v7732_v63, %v7692_v3 }
 0x563   :  { %v7695_v20 = vpop.f32.mrf.mxu1  ;;  %v7737_v39 = vpop.f32.mrf.mxu0 }
 0x564   :  { %v7735_v8 = vadd.f32 %v7734_v32, %v7694_v7 }
 0x565   :  { %v7696_v22 = vpop.f32.mrf.mxu1 }
 0x59d   :  { %v7814_v11 = vpop.f32.mrf.mxu0 }
 0x59f   :  { %v7773_v25 = vpop.f32.mrf.mxu1  ;;  %v7816_v26 = vpop.f32.mrf.mxu0 }
 0x5a0   :  { %v7774_v13 = vadd.f32 %v7773_v25, %v7733_v40 }
 0x5a1   :  { %v7775_v27 = vpop.f32.mrf.mxu1  ;;  %v7818_v34 = vpop.f32.mrf.mxu0 }
 0x5a2   :  { %v7815_v36 = vadd.f32 %v7814_v11, %v7774_v13  ;;  %v7776_v19 = vadd.f32 %v7775_v27, %v7735_v8 }
 0x5a3   :  { %v7777_v12 = vpop.f32.mrf.mxu1  ;;  %v7819_v42 = vpop.f32.mrf.mxu0 }
 0x5a4   :  { %v7817_v28 = vadd.f32 %v7816_v26, %v7776_v19  ;;  %v7827_v17 = vmax.f32 %v7815_v36, 0.0 }
 0x5a5   :  { %v7778_v21 = vpop.f32.mrf.mxu1 }
 0x5a6   :  { %v7828_v47 = vmax.f32 %v7817_v28, 0.0  ;;  %v7835_v46 = vpack.c.bf16 %v7827_v17, %v7827_v17 }
 0x5a8   :  { %v7836_v16 = vpack.c.bf16 %v7828_v47, %v7828_v47 }
 0x5aa   :  { %8508 = vmatprep.mubr.bf16.mxu0 %v7836_v16 }
 0x5ab   :  { %8509 = vmatmul.mubr.bf16.vlgmr.msra.gmra.mxu0 %v7835_v46 }
 0x5bd   :  { %v9678_v51 = vpop.f32.mrf.mxu0 }
 0x5bf   :  { %v9656_v56 = vpop.f32.mrf.mxu1  ;;  %v9679_v44 = vpop.f32.mrf.mxu0 }
 0x5c0   :  { %v9680_v52 = vadd.f32 %v9679_v44, %v9678_v51 }
 0x5c1   :  { %v9657_v55 = vpop.f32.mrf.mxu1  ;;  %v9681_v35 = vpop.f32.mrf.mxu0 }
 0x5c2   :  { %v9658_v50 = vadd.f32 %v9657_v55, %v9656_v56 }
 0x5c3   :  { %v9659_v33 = vpop.f32.mrf.mxu1  ;;  %v9682_v57 = vpop.f32.mrf.mxu0 }
 0x5c4   :  { %v8391_v24 = vadd.f32 %v9658_v50, %v9566_v54 }
 0x5c5   :  { %v9660_v43 = vpop.f32.mrf.mxu1 }
 0x5c6   :  { %v8431_v31 = vadd.f32 %v9680_v52, %v8391_v24 }
 0x5df   :  { %v9700_v45 = vpop.f32.mrf.mxu1 }
 0x5e1   :  { %v9701_v49 = vpop.f32.mrf.mxu1 }
 0x5e2   :  { %v9702_v58 = vadd.f32 %v9701_v49, %v9700_v45 }
 0x5e3   :  { %v9703_v37 = vpop.f32.mrf.mxu1 }
 0x5e4   :  { %v8471_v23 = vadd.f32 %v9702_v58, %v8431_v31 }
 0x5e5   :  { %v9704_v41 = vpop.f32.mrf.mxu1 }
 0x66b   :  { %v9722_v53 = vpop.f32.mrf.mxu0 }
 0x66d   :  { %v9723_v60 = vpop.f32.mrf.mxu0 }
 0x66e   :  { %v9724_v30 = vadd.f32 %v9723_v60, %v9722_v53 }
 0x66f   :  { %v9725_v62 = vpop.f32.mrf.mxu0 }
 0x670   :  { %v8511_v4 = vadd.f32 %v9724_v30, %v8471_v23 }
 0x671   :  { %v9726_v18 = vpop.f32.mrf.mxu0 }
 0x672   :  { %8516 = vst [vmem:[%s10290_s7] sm:$0xff] %v8511_v4 }
 0x673   :  { %8521 = vsyncpa [#allocation3], 1 }
 0x674   :  { %8522 = vsyncpa [#allocation5], 1 }
 0x675   :  { %8523 = vsyncpa [#allocation8], 1 }
 0x676   :  { %8524 = vsyncpa [#allocation11], 1 }

</bundles_post_ra>
